<compile_context>
chip_gen: v5e
topology: v5e:2x2
jax: 0.10.0
libtpu: 0.0.40
codegen_flags: <defaults>
</compile_context>

<pallas_src>
import numpy as np
import jax
import jax.numpy as jnp
from jax.experimental import pallas as pl
from jax.experimental.pallas import tpu as pltpu

CAPACITY = 64
LATENT_DIMS = 2
K = 4          # kernel size
S = 2          # stride
P = 1          # padding

C2_IN = 2 * CAPACITY      # 128
C2_OUT = CAPACITY         # 64
H_FC, W_FC = 7, 7
N_FC = H_FC * W_FC        # 49
H_MID, W_MID = 14, 14
N_MID = H_MID * W_MID     # 196
H_OUT, W_OUT = 28, 28
N_TAP = K * K             # 16

# For a stride-2 transposed conv, output row u = 2*m + r reads input row
# i = m - delta through kernel tap kh:   r -> ((kh, delta), (kh, delta))
_PHASE_TAPS = {0: ((1, 0), (3, 1)), 1: ((0, -1), (2, 0))}


# ---------------------------------------------------------------------------
# Fused kernel: one image per grid step. Layout is "transposed": channels in
# sublanes (rows), flattened spatial pixels in lanes.
# ---------------------------------------------------------------------------
def _decoder_kernel(z_ref, b1_ref, mask_ref, wfc_ref, bfc_ref, w2_ref,
                    s2_ref, b2_ref, w1_ref, out_ref):
    img = pl.program_id(0)
    z0 = z_ref[img, 0]
    z1 = z_ref[img, 1]

    # ---- fc: latent contraction (K=2) as a VPU broadcast-FMA -------------
    #   a_t[ci, p] = z0 * Wfc[0, ci, p] + z1 * Wfc[1, ci, p] + bfc[ci, p]
    a_t = z0 * wfc_ref[0] + z1 * wfc_ref[1] + bfc_ref[...]        # (128, 49)

    # ---- conv2 matmul on the MXU ------------------------------------------
    #   y2_t[(kh,kw,co), p] = sum_ci W2[(kh,kw,co), ci] * a_t[ci, p]
    y2_t = jnp.dot(w2_ref[...], a_t,
                   preferred_element_type=jnp.float32)            # (1024, 49)

    # ---- conv2 col2im: scatter each of the 16 tap slabs with a precomputed
    #      0/1 (49 -> 196) matrix; everything stays in VMEM ------------------
    x2_t = jnp.zeros((C2_OUT, N_MID), jnp.float32)                # (64, 196)
    for t in range(N_TAP):
        tap = y2_t[t * C2_OUT:(t + 1) * C2_OUT, :]                # (64, 49)
        x2_t = x2_t + jnp.dot(tap, s2_ref[t],
                              preferred_element_type=jnp.float32)

    # ---- conv2 bias + ReLU --------------------------------------------------
    x2_t = jnp.maximum(x2_t + b2_ref[...], 0.0)                   # (64, 196)

    # ---- conv1 matmul (transposed form: pixels stay in lanes) --------------
    #   y1_t[(kh,kw), q] = sum_ci W1[(kh,kw), ci] * x2_t[ci, q]
    y1_t = jnp.dot(w1_ref[...], x2_t,
                   preferred_element_type=jnp.float32)            # (16, 196)

    # ---- conv1 col2im: stride-2 phase decomposition via lane shifts --------
    mask_n0 = mask_ref[0:1, :]    # zero lanes where column n == 0   (eps=+1)
    mask_n13 = mask_ref[1:2, :]   # zero lanes where column n == 13  (eps=-1)

    def shifted_tap(kh, kw, delta, eps):
        row = y1_t[kh * K + kw:kh * K + kw + 1, :]                # (1, 196)
        d = W_MID * delta + eps                                   # lane shift
        if d > 0:
            row = jnp.concatenate(
                [jnp.zeros((1, d), jnp.float32), row[:, :N_MID - d]], axis=1)
        elif d < 0:
            row = jnp.concatenate(
                [row[:, -d:], jnp.zeros((1, -d), jnp.float32)], axis=1)
        if eps == 1:
            row = row * mask_n0
        elif eps == -1:
            row = row * mask_n13
        return row

    b1 = b1_ref[0]
    phases = []
    for r in (0, 1):
        for s in (0, 1):
            acc = jnp.zeros((1, N_MID), jnp.float32)
            for kh, dlt in _PHASE_TAPS[r]:
                for kw, eps in _PHASE_TAPS[s]:
                    acc = acc + shifted_tap(kh, kw, dlt, eps)
            phases.append(jax.nn.sigmoid(acc + b1))

    out_ref[...] = jnp.concatenate(phases, axis=0)[None, :, :]    # (1, 4, 196)


# ---------------------------------------------------------------------------
# One-time host-side parameter preparation (all layout work lives here).
# ---------------------------------------------------------------------------
def _conv2_scatter():
    s = np.zeros((N_TAP, N_FC, N_MID), np.float32)
    for kh in range(K):
        for kw in range(K):
            t = kh * K + kw
            for ih in range(H_FC):
                for iw in range(W_FC):
                    oh = S * ih - P + kh
                    ow = S * iw - P + kw
                    if 0 <= oh < H_MID and 0 <= ow < W_MID:
                        s[t, ih * W_FC + iw, oh * W_MID + ow] = 1.0
    return jnp.asarray(s)


def _wrap_masks():
    n = np.arange(N_MID) % W_MID
    return jnp.asarray(
        np.stack([(n != 0), (n != W_MID - 1)]).astype(np.float32))  # (2, 196)


def prepare_params(params):
    c = CAPACITY
    fc_w = params['fc_w']                      # (6272, 2) PyTorch (out, in)
    fc_b = params['fc_b']                      # (6272,)
    # fc output index j = ci*49 + p (from .view(B,128,7,7)); store weights as
    # (latent, ci, p) so the in-kernel FMA emits channels-in-rows directly.
    wfc_t = jnp.transpose(fc_w.reshape(2 * c, N_FC, LATENT_DIMS), (2, 0, 1))
    bfc_t = fc_b.reshape(2 * c, N_FC)
    # conv2 weight (Cin=128, Cout=64, K, K) -> rows (kh, kw, co), cols ci
    w2_t = jnp.transpose(params['conv2_w'], (2, 3, 1, 0)).reshape(K * K * c,
                                                                  2 * c)
    b2_col = params['conv2_b'].reshape(c, 1)
    # conv1 weight (Cin=64, Cout=1, K, K) -> rows (kh, kw), cols ci
    w1_t = params['conv1_w'].reshape(c, K * K).T
    b1 = params['conv1_b'].reshape(1)
    return {
        'b1': b1, 'masks': _wrap_masks(), 'wfc': wfc_t, 'bfc': bfc_t,
        'w2': w2_t, 's2': _conv2_scatter(), 'b2': b2_col, 'w1': w1_t,
    }


# ---------------------------------------------------------------------------
# Forward wrapper: one fused pallas_call + a tiny pixel-shuffle on the output.
# ---------------------------------------------------------------------------
@jax.jit
def decoder_forward(z, prep):
    b = z.shape[0]

    def full(shape):
        nd = len(shape)
        return pl.BlockSpec(shape, lambda i, _nd=nd: (0,) * _nd)

    out_phased = pl.pallas_call(
        _decoder_kernel,
        grid=(b,),
        in_specs=[
            pl.BlockSpec(memory_space=pltpu.MemorySpace.SMEM),   # z   (B, 2)
            pl.BlockSpec(memory_space=pltpu.MemorySpace.SMEM),   # b1  (1,)
            full(prep['masks'].shape),                           # (2, 196)
            full(prep['wfc'].shape),                             # (2, 128, 49)
            full(prep['bfc'].shape),                             # (128, 49)
            full(prep['w2'].shape),                              # (1024, 128)
            full(prep['s2'].shape),                              # (16, 49, 196)
            full(prep['b2'].shape),                              # (64, 1)
            full(prep['w1'].shape),                              # (16, 64)
        ],
        out_specs=pl.BlockSpec((1, 4, N_MID), lambda i: (i, 0, 0)),
        out_shape=jax.ShapeDtypeStruct((b, 4, N_MID), jnp.float32),
        compiler_params=pltpu.CompilerParams(
            dimension_semantics=("parallel",)),
    )(z, prep['b1'], prep['masks'], prep['wfc'], prep['bfc'],
      prep['w2'], prep['s2'], prep['b2'], prep['w1'])

    # Pixel-shuffle the 4 stride-2 phases (r, s) back to raster NCHW.
    x = out_phased.reshape(b, 2, 2, H_MID, W_MID)    # (B, r, s, m, n)
    x = x.transpose(0, 3, 1, 4, 2)                   # (B, m, r, n, s)
    return x.reshape(b, 1, H_OUT, W_OUT)


# ---------------------------------------------------------------------------
# Pure-JAX reference (correctness check)
# ---------------------------------------------------------------------------
def _conv_transpose_ref(x_nchw, w, bias):
    # w: (Cin, Cout, K, K) — PyTorch ConvTranspose2d weight layout
    w_flip = w[:, :, ::-1, ::-1]
    w_conv = jnp.transpose(w_flip, (1, 0, 2, 3))
    out = jax.lax.conv_general_dilated(
        x_nchw, w_conv, window_strides=(1, 1),
        padding=[(K - 1 - P, K - 1 - P)] * 2,
        lhs_dilation=(S, S),
        dimension_numbers=('NCHW', 'OIHW', 'NCHW'))
    return out + bias[None, :, None, None]


def decoder_ref(z, params):
    h = z @ params['fc_w'].T + params['fc_b']
    x = h.reshape(z.shape[0], 2 * CAPACITY, H_FC, W_FC)
    x = jax.nn.relu(_conv_transpose_ref(x, params['conv2_w'],
                                        params['conv2_b']))
    x = jax.nn.sigmoid(_conv_transpose_ref(x, params['conv1_w'],
                                           params['conv1_b']))
    return x


# ---------------------------------------------------------------------------
if __name__ == "__main__":
    c = CAPACITY
    key = jax.random.PRNGKey(0)
    k1, k2, k3, k4, k5, k6, kz = jax.random.split(key, 7)

    params = {
        'fc_w':    0.30 * jax.random.normal(k1, (2 * c * N_FC, LATENT_DIMS),
                                            jnp.float32),
        'fc_b':    0.05 * jax.random.normal(k2, (2 * c * N_FC,), jnp.float32),
        'conv2_w': 0.05 * jax.random.normal(k3, (2 * c, c, K, K), jnp.float32),
        'conv2_b': 0.05 * jax.random.normal(k4, (c,), jnp.float32),
        'conv1_w': 0.05 * jax.random.normal(k5, (c, 1, K, K), jnp.float32),
        'conv1_b': 0.05 * jax.random.normal(k6, (1,), jnp.float32),
    }

    # latent input: batch=2, latent_dims=2
    z = jax.random.normal(kz, (2, LATENT_DIMS), jnp.float32)

    prep = prepare_params(params)          # one-time layout prep (not per call)

    out = jax.block_until_ready(decoder_forward(z, prep))
    assert out.shape == (2, 1, H_OUT, W_OUT), out.shape

    ref = jax.block_until_ready(decoder_ref(z, params))
    assert jnp.allclose(out, ref, atol=1e-3, rtol=1e-3), \
        float(jnp.max(jnp.abs(out - ref)))

    print("KERNEL_OK")
</pallas_src>

<mosaic_0001>
module attributes {stable_mosaic.version = 11 : i64} {
  func.func @_decoder_kernel(%arg0: i32, %arg1: memref<2x2xf32, #tpu.memory_space<smem>>, %arg2: memref<1xf32, #tpu.memory_space<smem>>, %arg3: memref<2x196xf32, #tpu.memory_space<vmem>>, %arg4: memref<2x128x49xf32, #tpu.memory_space<vmem>>, %arg5: memref<128x49xf32, #tpu.memory_space<vmem>>, %arg6: memref<1024x128xf32, #tpu.memory_space<vmem>>, %arg7: memref<16x49x196xf32, #tpu.memory_space<vmem>>, %arg8: memref<64x1xf32, #tpu.memory_space<vmem>>, %arg9: memref<16x64xf32, #tpu.memory_space<vmem>>, %arg10: memref<1x4x196xf32, #tpu.memory_space<vmem>>) attributes {dimension_semantics = [#tpu.dimension_semantics<parallel>], iteration_bounds = array<i64: 2>, scalar_prefetch = 0 : i64, scratch_operands = 0 : i64, tpu.core_type = #tpu.core_type<tc>, window_params = [{transform_indices = @transform_0, window_bounds = array<i64: 2, 2>}, {transform_indices = @transform_1, window_bounds = array<i64: 1>}, {pipeline_mode = #tpu.pipeline_mode<synchronous>, transform_indices = @transform_2, window_bounds = array<i64: 2, 196>}, {pipeline_mode = #tpu.pipeline_mode<synchronous>, transform_indices = @transform_3, window_bounds = array<i64: 2, 128, 49>}, {pipeline_mode = #tpu.pipeline_mode<synchronous>, transform_indices = @transform_4, window_bounds = array<i64: 128, 49>}, {pipeline_mode = #tpu.pipeline_mode<synchronous>, transform_indices = @transform_5, window_bounds = array<i64: 1024, 128>}, {pipeline_mode = #tpu.pipeline_mode<synchronous>, transform_indices = @transform_6, window_bounds = array<i64: 16, 49, 196>}, {pipeline_mode = #tpu.pipeline_mode<synchronous>, transform_indices = @transform_7, window_bounds = array<i64: 64, 1>}, {pipeline_mode = #tpu.pipeline_mode<synchronous>, transform_indices = @transform_8, window_bounds = array<i64: 16, 64>}, {transform_indices = @transform_9, window_bounds = array<i64: 1, 4, 196>}]} {
    %0 = arith.index_cast %arg0 : i32 to index
    %c0 = arith.constant 0 : index
    %1 = memref.load %arg1[%0, %c0] : memref<2x2xf32, #tpu.memory_space<smem>>
    %2 = arith.index_cast %arg0 : i32 to index
    %c1 = arith.constant 1 : index
    %3 = memref.load %arg1[%2, %c1] : memref<2x2xf32, #tpu.memory_space<smem>>
    %c0_0 = arith.constant 0 : index
    %c0_1 = arith.constant 0 : index
    %c0_2 = arith.constant 0 : index
    %4 = vector.load %arg4[%c0_0, %c0_1, %c0_2] : memref<2x128x49xf32, #tpu.memory_space<vmem>>, vector<1x128x49xf32>
    %5 = vector.shape_cast %4 : vector<1x128x49xf32> to vector<128x49xf32>
    %6 = vector.broadcast %1 : f32 to vector<128x49xf32>
    %7 = arith.mulf %6, %5 : vector<128x49xf32>
    %c1_3 = arith.constant 1 : index
    %c0_4 = arith.constant 0 : index
    %c0_5 = arith.constant 0 : index
    %8 = vector.load %arg4[%c1_3, %c0_4, %c0_5] : memref<2x128x49xf32, #tpu.memory_space<vmem>>, vector<1x128x49xf32>
    %9 = vector.shape_cast %8 : vector<1x128x49xf32> to vector<128x49xf32>
    %10 = vector.broadcast %3 : f32 to vector<128x49xf32>
    %11 = arith.mulf %10, %9 : vector<128x49xf32>
    %12 = arith.addf %7, %11 : vector<128x49xf32>
    %c0_6 = arith.constant 0 : index
    %c0_7 = arith.constant 0 : index
    %13 = vector.load %arg5[%c0_6, %c0_7] : memref<128x49xf32, #tpu.memory_space<vmem>>, vector<128x49xf32>
    %14 = arith.addf %12, %13 : vector<128x49xf32>
    %c0_8 = arith.constant 0 : index
    %c0_9 = arith.constant 0 : index
    %15 = vector.load %arg6[%c0_8, %c0_9] : memref<1024x128xf32, #tpu.memory_space<vmem>>, vector<1024x128xf32>
    %cst = arith.constant dense<0.000000e+00> : vector<1024x49xf32>
    %16 = tpu.matmul %15, %14, %cst {dimension_numbers = #tpu.dot_dimension_numbers<[1], [0], [0], [1], [0, 0, 1, 1], [], []>} : vector<1024x128xf32>, vector<128x49xf32>, vector<1024x49xf32> -> vector<1024x49xf32>
    %cst_10 = arith.constant 0.000000e+00 : f32
    %17 = vector.broadcast %cst_10 : f32 to vector<64x196xf32>
    %18 = vector.extract_strided_slice %16 {offsets = [0, 0], sizes = [64, 49], strides = [1, 1]} : vector<1024x49xf32> to vector<64x49xf32>
    %c0_11 = arith.constant 0 : index
    %c0_12 = arith.constant 0 : index
    %c0_13 = arith.constant 0 : index
    %19 = vector.load %arg7[%c0_11, %c0_12, %c0_13] : memref<16x49x196xf32, #tpu.memory_space<vmem>>, vector<1x49x196xf32>
    %20 = vector.shape_cast %19 : vector<1x49x196xf32> to vector<49x196xf32>
    %cst_14 = arith.constant dense<0.000000e+00> : vector<64x196xf32>
    %21 = tpu.matmul %18, %20, %cst_14 {dimension_numbers = #tpu.dot_dimension_numbers<[1], [0], [0], [1], [0, 0, 1, 1], [], []>} : vector<64x49xf32>, vector<49x196xf32>, vector<64x196xf32> -> vector<64x196xf32>
    %22 = arith.addf %17, %21 : vector<64x196xf32>
    %23 = vector.extract_strided_slice %16 {offsets = [64, 0], sizes = [64, 49], strides = [1, 1]} : vector<1024x49xf32> to vector<64x49xf32>
    %c1_15 = arith.constant 1 : index
    %c0_16 = arith.constant 0 : index
    %c0_17 = arith.constant 0 : index
    %24 = vector.load %arg7[%c1_15, %c0_16, %c0_17] : memref<16x49x196xf32, #tpu.memory_space<vmem>>, vector<1x49x196xf32>
    %25 = vector.shape_cast %24 : vector<1x49x196xf32> to vector<49x196xf32>
    %cst_18 = arith.constant dense<0.000000e+00> : vector<64x196xf32>
    %26 = tpu.matmul %23, %25, %cst_18 {dimension_numbers = #tpu.dot_dimension_numbers<[1], [0], [0], [1], [0, 0, 1, 1], [], []>} : vector<64x49xf32>, vector<49x196xf32>, vector<64x196xf32> -> vector<64x196xf32>
    %27 = arith.addf %22, %26 : vector<64x196xf32>
    %28 = vector.extract_strided_slice %16 {offsets = [128, 0], sizes = [64, 49], strides = [1, 1]} : vector<1024x49xf32> to vector<64x49xf32>
    %c2 = arith.constant 2 : index
    %c0_19 = arith.constant 0 : index
    %c0_20 = arith.constant 0 : index
    %29 = vector.load %arg7[%c2, %c0_19, %c0_20] : memref<16x49x196xf32, #tpu.memory_space<vmem>>, vector<1x49x196xf32>
    %30 = vector.shape_cast %29 : vector<1x49x196xf32> to vector<49x196xf32>
    %cst_21 = arith.constant dense<0.000000e+00> : vector<64x196xf32>
    %31 = tpu.matmul %28, %30, %cst_21 {dimension_numbers = #tpu.dot_dimension_numbers<[1], [0], [0], [1], [0, 0, 1, 1], [], []>} : vector<64x49xf32>, vector<49x196xf32>, vector<64x196xf32> -> vector<64x196xf32>
    %32 = arith.addf %27, %31 : vector<64x196xf32>
    %33 = vector.extract_strided_slice %16 {offsets = [192, 0], sizes = [64, 49], strides = [1, 1]} : vector<1024x49xf32> to vector<64x49xf32>
    %c3 = arith.constant 3 : index
    %c0_22 = arith.constant 0 : index
    %c0_23 = arith.constant 0 : index
    %34 = vector.load %arg7[%c3, %c0_22, %c0_23] : memref<16x49x196xf32, #tpu.memory_space<vmem>>, vector<1x49x196xf32>
    %35 = vector.shape_cast %34 : vector<1x49x196xf32> to vector<49x196xf32>
    %cst_24 = arith.constant dense<0.000000e+00> : vector<64x196xf32>
    %36 = tpu.matmul %33, %35, %cst_24 {dimension_numbers = #tpu.dot_dimension_numbers<[1], [0], [0], [1], [0, 0, 1, 1], [], []>} : vector<64x49xf32>, vector<49x196xf32>, vector<64x196xf32> -> vector<64x196xf32>
    %37 = arith.addf %32, %36 : vector<64x196xf32>
    %38 = vector.extract_strided_slice %16 {offsets = [256, 0], sizes = [64, 49], strides = [1, 1]} : vector<1024x49xf32> to vector<64x49xf32>
    %c4 = arith.constant 4 : index
    %c0_25 = arith.constant 0 : index
    %c0_26 = arith.constant 0 : index
    %39 = vector.load %arg7[%c4, %c0_25, %c0_26] : memref<16x49x196xf32, #tpu.memory_space<vmem>>, vector<1x49x196xf32>
    %40 = vector.shape_cast %39 : vector<1x49x196xf32> to vector<49x196xf32>
    %cst_27 = arith.constant dense<0.000000e+00> : vector<64x196xf32>
    %41 = tpu.matmul %38, %40, %cst_27 {dimension_numbers = #tpu.dot_dimension_numbers<[1], [0], [0], [1], [0, 0, 1, 1], [], []>} : vector<64x49xf32>, vector<49x196xf32>, vector<64x196xf32> -> vector<64x196xf32>
    %42 = arith.addf %37, %41 : vector<64x196xf32>
    %43 = vector.extract_strided_slice %16 {offsets = [320, 0], sizes = [64, 49], strides = [1, 1]} : vector<1024x49xf32> to vector<64x49xf32>
    %c5 = arith.constant 5 : index
    %c0_28 = arith.constant 0 : index
    %c0_29 = arith.constant 0 : index
    %44 = vector.load %arg7[%c5, %c0_28, %c0_29] : memref<16x49x196xf32, #tpu.memory_space<vmem>>, vector<1x49x196xf32>
    %45 = vector.shape_cast %44 : vector<1x49x196xf32> to vector<49x196xf32>
    %cst_30 = arith.constant dense<0.000000e+00> : vector<64x196xf32>
    %46 = tpu.matmul %43, %45, %cst_30 {dimension_numbers = #tpu.dot_dimension_numbers<[1], [0], [0], [1], [0, 0, 1, 1], [], []>} : vector<64x49xf32>, vector<49x196xf32>, vector<64x196xf32> -> vector<64x196xf32>
    %47 = arith.addf %42, %46 : vector<64x196xf32>
    %48 = vector.extract_strided_slice %16 {offsets = [384, 0], sizes = [64, 49], strides = [1, 1]} : vector<1024x49xf32> to vector<64x49xf32>
    %c6 = arith.constant 6 : index
    %c0_31 = arith.constant 0 : index
    %c0_32 = arith.constant 0 : index
    %49 = vector.load %arg7[%c6, %c0_31, %c0_32] : memref<16x49x196xf32, #tpu.memory_space<vmem>>, vector<1x49x196xf32>
    %50 = vector.shape_cast %49 : vector<1x49x196xf32> to vector<49x196xf32>
    %cst_33 = arith.constant dense<0.000000e+00> : vector<64x196xf32>
    %51 = tpu.matmul %48, %50, %cst_33 {dimension_numbers = #tpu.dot_dimension_numbers<[1], [0], [0], [1], [0, 0, 1, 1], [], []>} : vector<64x49xf32>, vector<49x196xf32>, vector<64x196xf32> -> vector<64x196xf32>
    %52 = arith.addf %47, %51 : vector<64x196xf32>
    %53 = vector.extract_strided_slice %16 {offsets = [448, 0], sizes = [64, 49], strides = [1, 1]} : vector<1024x49xf32> to vector<64x49xf32>
    %c7 = arith.constant 7 : index
    %c0_34 = arith.constant 0 : index
    %c0_35 = arith.constant 0 : index
    %54 = vector.load %arg7[%c7, %c0_34, %c0_35] : memref<16x49x196xf32, #tpu.memory_space<vmem>>, vector<1x49x196xf32>
    %55 = vector.shape_cast %54 : vector<1x49x196xf32> to vector<49x196xf32>
    %cst_36 = arith.constant dense<0.000000e+00> : vector<64x196xf32>
    %56 = tpu.matmul %53, %55, %cst_36 {dimension_numbers = #tpu.dot_dimension_numbers<[1], [0], [0], [1], [0, 0, 1, 1], [], []>} : vector<64x49xf32>, vector<49x196xf32>, vector<64x196xf32> -> vector<64x196xf32>
    %57 = arith.addf %52, %56 : vector<64x196xf32>
    %58 = vector.extract_strided_slice %16 {offsets = [512, 0], sizes = [64, 49], strides = [1, 1]} : vector<1024x49xf32> to vector<64x49xf32>
    %c8 = arith.constant 8 : index
    %c0_37 = arith.constant 0 : index
    %c0_38 = arith.constant 0 : index
    %59 = vector.load %arg7[%c8, %c0_37, %c0_38] : memref<16x49x196xf32, #tpu.memory_space<vmem>>, vector<1x49x196xf32>
    %60 = vector.shape_cast %59 : vector<1x49x196xf32> to vector<49x196xf32>
    %cst_39 = arith.constant dense<0.000000e+00> : vector<64x196xf32>
    %61 = tpu.matmul %58, %60, %cst_39 {dimension_numbers = #tpu.dot_dimension_numbers<[1], [0], [0], [1], [0, 0, 1, 1], [], []>} : vector<64x49xf32>, vector<49x196xf32>, vector<64x196xf32> -> vector<64x196xf32>
    %62 = arith.addf %57, %61 : vector<64x196xf32>
    %63 = vector.extract_strided_slice %16 {offsets = [576, 0], sizes = [64, 49], strides = [1, 1]} : vector<1024x49xf32> to vector<64x49xf32>
    %c9 = arith.constant 9 : index
    %c0_40 = arith.constant 0 : index
    %c0_41 = arith.constant 0 : index
    %64 = vector.load %arg7[%c9, %c0_40, %c0_41] : memref<16x49x196xf32, #tpu.memory_space<vmem>>, vector<1x49x196xf32>
    %65 = vector.shape_cast %64 : vector<1x49x196xf32> to vector<49x196xf32>
    %cst_42 = arith.constant dense<0.000000e+00> : vector<64x196xf32>
    %66 = tpu.matmul %63, %65, %cst_42 {dimension_numbers = #tpu.dot_dimension_numbers<[1], [0], [0], [1], [0, 0, 1, 1], [], []>} : vector<64x49xf32>, vector<49x196xf32>, vector<64x196xf32> -> vector<64x196xf32>
    %67 = arith.addf %62, %66 : vector<64x196xf32>
    %68 = vector.extract_strided_slice %16 {offsets = [640, 0], sizes = [64, 49], strides = [1, 1]} : vector<1024x49xf32> to vector<64x49xf32>
    %c10 = arith.constant 10 : index
    %c0_43 = arith.constant 0 : index
    %c0_44 = arith.constant 0 : index
    %69 = vector.load %arg7[%c10, %c0_43, %c0_44] : memref<16x49x196xf32, #tpu.memory_space<vmem>>, vector<1x49x196xf32>
    %70 = vector.shape_cast %69 : vector<1x49x196xf32> to vector<49x196xf32>
    %cst_45 = arith.constant dense<0.000000e+00> : vector<64x196xf32>
    %71 = tpu.matmul %68, %70, %cst_45 {dimension_numbers = #tpu.dot_dimension_numbers<[1], [0], [0], [1], [0, 0, 1, 1], [], []>} : vector<64x49xf32>, vector<49x196xf32>, vector<64x196xf32> -> vector<64x196xf32>
    %72 = arith.addf %67, %71 : vector<64x196xf32>
    %73 = vector.extract_strided_slice %16 {offsets = [704, 0], sizes = [64, 49], strides = [1, 1]} : vector<1024x49xf32> to vector<64x49xf32>
    %c11 = arith.constant 11 : index
    %c0_46 = arith.constant 0 : index
    %c0_47 = arith.constant 0 : index
    %74 = vector.load %arg7[%c11, %c0_46, %c0_47] : memref<16x49x196xf32, #tpu.memory_space<vmem>>, vector<1x49x196xf32>
    %75 = vector.shape_cast %74 : vector<1x49x196xf32> to vector<49x196xf32>
    %cst_48 = arith.constant dense<0.000000e+00> : vector<64x196xf32>
    %76 = tpu.matmul %73, %75, %cst_48 {dimension_numbers = #tpu.dot_dimension_numbers<[1], [0], [0], [1], [0, 0, 1, 1], [], []>} : vector<64x49xf32>, vector<49x196xf32>, vector<64x196xf32> -> vector<64x196xf32>
    %77 = arith.addf %72, %76 : vector<64x196xf32>
    %78 = vector.extract_strided_slice %16 {offsets = [768, 0], sizes = [64, 49], strides = [1, 1]} : vector<1024x49xf32> to vector<64x49xf32>
    %c12 = arith.constant 12 : index
    %c0_49 = arith.constant 0 : index
    %c0_50 = arith.constant 0 : index
    %79 = vector.load %arg7[%c12, %c0_49, %c0_50] : memref<16x49x196xf32, #tpu.memory_space<vmem>>, vector<1x49x196xf32>
    %80 = vector.shape_cast %79 : vector<1x49x196xf32> to vector<49x196xf32>
    %cst_51 = arith.constant dense<0.000000e+00> : vector<64x196xf32>
    %81 = tpu.matmul %78, %80, %cst_51 {dimension_numbers = #tpu.dot_dimension_numbers<[1], [0], [0], [1], [0, 0, 1, 1], [], []>} : vector<64x49xf32>, vector<49x196xf32>, vector<64x196xf32> -> vector<64x196xf32>
    %82 = arith.addf %77, %81 : vector<64x196xf32>
    %83 = vector.extract_strided_slice %16 {offsets = [832, 0], sizes = [64, 49], strides = [1, 1]} : vector<1024x49xf32> to vector<64x49xf32>
    %c13 = arith.constant 13 : index
    %c0_52 = arith.constant 0 : index
    %c0_53 = arith.constant 0 : index
    %84 = vector.load %arg7[%c13, %c0_52, %c0_53] : memref<16x49x196xf32, #tpu.memory_space<vmem>>, vector<1x49x196xf32>
    %85 = vector.shape_cast %84 : vector<1x49x196xf32> to vector<49x196xf32>
    %cst_54 = arith.constant dense<0.000000e+00> : vector<64x196xf32>
    %86 = tpu.matmul %83, %85, %cst_54 {dimension_numbers = #tpu.dot_dimension_numbers<[1], [0], [0], [1], [0, 0, 1, 1], [], []>} : vector<64x49xf32>, vector<49x196xf32>, vector<64x196xf32> -> vector<64x196xf32>
    %87 = arith.addf %82, %86 : vector<64x196xf32>
    %88 = vector.extract_strided_slice %16 {offsets = [896, 0], sizes = [64, 49], strides = [1, 1]} : vector<1024x49xf32> to vector<64x49xf32>
    %c14 = arith.constant 14 : index
    %c0_55 = arith.constant 0 : index
    %c0_56 = arith.constant 0 : index
    %89 = vector.load %arg7[%c14, %c0_55, %c0_56] : memref<16x49x196xf32, #tpu.memory_space<vmem>>, vector<1x49x196xf32>
    %90 = vector.shape_cast %89 : vector<1x49x196xf32> to vector<49x196xf32>
    %cst_57 = arith.constant dense<0.000000e+00> : vector<64x196xf32>
    %91 = tpu.matmul %88, %90, %cst_57 {dimension_numbers = #tpu.dot_dimension_numbers<[1], [0], [0], [1], [0, 0, 1, 1], [], []>} : vector<64x49xf32>, vector<49x196xf32>, vector<64x196xf32> -> vector<64x196xf32>
    %92 = arith.addf %87, %91 : vector<64x196xf32>
    %93 = vector.extract_strided_slice %16 {offsets = [960, 0], sizes = [64, 49], strides = [1, 1]} : vector<1024x49xf32> to vector<64x49xf32>
    %c15 = arith.constant 15 : index
    %c0_58 = arith.constant 0 : index
    %c0_59 = arith.constant 0 : index
    %94 = vector.load %arg7[%c15, %c0_58, %c0_59] : memref<16x49x196xf32, #tpu.memory_space<vmem>>, vector<1x49x196xf32>
    %95 = vector.shape_cast %94 : vector<1x49x196xf32> to vector<49x196xf32>
    %cst_60 = arith.constant dense<0.000000e+00> : vector<64x196xf32>
    %96 = tpu.matmul %93, %95, %cst_60 {dimension_numbers = #tpu.dot_dimension_numbers<[1], [0], [0], [1], [0, 0, 1, 1], [], []>} : vector<64x49xf32>, vector<49x196xf32>, vector<64x196xf32> -> vector<64x196xf32>
    %97 = arith.addf %92, %96 : vector<64x196xf32>
    %c0_61 = arith.constant 0 : index
    %c0_62 = arith.constant 0 : index
    %98 = vector.load %arg8[%c0_61, %c0_62] : memref<64x1xf32, #tpu.memory_space<vmem>>, vector<64x1xf32>
    %99 = vector.broadcast %98 : vector<64x1xf32> to vector<64x196xf32>
    %100 = arith.addf %97, %99 : vector<64x196xf32>
    %cst_63 = arith.constant 0.000000e+00 : f32
    %101 = vector.broadcast %cst_63 : f32 to vector<64x196xf32>
    %102 = arith.maximumf %100, %101 : vector<64x196xf32>
    %c0_64 = arith.constant 0 : index
    %c0_65 = arith.constant 0 : index
    %103 = vector.load %arg9[%c0_64, %c0_65] : memref<16x64xf32, #tpu.memory_space<vmem>>, vector<16x64xf32>
    %cst_66 = arith.constant dense<0.000000e+00> : vector<16x196xf32>
    %104 = tpu.matmul %103, %102, %cst_66 {dimension_numbers = #tpu.dot_dimension_numbers<[1], [0], [0], [1], [0, 0, 1, 1], [], []>} : vector<16x64xf32>, vector<64x196xf32>, vector<16x196xf32> -> vector<16x196xf32>
    %c0_67 = arith.constant 0 : index
    %c0_68 = arith.constant 0 : index
    %105 = vector.load %arg3[%c0_67, %c0_68] : memref<2x196xf32, #tpu.memory_space<vmem>>, vector<1x196xf32>
    %c1_69 = arith.constant 1 : index
    %c0_70 = arith.constant 0 : index
    %106 = vector.load %arg3[%c1_69, %c0_70] : memref<2x196xf32, #tpu.memory_space<vmem>>, vector<1x196xf32>
    %c0_71 = arith.constant 0 : index
    %107 = memref.load %arg2[%c0_71] : memref<1xf32, #tpu.memory_space<smem>>
    %cst_72 = arith.constant 0.000000e+00 : f32
    %108 = vector.broadcast %cst_72 : f32 to vector<1x196xf32>
    %109 = vector.extract_strided_slice %104 {offsets = [5, 0], sizes = [1, 196], strides = [1, 1]} : vector<16x196xf32> to vector<1x196xf32>
    %110 = arith.addf %108, %109 : vector<1x196xf32>
    %111 = vector.extract_strided_slice %104 {offsets = [7, 0], sizes = [1, 196], strides = [1, 1]} : vector<16x196xf32> to vector<1x196xf32>
    %cst_73 = arith.constant 0.000000e+00 : f32
    %112 = vector.broadcast %cst_73 : f32 to vector<1x1xf32>
    %113 = vector.extract_strided_slice %111 {offsets = [0, 0], sizes = [1, 195], strides = [1, 1]} : vector<1x196xf32> to vector<1x195xf32>
    %114 = tpu.concatenate %112, %113 in 1 : vector<1x1xf32>, vector<1x195xf32> -> vector<1x196xf32>
    %115 = arith.mulf %114, %105 : vector<1x196xf32>
    %116 = arith.addf %110, %115 : vector<1x196xf32>
    %117 = vector.extract_strided_slice %104 {offsets = [13, 0], sizes = [1, 196], strides = [1, 1]} : vector<16x196xf32> to vector<1x196xf32>
    %cst_74 = arith.constant 0.000000e+00 : f32
    %118 = vector.broadcast %cst_74 : f32 to vector<1x14xf32>
    %119 = vector.extract_strided_slice %117 {offsets = [0, 0], sizes = [1, 182], strides = [1, 1]} : vector<1x196xf32> to vector<1x182xf32>
    %120 = tpu.concatenate %118, %119 in 1 : vector<1x14xf32>, vector<1x182xf32> -> vector<1x196xf32>
    %121 = arith.addf %116, %120 : vector<1x196xf32>
    %122 = vector.extract_strided_slice %104 {offsets = [15, 0], sizes = [1, 196], strides = [1, 1]} : vector<16x196xf32> to vector<1x196xf32>
    %cst_75 = arith.constant 0.000000e+00 : f32
    %123 = vector.broadcast %cst_75 : f32 to vector<1x15xf32>
    %124 = vector.extract_strided_slice %122 {offsets = [0, 0], sizes = [1, 181], strides = [1, 1]} : vector<1x196xf32> to vector<1x181xf32>
    %125 = tpu.concatenate %123, %124 in 1 : vector<1x15xf32>, vector<1x181xf32> -> vector<1x196xf32>
    %126 = arith.mulf %125, %105 : vector<1x196xf32>
    %127 = arith.addf %121, %126 : vector<1x196xf32>
    %128 = vector.broadcast %107 : f32 to vector<1x196xf32>
    %129 = arith.addf %127, %128 : vector<1x196xf32>
    %130 = arith.negf %129 : vector<1x196xf32>
    %131 = math.exp %130 : vector<1x196xf32>
    %cst_76 = arith.constant 1.000000e+00 : f32
    %132 = vector.broadcast %cst_76 : f32 to vector<1x196xf32>
    %133 = arith.addf %132, %131 : vector<1x196xf32>
    %134 = arith.divf %132, %133 : vector<1x196xf32>
    %cst_77 = arith.constant 0.000000e+00 : f32
    %135 = vector.broadcast %cst_77 : f32 to vector<1x196xf32>
    %136 = vector.extract_strided_slice %104 {offsets = [4, 0], sizes = [1, 196], strides = [1, 1]} : vector<16x196xf32> to vector<1x196xf32>
    %137 = vector.extract_strided_slice %136 {offsets = [0, 1], sizes = [1, 195], strides = [1, 1]} : vector<1x196xf32> to vector<1x195xf32>
    %cst_78 = arith.constant 0.000000e+00 : f32
    %138 = vector.broadcast %cst_78 : f32 to vector<1x1xf32>
    %139 = tpu.concatenate %137, %138 in 1 : vector<1x195xf32>, vector<1x1xf32> -> vector<1x196xf32>
    %140 = arith.mulf %139, %106 : vector<1x196xf32>
    %141 = arith.addf %135, %140 : vector<1x196xf32>
    %142 = vector.extract_strided_slice %104 {offsets = [6, 0], sizes = [1, 196], strides = [1, 1]} : vector<16x196xf32> to vector<1x196xf32>
    %143 = arith.addf %141, %142 : vector<1x196xf32>
    %144 = vector.extract_strided_slice %104 {offsets = [12, 0], sizes = [1, 196], strides = [1, 1]} : vector<16x196xf32> to vector<1x196xf32>
    %cst_79 = arith.constant 0.000000e+00 : f32
    %145 = vector.broadcast %cst_79 : f32 to vector<1x13xf32>
    %146 = vector.extract_strided_slice %144 {offsets = [0, 0], sizes = [1, 183], strides = [1, 1]} : vector<1x196xf32> to vector<1x183xf32>
    %147 = tpu.concatenate %145, %146 in 1 : vector<1x13xf32>, vector<1x183xf32> -> vector<1x196xf32>
    %148 = arith.mulf %147, %106 : vector<1x196xf32>
    %149 = arith.addf %143, %148 : vector<1x196xf32>
    %150 = vector.extract_strided_slice %104 {offsets = [14, 0], sizes = [1, 196], strides = [1, 1]} : vector<16x196xf32> to vector<1x196xf32>
    %cst_80 = arith.constant 0.000000e+00 : f32
    %151 = vector.broadcast %cst_80 : f32 to vector<1x14xf32>
    %152 = vector.extract_strided_slice %150 {offsets = [0, 0], sizes = [1, 182], strides = [1, 1]} : vector<1x196xf32> to vector<1x182xf32>
    %153 = tpu.concatenate %151, %152 in 1 : vector<1x14xf32>, vector<1x182xf32> -> vector<1x196xf32>
    %154 = arith.addf %149, %153 : vector<1x196xf32>
    %155 = vector.broadcast %107 : f32 to vector<1x196xf32>
    %156 = arith.addf %154, %155 : vector<1x196xf32>
    %157 = arith.negf %156 : vector<1x196xf32>
    %158 = math.exp %157 : vector<1x196xf32>
    %cst_81 = arith.constant 1.000000e+00 : f32
    %159 = vector.broadcast %cst_81 : f32 to vector<1x196xf32>
    %160 = arith.addf %159, %158 : vector<1x196xf32>
    %161 = arith.divf %159, %160 : vector<1x196xf32>
    %cst_82 = arith.constant 0.000000e+00 : f32
    %162 = vector.broadcast %cst_82 : f32 to vector<1x196xf32>
    %163 = vector.extract_strided_slice %104 {offsets = [1, 0], sizes = [1, 196], strides = [1, 1]} : vector<16x196xf32> to vector<1x196xf32>
    %164 = vector.extract_strided_slice %163 {offsets = [0, 14], sizes = [1, 182], strides = [1, 1]} : vector<1x196xf32> to vector<1x182xf32>
    %cst_83 = arith.constant 0.000000e+00 : f32
    %165 = vector.broadcast %cst_83 : f32 to vector<1x14xf32>
    %166 = tpu.concatenate %164, %165 in 1 : vector<1x182xf32>, vector<1x14xf32> -> vector<1x196xf32>
    %167 = arith.addf %162, %166 : vector<1x196xf32>
    %168 = vector.extract_strided_slice %104 {offsets = [3, 0], sizes = [1, 196], strides = [1, 1]} : vector<16x196xf32> to vector<1x196xf32>
    %169 = vector.extract_strided_slice %168 {offsets = [0, 13], sizes = [1, 183], strides = [1, 1]} : vector<1x196xf32> to vector<1x183xf32>
    %cst_84 = arith.constant 0.000000e+00 : f32
    %170 = vector.broadcast %cst_84 : f32 to vector<1x13xf32>
    %171 = tpu.concatenate %169, %170 in 1 : vector<1x183xf32>, vector<1x13xf32> -> vector<1x196xf32>
    %172 = arith.mulf %171, %105 : vector<1x196xf32>
    %173 = arith.addf %167, %172 : vector<1x196xf32>
    %174 = vector.extract_strided_slice %104 {offsets = [9, 0], sizes = [1, 196], strides = [1, 1]} : vector<16x196xf32> to vector<1x196xf32>
    %175 = arith.addf %173, %174 : vector<1x196xf32>
    %176 = vector.extract_strided_slice %104 {offsets = [11, 0], sizes = [1, 196], strides = [1, 1]} : vector<16x196xf32> to vector<1x196xf32>
    %cst_85 = arith.constant 0.000000e+00 : f32
    %177 = vector.broadcast %cst_85 : f32 to vector<1x1xf32>
    %178 = vector.extract_strided_slice %176 {offsets = [0, 0], sizes = [1, 195], strides = [1, 1]} : vector<1x196xf32> to vector<1x195xf32>
    %179 = tpu.concatenate %177, %178 in 1 : vector<1x1xf32>, vector<1x195xf32> -> vector<1x196xf32>
    %180 = arith.mulf %179, %105 : vector<1x196xf32>
    %181 = arith.addf %175, %180 : vector<1x196xf32>
    %182 = vector.broadcast %107 : f32 to vector<1x196xf32>
    %183 = arith.addf %181, %182 : vector<1x196xf32>
    %184 = arith.negf %183 : vector<1x196xf32>
    %185 = math.exp %184 : vector<1x196xf32>
    %cst_86 = arith.constant 1.000000e+00 : f32
    %186 = vector.broadcast %cst_86 : f32 to vector<1x196xf32>
    %187 = arith.addf %186, %185 : vector<1x196xf32>
    %188 = arith.divf %186, %187 : vector<1x196xf32>
    %cst_87 = arith.constant 0.000000e+00 : f32
    %189 = vector.broadcast %cst_87 : f32 to vector<1x196xf32>
    %190 = vector.extract_strided_slice %104 {offsets = [0, 0], sizes = [1, 196], strides = [1, 1]} : vector<16x196xf32> to vector<1x196xf32>
    %191 = vector.extract_strided_slice %190 {offsets = [0, 15], sizes = [1, 181], strides = [1, 1]} : vector<1x196xf32> to vector<1x181xf32>
    %cst_88 = arith.constant 0.000000e+00 : f32
    %192 = vector.broadcast %cst_88 : f32 to vector<1x15xf32>
    %193 = tpu.concatenate %191, %192 in 1 : vector<1x181xf32>, vector<1x15xf32> -> vector<1x196xf32>
    %194 = arith.mulf %193, %106 : vector<1x196xf32>
    %195 = arith.addf %189, %194 : vector<1x196xf32>
    %196 = vector.extract_strided_slice %104 {offsets = [2, 0], sizes = [1, 196], strides = [1, 1]} : vector<16x196xf32> to vector<1x196xf32>
    %197 = vector.extract_strided_slice %196 {offsets = [0, 14], sizes = [1, 182], strides = [1, 1]} : vector<1x196xf32> to vector<1x182xf32>
    %cst_89 = arith.constant 0.000000e+00 : f32
    %198 = vector.broadcast %cst_89 : f32 to vector<1x14xf32>
    %199 = tpu.concatenate %197, %198 in 1 : vector<1x182xf32>, vector<1x14xf32> -> vector<1x196xf32>
    %200 = arith.addf %195, %199 : vector<1x196xf32>
    %201 = vector.extract_strided_slice %104 {offsets = [8, 0], sizes = [1, 196], strides = [1, 1]} : vector<16x196xf32> to vector<1x196xf32>
    %202 = vector.extract_strided_slice %201 {offsets = [0, 1], sizes = [1, 195], strides = [1, 1]} : vector<1x196xf32> to vector<1x195xf32>
    %cst_90 = arith.constant 0.000000e+00 : f32
    %203 = vector.broadcast %cst_90 : f32 to vector<1x1xf32>
    %204 = tpu.concatenate %202, %203 in 1 : vector<1x195xf32>, vector<1x1xf32> -> vector<1x196xf32>
    %205 = arith.mulf %204, %106 : vector<1x196xf32>
    %206 = arith.addf %200, %205 : vector<1x196xf32>
    %207 = vector.extract_strided_slice %104 {offsets = [10, 0], sizes = [1, 196], strides = [1, 1]} : vector<16x196xf32> to vector<1x196xf32>
    %208 = arith.addf %206, %207 : vector<1x196xf32>
    %209 = vector.broadcast %107 : f32 to vector<1x196xf32>
    %210 = arith.addf %208, %209 : vector<1x196xf32>
    %211 = arith.negf %210 : vector<1x196xf32>
    %212 = math.exp %211 : vector<1x196xf32>
    %cst_91 = arith.constant 1.000000e+00 : f32
    %213 = vector.broadcast %cst_91 : f32 to vector<1x196xf32>
    %214 = arith.addf %213, %212 : vector<1x196xf32>
    %215 = arith.divf %213, %214 : vector<1x196xf32>
    %216 = tpu.concatenate %134, %161, %188, %215 in 0 : vector<1x196xf32>, vector<1x196xf32>, vector<1x196xf32>, vector<1x196xf32> -> vector<4x196xf32>
    %217 = vector.shape_cast %216 : vector<4x196xf32> to vector<1x4x196xf32>
    %c0_92 = arith.constant 0 : index
    %c0_93 = arith.constant 0 : index
    %c0_94 = arith.constant 0 : index
    %218 = vector.load %arg10[%c0_92, %c0_93, %c0_94] : memref<1x4x196xf32, #tpu.memory_space<vmem>>, vector<1x4x196xf32>
    tpu.vector_store %arg10[%c0_92, %c0_93, %c0_94], %217 {strides = array<i32>} : memref<1x4x196xf32, #tpu.memory_space<vmem>>, vector<1x4x196xf32>,
    return
  }
  func.func @transform_0(%arg0: i32) -> (i32, i32) {
    %c0_i32 = arith.constant 0 : i32
    %c0_i32_0 = arith.constant 0 : i32
    %c0_i32_1 = arith.constant 0 : i32
    return %c0_i32, %c0_i32_0 : i32, i32
  }
  func.func @transform_1(%arg0: i32) -> i32 {
    %c0_i32 = arith.constant 0 : i32
    %c0_i32_0 = arith.constant 0 : i32
    return %c0_i32 : i32
  }
  func.func @transform_2(%arg0: i32) -> (i32, i32) {
    %c0_i32 = arith.constant 0 : i32
    %c0_i32_0 = arith.constant 0 : i32
    %c0_i32_1 = arith.constant 0 : i32
    return %c0_i32, %c0_i32_0 : i32, i32
  }
  func.func @transform_3(%arg0: i32) -> (i32, i32, i32) {
    %c0_i32 = arith.constant 0 : i32
    %c0_i32_0 = arith.constant 0 : i32
    %c0_i32_1 = arith.constant 0 : i32
    %c0_i32_2 = arith.constant 0 : i32
    return %c0_i32, %c0_i32_0, %c0_i32_1 : i32, i32, i32
  }
  func.func @transform_4(%arg0: i32) -> (i32, i32) {
    %c0_i32 = arith.constant 0 : i32
    %c0_i32_0 = arith.constant 0 : i32
    %c0_i32_1 = arith.constant 0 : i32
    return %c0_i32, %c0_i32_0 : i32, i32
  }
  func.func @transform_5(%arg0: i32) -> (i32, i32) {
    %c0_i32 = arith.constant 0 : i32
    %c0_i32_0 = arith.constant 0 : i32
    %c0_i32_1 = arith.constant 0 : i32
    return %c0_i32, %c0_i32_0 : i32, i32
  }
  func.func @transform_6(%arg0: i32) -> (i32, i32, i32) {
    %c0_i32 = arith.constant 0 : i32
    %c0_i32_0 = arith.constant 0 : i32
    %c0_i32_1 = arith.constant 0 : i32
    %c0_i32_2 = arith.constant 0 : i32
    return %c0_i32, %c0_i32_0, %c0_i32_1 : i32, i32, i32
  }
  func.func @transform_7(%arg0: i32) -> (i32, i32) {
    %c0_i32 = arith.constant 0 : i32
    %c0_i32_0 = arith.constant 0 : i32
    %c0_i32_1 = arith.constant 0 : i32
    return %c0_i32, %c0_i32_0 : i32, i32
  }
  func.func @transform_8(%arg0: i32) -> (i32, i32) {
    %c0_i32 = arith.constant 0 : i32
    %c0_i32_0 = arith.constant 0 : i32
    %c0_i32_1 = arith.constant 0 : i32
    return %c0_i32, %c0_i32_0 : i32, i32
  }
  func.func @transform_9(%arg0: i32) -> (i32, i32, i32) {
    %c0_i32 = arith.constant 0 : i32
    %c0_i32_0 = arith.constant 0 : i32
    %c0_i32_1 = arith.constant 0 : i32
    return %arg0, %c0_i32, %c0_i32_0 : i32, i32, i32
  }
}

</mosaic_0001>

<bundles_post_ra>
// kernel: decoder_forward.1
= control target key start
LH: loop header
LB: loop body
LE: loop exit
PB: predicated region body
PF: predicated region fallthrough
CT: control target
= control target key end

     0   :  { %s7337_s0 = inlined_call_operand.vmem [shape: f32[2,2], index: 0, kind: input, shape index: {}]   ;;  %s7338_s1 = inlined_call_operand.<no memory space> [shape: f32[1], index: 1, kind: input, shape index: {}]   ;;  %s7339_s2 = inlined_call_operand.vmem [shape: f32[2,196], index: 2, kind: input, shape index: {}]   ;;  %s7340_s3 = inlined_call_operand.vmem [shape: f32[2,128,49], index: 3, kind: input, shape index: {}]   ;;  %s7341_s4 = inlined_call_operand.vmem [shape: f32[128,49], index: 4, kind: input, shape index: {}]   ;;  %s7342_s5 = inlined_call_operand.vmem [shape: f32[1024,128], index: 5, kind: input, shape index: {}]   ;;  %s7343_s6 = inlined_call_operand.vmem [shape: f32[16,49,196], index: 6, kind: input, shape index: {}]   ;;  %s7344_s7 = inlined_call_operand.vmem [shape: f32[64,1], index: 7, kind: input, shape index: {}]   ;;  %s7345_s8 = inlined_call_operand.vmem [shape: f32[16,64], index: 8, kind: input, shape index: {}]   ;;  %s7346_s9 = inlined_call_operand.vmem [shape: f32[2,4,196], index: 9, kind: output, shape index: {}]  }
   0x1   :  { %14 = sst [smem:[#allocation2]] %s7338_s1 }
   0x2   :  { %15 = vsyncpa [#allocation4], 0  ;;  %s4594_s11 = smov 0  }
   0x3 LB: > { %s4600_s12 = sadd.s32 4294967295, %s4529_s11   ;;  %p3856_p0 = scmp.ge.s32.totalorder %s4529_s11, 1  ;;  %s4529_s11 = sphi %s4594_s11, %s21_s11  }
   0x4   : > { %p241_p1 = scmp.lt.s32.totalorder %s4529_s11, 3  ;;  %s253_s1 = sshll.u32 %s7337_s0, 4  ;;  %s254_s1 = int_to_ptr.vmem [resolvable:$true] %s253_s1 }
   0x5   : > { %p4449_p3 = scmp.eq.s32.totalorder %s4600_s12, 0  ;;  %s4531_s15 = smov [#allocation3]  }
   0x6   : > { %p242_p2 = pnand %p3856_p0, %p241_p1 }
   0x8   : > { %p4445_p4 = pneg %p242_p2  ;;  %290 = sbr.rel (%p242_p2) target bundleno = 1639 (0x667), region = 56 }
   0xa   : > { %p4446_p5 = pnand %p4449_p3, %p4445_p4 }
   0xc   : > { %4448 = dma.vmem_to_smem (!%p4446_p5), %s254_s1, 32, %s4531_s15, [#allocation4]  }
   0xd   : > { %4524 = dma.done.wait (%p4449_p3), [#allocation4], 32  }
   0xe   : > { %4526 = vsyncadd (%p4449_p3), [#allocation4], 4294967264 }
   0xf   : > { %297 = sfence }
  0x10   : > { %s3862_s16 = sshll.u32 %s4600_s12, 7  ;;  %v347_v0 = vld [vmem:[%s7340_s3 + $0x78] sm:$0xff]  ;;  %v346_v2 = vld [vmem:[%s7340_s3 + $0x70] sm:$0xff]  ;;  %v345_v3 = vld [vmem:[%s7340_s3 + $0x68] sm:$0xff]  ;;  %vm1030_vm0 = vcmask 1040384   ;;  %vm1005_vm1 = vcmask 400384  }
  0x11   : > { %s329_s17 = sld [smem:[#allocation3 + %s3862_s16]]  ;;  %s330_s18 = sadd.s32 1, %s3862_s16  ;;  %v3878_v1 = vld [vmem:[%s7340_s3 + $0xf8] sm:$0xff]  ;;  %v3877_v4 = vld [vmem:[%s7340_s3 + $0xf0] sm:$0xff]  ;;  %v3876_v5 = vld [vmem:[%s7340_s3 + $0xe8] sm:$0xff]  ;;  %vm3315_vm2 = vcmask 523264  }
  0x12   : > { %s331_s19 = sld [smem:[#allocation3 + %s330_s18]]  ;;  %v344_v6 = vld [vmem:[%s7340_s3 + $0x60] sm:$0xff]  ;;  %v343_v9 = vld [vmem:[%s7340_s3 + $0x58] sm:$0xff]  ;;  %v342_v19 = vld [vmem:[%s7340_s3 + $0x50] sm:$0xff]  ;;  %s4534_s22 = smov 127   ;;  %vm3382_vm3 = vcmask 7168  }
  0x13   : > { %v3875_v8 = vld [vmem:[%s7340_s3 + $0xe0] sm:$0xff]  ;;  %v3874_v14 = vld [vmem:[%s7340_s3 + $0xd8] sm:$0xff]  ;;  %v429_v21 = vld [vmem:[%s7341_s4 + $0x70] sm:$0xff]  ;;  %s4536_s23 = smov 1   ;;  %s4537_s24 = smov 13   ;;  %vm3605_vm4 = vcmask 449536  }
  0x14   : > { %v430_v20 = vld [vmem:[%s7341_s4 + $0x78] sm:$0xff]  ;;  %v3873_v24 = vld [vmem:[%s7340_s3 + $0xd0] sm:$0xff]  ;;  %v341_v29 = vld [vmem:[%s7340_s3 + $0x48] sm:$0xff]  ;;  %s4538_s25 = smov 14   ;;  %s4539_s26 = smov 15   ;;  %vm3601_vm5 = vcmask 941056  }
  0x15   : > { %v3872_v30 = vld [vmem:[%s7340_s3 + $0xc8] sm:$0xff]  ;;  %v427_v37 = vld [vmem:[%s7341_s4 + $0x60] sm:$0xff]  ;;  %v426_v44 = vld [vmem:[%s7341_s4 + $0x58] sm:$0xff]  ;;  %s4540_s27 = smov 113   ;;  %vm3410_vm6 = vcmask 113664   ;;  %vm3427_vm7 = vcmask 121856  }
  0x16   : > { %v428_v31 = vld [vmem:[%s7341_s4 + $0x68] sm:$0xff]  ;;  %v340_v40 = vld [vmem:[%s7340_s3 + $0x40] sm:$0xff]  ;;  %v339_v45 = vld [vmem:[%s7340_s3 + $0x38] sm:$0xff]  ;;  %vm3514_vm8 = vcmask 105472   ;;  %vm3487_vm9 = vcmask 1039360   ;;  %vm3593_vm10 = vcmask 441344  }
  0x17   : > { %v4630_v7 = vstv %s329_s17  ;;  %v3871_v41 = vld [vmem:[%s7340_s3 + $0xc0] sm:$0xff]  ;;  %v3870_v46 = vld [vmem:[%s7340_s3 + $0xb8] sm:$0xff]  ;;  %v425_v51 = vld [vmem:[%s7341_s4 + $0x50] sm:$0xff]  ;;  %s4533_s17 = smov 115   ;;  %vm3589_vm11 = vcmask 932864   ;;  %s3371_s13 = sld [smem:[#allocation2]] }
  0x18   : > { %v364_v10 = vmul.f32 %v4630_v7, %v347_v0  ;;  %v4639_v11 = vstv %s331_s19  ;;  %v363_v12 = vmul.f32 %v4630_v7, %v346_v2  ;;  %v362_v13 = vmul.f32 %v4630_v7, %v345_v3  ;;  %v338_v53 = vld [vmem:[%s7340_s3 + $0x30] sm:$0xff]  ;;  %v424_v56 = vld [vmem:[%s7341_s4 + $0x48] sm:$0xff]  ;;  %v423_v3 = vld [vmem:[%s7341_s4 + $0x40] sm:$0xff]  ;;  %s4535_s19 = smov 114   ;;  %p323_p6 = scmp.lt.s32.totalorder %s4600_s12, 1 }
  0x19   : > { %v398_v15 = vmul.f32 %v3878_v1, %v4639_v11  ;;  %v397_v16 = vmul.f32 %v3877_v4, %v4639_v11  ;;  %v396_v17 = vmul.f32 %v3876_v5, %v4639_v11  ;;  %v361_v18 = vmul.f32 %v4630_v7, %v344_v6  ;;  %v3869_v54 = vld [vmem:[%s7340_s3 + $0xb0] sm:$0xff]  ;;  %v337_v59 = vld [vmem:[%s7340_s3 + $0x28] sm:$0xff]  ;;  %v336_v1 = vld [vmem:[%s7340_s3 + $0x20] sm:$0xff] }
  0x1a   : > { %v395_v22 = vmul.f32 %v3875_v8, %v4639_v11  ;;  %v360_v23 = vmul.f32 %v4630_v7, %v343_v9  ;;  %v394_v28 = vmul.f32 %v3874_v14, %v4639_v11  ;;  %v359_v32 = vmul.f32 %v4630_v7, %v342_v19  ;;  %v3868_v60 = vld [vmem:[%s7340_s3 + $0xa8] sm:$0xff]  ;;  %v3867_v4 = vld [vmem:[%s7340_s3 + $0xa0] sm:$0xff]  ;;  %v335_v9 = vld [vmem:[%s7340_s3 + $0x18] sm:$0xff]  ;;  %s7646_s12 = smov (!%p323_p6, %s4600_s12), 1 }
  0x1b   : > { %v414_v25 = vadd.f32 %v398_v15, %v364_v10  ;;  %v413_v26 = vadd.f32 %v397_v16, %v363_v12  ;;  %v412_v27 = vadd.f32 %v396_v17, %v362_v13  ;;  %v393_v36 = vmul.f32 %v3873_v24, %v4639_v11  ;;  %v3866_v10 = vld [vmem:[%s7340_s3 + $0x98] sm:$0xff]  ;;  %v334_v17 = vld [vmem:[%s7340_s3 + $0x10] sm:$0xff]  ;;  %v420_v24 = vld [vmem:[%s7341_s4 + $0x28] sm:$0xff]  ;;  %s4392_s14 = sshll.u32 %s7646_s12, 3 }
  0x1c   : > { %v411_v35 = vadd.f32 %v395_v22, %v361_v18  ;;  %v358_v38 = vmul.f32 %v4630_v7, %v341_v29  ;;  %v392_v39 = vmul.f32 %v3872_v30, %v4639_v11  ;;  %v410_v43 = vadd.f32 %v394_v28, %v360_v23  ;;  %v422_v12 = vld [vmem:[%s7341_s4 + $0x38] sm:$0xff]  ;;  %v421_v18 = vld [vmem:[%s7341_s4 + $0x30] sm:$0xff]  ;;  %s327_s16 = scalar_lea.vmem %s7346_s9, %s4392_s14 }
  0x1d   : > { %v446_v33 = vadd.f32 %v430_v20, %v414_v25  ;;  %v4675_v34 = vadd.f32 %v429_v21, %v413_v26  ;;  %v4689_v42 = vadd.f32 %v428_v31, %v412_v27  ;;  %v409_v48 = vadd.f32 %v393_v36, %v359_v32  ;;  %v3865_v21 = vld [vmem:[%s7340_s3 + $0x90] sm:$0xff]  ;;  %v333_v26 = vld [vmem:[%s7340_s3 + $0x8] sm:$0xff]  ;;  %v332_v31 = vld [vmem:[%s7340_s3] sm:$0xff] }
  0x1e   : > { %v4701_v47 = vadd.f32 %v427_v37, %v411_v35  ;;  %v357_v49 = vmul.f32 %v4630_v7, %v340_v40  ;;  %v391_v50 = vmul.f32 %v3871_v41, %v4639_v11  ;;  %v408_v52 = vadd.f32 %v392_v39, %v358_v38  ;;  %v3864_v27 = vld [vmem:[%s7340_s3 + $0x88] sm:$0xff]  ;;  %v419_v32 = vld [vmem:[%s7341_s4 + $0x20] sm:$0xff]  ;;  %v418_v38 = vld [vmem:[%s7341_s4 + $0x18] sm:$0xff] }
  0x1f   : > { %575 = vmatpush.msra.mxu0 %v446_v33  ;;  %4395 = vmatpush.msra.mxu3 %v446_v33  ;;  %v4716_v55 = vadd.f32 %v426_v44, %v410_v43  ;;  %v356_v57 = vmul.f32 %v4630_v7, %v339_v45  ;;  %v390_v58 = vmul.f32 %v3870_v46, %v4639_v11  ;;  %v417_v43 = vld [vmem:[%s7341_s4 + $0x10] sm:$0xff]  ;;  %v416_v45 = vld [vmem:[%s7341_s4 + $0x8] sm:$0xff]  ;;  %vm3491_vm12 = vcmask 547840  }
  0x20   : > { %v4731_v61 = vadd.f32 %v425_v51, %v409_v48  ;;  %v407_v62 = vadd.f32 %v391_v50, %v357_v49  ;;  %v355_v63 = vmul.f32 %v4630_v7, %v338_v53  ;;  %v389_v0 = vmul.f32 %v3869_v54, %v4639_v11  ;;  %4393 = vmatpush.msra.mxu1 %v446_v33  ;;  %v447_v50 = vld [vmem:[%s7342_s5] sm:$0xff]  ;;  %v562_v51 = vld [vmem:[%s7342_s5 + $0x398] sm:$0xff]  ;;  %v449_v54 = vld [vmem:[%s7342_s5 + $0x10] sm:$0xff] }
  0x21   : > { %576 = vmatpush.msra.mxu0 %v4675_v34  ;;  %4398 = vmatpush.msra.mxu3 %v4675_v34  ;;  %v4738_v2 = vadd.f32 %v424_v56, %v408_v52  ;;  %v406_v5 = vadd.f32 %v390_v58, %v356_v57  ;;  %v354_v6 = vmul.f32 %v4630_v7, %v337_v59  ;;  %v448_v52 = vld [vmem:[%s7342_s5 + $0x8] sm:$0xff]  ;;  %v563_v53 = vld [vmem:[%s7342_s5 + $0x3a0] sm:$0xff]  ;;  %v450_v56 = vld [vmem:[%s7342_s5 + $0x18] sm:$0xff]  ;;  %vm3687_vm13 = vcmask 433152  }
  0x22   : > { %v388_v8 = vmul.f32 %v3868_v60, %v4639_v11  ;;  %v353_v13 = vmul.f32 %v4630_v7, %v336_v1  ;;  %4394 = vmatpush.msra.mxu2 %v446_v33  ;;  %v439_v14 = vadd.f32 %v423_v3, %v407_v62  ;;  %v405_v15 = vadd.f32 %v389_v0, %v355_v63  ;;  %v565_v57 = vld [vmem:[%s7342_s5 + $0x3b0] sm:$0xff]  ;;  %v451_v58 = vld [vmem:[%s7342_s5 + $0x20] sm:$0xff]  ;;  %v566_v59 = vld [vmem:[%s7342_s5 + $0x3b8] sm:$0xff] }
  0x23   : > { %577 = vmatpush.msra.mxu0 %v4689_v42  ;;  %4401 = vmatpush.msra.mxu3 %v4689_v42  ;;  %v387_v16 = vmul.f32 %v3867_v4, %v4639_v11  ;;  %v352_v19 = vmul.f32 %v4630_v7, %v335_v9  ;;  %v386_v20 = vmul.f32 %v3866_v10, %v4639_v11  ;;  %v452_v60 = vld [vmem:[%s7342_s5 + $0x28] sm:$0xff]  ;;  %v453_v62 = vld [vmem:[%s7342_s5 + $0x30] sm:$0xff]  ;;  %v454_v0 = vld [vmem:[%s7342_s5 + $0x38] sm:$0xff]  ;;  %vm3683_vm14 = vcmask 924672  }
  0x24   : > { %4396 = vmatpush.msra.mxu1 %v4675_v34  ;;  %4397 = vmatpush.msra.mxu2 %v4675_v34  ;;  %v438_v22 = vadd.f32 %v422_v12, %v406_v5  ;;  %v404_v23 = vadd.f32 %v388_v8, %v354_v6  ;;  %v351_v25 = vmul.f32 %v4630_v7, %v334_v17  ;;  %v3863_v34 = vld [vmem:[%s7340_s3 + $0x80] sm:$0xff]  ;;  %v568_v63 = vld [vmem:[%s7342_s5 + $0x3c8] sm:$0xff]  ;;  %v569_v1 = vld [vmem:[%s7342_s5 + $0x3d0] sm:$0xff] }
  0x25   : > { %578 = vmatpush.msra.mxu0 %v4701_v47  ;;  %4404 = vmatpush.msra.mxu3 %v4701_v47  ;;  %v437_v28 = vadd.f32 %v421_v18, %v405_v15  ;;  %v403_v29 = vadd.f32 %v387_v16, %v353_v13  ;;  %v385_v30 = vmul.f32 %v3865_v21, %v4639_v11  ;;  %v570_v3 = vld [vmem:[%s7342_s5 + $0x3d8] sm:$0xff]  ;;  %v456_v4 = vld [vmem:[%s7342_s5 + $0x48] sm:$0xff]  ;;  %v571_v5 = vld [vmem:[%s7342_s5 + $0x3e0] sm:$0xff] }
  0x26   : > { %4399 = vmatpush.msra.mxu1 %v4689_v42  ;;  %4400 = vmatpush.msra.mxu2 %v4689_v42  ;;  %v402_v33 = vadd.f32 %v386_v20, %v352_v19  ;;  %v436_v35 = vadd.f32 %v420_v24, %v404_v23  ;;  %v350_v36 = vmul.f32 %v4630_v7, %v333_v26  ;;  %v457_v6 = vld [vmem:[%s7342_s5 + $0x50] sm:$0xff]  ;;  %v572_v8 = vld [vmem:[%s7342_s5 + $0x3e8] sm:$0xff]  ;;  %v988_v9 = vld [vmem:[%s7343_s6 + $0x60] sm:$0x1] }
  0x27   : > { %579 = vmatpush.msra.mxu0 %v4716_v55  ;;  %4407 = vmatpush.msra.mxu3 %v4716_v55  ;;  %v384_v37 = vmul.f32 %v3864_v27, %v4639_v11  ;;  %v349_v39 = vmul.f32 %v4630_v7, %v332_v31  ;;  %v435_v40 = vadd.f32 %v419_v32, %v403_v29  ;;  %v986_v10 = vld [vmem:[%s7343_s6 + $0x50] sm:$0xff]  ;;  %v544_v12 = vld [vmem:[%s7342_s5 + $0x308] sm:$0xff]  ;;  %v458_v15 = vld [vmem:[%s7342_s5 + $0x58] sm:$0xff] }
  0x28   : > { %4402 = vmatpush.msra.mxu1 %v4701_v47  ;;  %4403 = vmatpush.msra.mxu2 %v4701_v47  ;;  %v401_v41 = vadd.f32 %v385_v30, %v351_v25  ;;  %v383_v42 = vmul.f32 %v3863_v34, %v4639_v11  ;;  %v434_v44 = vadd.f32 %v418_v38, %v402_v33  ;;  %v415_v47 = vld [vmem:[%s7341_s4] sm:$0xff]  ;;  %v553_v13 = vld [vmem:[%s7342_s5 + $0x350] sm:$0xff]  ;;  %v554_v23 = vld [vmem:[%s7342_s5 + $0x358] sm:$0xff] }
  0x29   : > { %580 = vmatpush.msra.mxu0 %v4731_v61  ;;  %4410 = vmatpush.msra.mxu3 %v4731_v61  ;;  %v400_v7 = vadd.f32 %v384_v37, %v350_v36  ;;  %v982_v16 = vld [vmem:[%s7343_s6 + $0x30] sm:$0xff]  ;;  %v980_v18 = vld [vmem:[%s7343_s6 + $0x20] sm:$0xff]  ;;  %v574_v24 = vld [vmem:[%s7342_s5 + $0x3f8] sm:$0xff] }
  0x2a   : > { %4405 = vmatpush.msra.mxu1 %v4716_v55  ;;  %4406 = vmatpush.msra.mxu2 %v4716_v55  ;;  %v433_v11 = vadd.f32 %v417_v43, %v401_v41  ;;  %v399_v46 = vadd.f32 %v383_v42, %v349_v39  ;;  %v564_v55 = vld [vmem:[%s7342_s5 + $0x3a8] sm:$0xff]  ;;  %v573_v17 = vld [vmem:[%s7342_s5 + $0x3f0] sm:$0xff]  ;;  %v976_v20 = vld [vmem:[%s7343_s6] sm:$0xff] }
  0x2b   : > { %581 = vmatpush.msra.mxu0 %v4738_v2  ;;  %4413 = vmatpush.msra.mxu3 %v4738_v2  ;;  %v432_v48 = vadd.f32 %v416_v45, %v400_v7  ;;  %v978_v19 = vld [vmem:[%s7343_s6 + $0x10] sm:$0xff]  ;;  %v459_v21 = vld [vmem:[%s7342_s5 + $0x60] sm:$0xff]  ;;  %v460_v25 = vld [vmem:[%s7342_s5 + $0x68] sm:$0xff] }
  0x2c   : > { %4408 = vmatpush.msra.mxu1 %v4731_v61  ;;  %4409 = vmatpush.msra.mxu2 %v4731_v61  ;;  %v431_v49 = vadd.f32 %v415_v47, %v399_v46  ;;  %v567_v61 = vld [vmem:[%s7342_s5 + $0x3c0] sm:$0xff]  ;;  %v546_v26 = vld [vmem:[%s7342_s5 + $0x318] sm:$0xff]  ;;  %v556_v30 = vld [vmem:[%s7342_s5 + $0x368] sm:$0xff] }
  0x2d   : > { %582 = vmatpush.msra.mxu0 %v439_v14  ;;  %4416 = vmatpush.msra.mxu3 %v439_v14  ;;  %v555_v27 = vld [vmem:[%s7342_s5 + $0x360] sm:$0xff]  ;;  %v462_v31 = vld [vmem:[%s7342_s5 + $0x78] sm:$0xff]  ;;  %v548_v32 = vld [vmem:[%s7342_s5 + $0x328] sm:$0xff] }
  0x2e   : > { %4411 = vmatpush.msra.mxu1 %v4738_v2  ;;  %4412 = vmatpush.msra.mxu2 %v4738_v2  ;;  %v455_v2 = vld [vmem:[%s7342_s5 + $0x40] sm:$0xff]  ;;  %v557_v33 = vld [vmem:[%s7342_s5 + $0x370] sm:$0xff]  ;;  %v558_v37 = vld [vmem:[%s7342_s5 + $0x378] sm:$0xff] }
  0x2f   : > { %583 = vmatpush.msra.mxu0 %v438_v22  ;;  %4419 = vmatpush.msra.mxu3 %v438_v22  ;;  %v547_v29 = vld [vmem:[%s7342_s5 + $0x320] sm:$0xff]  ;;  %v549_v36 = vld [vmem:[%s7342_s5 + $0x330] sm:$0xff]  ;;  %v464_v39 = vld [vmem:[%s7342_s5 + $0x88] sm:$0xff] }
  0x30   : > { %4414 = vmatpush.msra.mxu1 %v439_v14  ;;  %4415 = vmatpush.msra.mxu2 %v439_v14  ;;  %v984_v14 = vld [vmem:[%s7343_s6 + $0x40] sm:$0xff]  ;;  %v465_v43 = vld [vmem:[%s7342_s5 + $0x90] sm:$0xff]  ;;  %v560_v7 = vld [vmem:[%s7342_s5 + $0x388] sm:$0xff] }
  0x31   : > { %584 = vmatpush.msra.mxu0 %v437_v28  ;;  %4422 = vmatpush.msra.mxu3 %v437_v28  ;;  %v559_v41 = vld [vmem:[%s7342_s5 + $0x380] sm:$0xff]  ;;  %v3891_v45 = vld [vmem:[%s7343_s6 + $0xd0] sm:$0x1]  ;;  %v3890_v47 = vld [vmem:[%s7343_s6 + $0xc8] sm:$0xff] }
  0x32   : > { %4417 = vmatpush.msra.mxu1 %v438_v22  ;;  %4418 = vmatpush.msra.mxu2 %v438_v22  ;;  %v545_v22 = vld [vmem:[%s7342_s5 + $0x310] sm:$0xff]  ;;  %v3889_v46 = vld [vmem:[%s7343_s6 + $0xc0] sm:$0xff] }
  0x33   : > { %585 = vmatpush.msra.mxu0 %v436_v35  ;;  %4425 = vmatpush.msra.mxu3 %v436_v35 }
  0x34   : > { %4420 = vmatpush.msra.mxu1 %v437_v28  ;;  %4421 = vmatpush.msra.mxu2 %v437_v28  ;;  %v461_v28 = vld [vmem:[%s7342_s5 + $0x70] sm:$0xff] }
  0x35   : > { %586 = vmatpush.msra.mxu0 %v435_v40  ;;  %4428 = vmatpush.msra.mxu3 %v435_v40 }
  0x36   : > { %4423 = vmatpush.msra.mxu1 %v436_v35  ;;  %4424 = vmatpush.msra.mxu2 %v436_v35  ;;  %v463_v35 = vld [vmem:[%s7342_s5 + $0x80] sm:$0xff] }
  0x37   : > { %587 = vmatpush.msra.mxu0 %v434_v44  ;;  %4431 = vmatpush.msra.mxu3 %v434_v44 }
  0x38   : > { %4426 = vmatpush.msra.mxu1 %v435_v40  ;;  %4427 = vmatpush.msra.mxu2 %v435_v40  ;;  %v550_v40 = vld [vmem:[%s7342_s5 + $0x338] sm:$0xff] }
  0x39   : > { %588 = vmatpush.msra.mxu0 %v433_v11  ;;  %4434 = vmatpush.msra.mxu3 %v433_v11 }
  0x3a   : > { %4429 = vmatpush.msra.mxu1 %v434_v44  ;;  %4430 = vmatpush.msra.mxu2 %v434_v44  ;;  %v551_v44 = vld [vmem:[%s7342_s5 + $0x340] sm:$0xff] }
  0x3b   : > { %589 = vmatpush.msra.mxu0 %v432_v48  ;;  %4437 = vmatpush.msra.mxu3 %v432_v48 }
  0x3c   : > { %4432 = vmatpush.msra.mxu1 %v433_v11  ;;  %4433 = vmatpush.msra.mxu2 %v433_v11  ;;  %v3892_v11 = vld [vmem:[%s7343_s6 + $0xd8] sm:$0x1] }
  0x3d   : > { %590 = vmatpush.msra.mxu0 %v431_v49  ;;  %4440 = vmatpush.msra.mxu3 %v431_v49 }
  0x3e   : > { %591 = vmatmul.f32.vlgmr.msra.gmra.mxu0 %v447_v50  ;;  %936 = vmatmul.f32.vlgmr.msra.gmra.mxu3 %v562_v51  ;;  %v466_v51 = vld [vmem:[%s7342_s5 + $0x98] sm:$0xff] }
  0x3f   : > { %4435 = vmatpush.msra.mxu1 %v432_v48  ;;  %4436 = vmatpush.msra.mxu2 %v432_v48  ;;  %v3887_v48 = vld [vmem:[%s7343_s6 + $0xb0] sm:$0xff] }
  0x40   : > { %3911 = vmatpush.msk.msrb.mxu3 %vm1030_vm0, %v988_v9 }
  0x41   : > { %4438 = vmatpush.msra.mxu1 %v431_v49  ;;  %4439 = vmatpush.msra.mxu2 %v431_v49  ;;  %v3888_v49 = vld [vmem:[%s7343_s6 + $0xb8] sm:$0xff] }
  0x42   : > { %882 = vmatmul.f32.vlgmr.msra.gmra.mxu1 %v544_v12  ;;  %909 = vmatmul.f32.vlgmr.msra.gmra.mxu2 %v553_v13  ;;  %v473_v13 = vld [vmem:[%s7342_s5 + $0xd0] sm:$0xff] }
  0x43   : > { %1159 = vmatpush.msrb.mxu3 %v986_v10  ;;  %3893 = vmatpush.msk.msrb.mxu1 %vm1030_vm0, %v3891_v45  ;;  %v472_v10 = vld [vmem:[%s7342_s5 + $0xc8] sm:$0xff] }
  0x44   : > { %3902 = vmatpush.msk.msrb.mxu2 %vm1030_vm0, %v3892_v11  ;;  %v478_v11 = vld [vmem:[%s7342_s5 + $0xf8] sm:$0xff] }
  0x45   : > { %1160 = vmatpush.msrb.mxu3 %v984_v14  ;;  %1047 = vmatpush.msrb.mxu1 %v3889_v46  ;;  %v989_v14 = vld [vmem:[%s7343_s6 + $0x68] sm:$0x1] }
  0x46   : > { %594 = vmatmul.f32.gmra.mxu0 %v448_v52  ;;  %939 = vmatmul.f32.gmra.mxu3 %v563_v53  ;;  %v552_v52 = vld [vmem:[%s7342_s5 + $0x348] sm:$0xff]  ;;  %v561_v53 = vld [vmem:[%s7342_s5 + $0x390] sm:$0xff] }
  0x47   : > { %1161 = vmatpush.msrb.mxu3 %v982_v16  ;;  %1088 = vmatpush.msrb.mxu2 %v3890_v47  ;;  %v3942_v16 = vld [vmem:[%s7343_s6 + $0x148] sm:$0x1]  ;;  %v479_v47 = vld [vmem:[%s7342_s5 + $0x100] sm:$0xff] }
  0x48   : > { %1048 = vmatpush.msrb.mxu1 %v3887_v48 }
  0x49   : > { %1162 = vmatpush.msrb.mxu3 %v980_v18  ;;  %1089 = vmatpush.msrb.mxu2 %v3888_v49  ;;  %v3939_v18 = vld [vmem:[%s7343_s6 + $0x130] sm:$0xff]  ;;  %v480_v49 = vld [vmem:[%s7342_s5 + $0x108] sm:$0xff] }
  0x4a   : > { %885 = vmatmul.f32.gmra.mxu1 %v545_v22  ;;  %912 = vmatmul.f32.gmra.mxu2 %v554_v23  ;;  %v3938_v22 = vld [vmem:[%s7343_s6 + $0x128] sm:$0xff] }
  0x4b   : > { %1163 = vmatpush.msrb.mxu3 %v978_v19  ;;  %v3940_v19 = vld [vmem:[%s7343_s6 + $0x138] sm:$0xff] }
  0x4d   : > { %1164 = vmatpush.msrb.mxu3 %v976_v20  ;;  %v985_v20 = vld [vmem:[%s7343_s6 + $0x48] sm:$0xff] }
  0x4e   : > { %597 = vmatmul.f32.gmra.mxu0 %v449_v54  ;;  %942 = vmatmul.f32.gmra.mxu3 %v564_v55  ;;  %v3885_v54 = vld [vmem:[%s7343_s6 + $0xa0] sm:$0xff]  ;;  %v3886_v55 = vld [vmem:[%s7343_s6 + $0xa8] sm:$0xff] }
  0x4f   : > { %1049 = vmatpush.msrb.mxu1 %v3885_v54  ;;  %1090 = vmatpush.msrb.mxu2 %v3886_v55  ;;  %v3971_v54 = vld [vmem:[%s7343_s6 + $0x1a0] sm:$0xff] }
  0x50   : > { %3952 = vmatpush.msk.msra.mxu3 %vm1030_vm0, %v3942_v16 }
  0x52   : > { %888 = vmatmul.f32.gmra.mxu1 %v546_v26  ;;  %915 = vmatmul.f32.gmra.mxu2 %v555_v27  ;;  %v3935_v26 = vld [vmem:[%s7343_s6 + $0x110] sm:$0xff]  ;;  %v3936_v27 = vld [vmem:[%s7343_s6 + $0x118] sm:$0xff] }
  0x53   : > { %1327 = vmatpush.msra.mxu3 %v3940_v19  ;;  %v485_v19 = vld [vmem:[%s7342_s5 + $0x130] sm:$0xff] }
  0x55   : > { %1328 = vmatpush.msra.mxu3 %v3938_v22  ;;  %v486_v22 = vld [vmem:[%s7342_s5 + $0x138] sm:$0xff] }
  0x56   : > { %600 = vmatmul.f32.gmra.mxu0 %v450_v56  ;;  %945 = vmatmul.f32.gmra.mxu3 %v565_v57  ;;  %v3883_v56 = vld [vmem:[%s7343_s6 + $0x90] sm:$0xff]  ;;  %v3884_v57 = vld [vmem:[%s7343_s6 + $0x98] sm:$0xff] }
  0x57   : > { %1050 = vmatpush.msrb.mxu1 %v3883_v56  ;;  %1091 = vmatpush.msrb.mxu2 %v3884_v57  ;;  %v482_v56 = vld [vmem:[%s7342_s5 + $0x118] sm:$0xff]  ;;  %v3969_v57 = vld [vmem:[%s7343_s6 + $0x190] sm:$0xff] }
  0x58   : > { %1329 = vmatpush.msra.mxu3 %v3936_v27 }
  0x5a   : > { %891 = vmatmul.f32.gmra.mxu1 %v547_v29  ;;  %918 = vmatmul.f32.gmra.mxu2 %v556_v30  ;;  %v3933_v29 = vld [vmem:[%s7343_s6 + $0x100] sm:$0xff]  ;;  %v3934_v30 = vld [vmem:[%s7343_s6 + $0x108] sm:$0xff] }
  0x5b   : > { %1330 = vmatpush.msra.mxu3 %v3934_v30 }
  0x5e   : > { %603 = vmatmul.f32.gmra.mxu0 %v451_v58  ;;  %948 = vmatmul.f32.gmra.mxu3 %v566_v59  ;;  %v3881_v58 = vld [vmem:[%s7343_s6 + $0x80] sm:$0xff]  ;;  %v3882_v59 = vld [vmem:[%s7343_s6 + $0x88] sm:$0xff] }
  0x5f   : > { %1051 = vmatpush.msrb.mxu1 %v3881_v58  ;;  %1092 = vmatpush.msrb.mxu2 %v3882_v59  ;;  %v3970_v58 = vld [vmem:[%s7343_s6 + $0x198] sm:$0xff] }
  0x62   : > { %894 = vmatmul.f32.gmra.mxu1 %v548_v32  ;;  %921 = vmatmul.f32.gmra.mxu2 %v557_v33  ;;  %v3931_v32 = vld [vmem:[%s7343_s6 + $0xf0] sm:$0xff]  ;;  %v3932_v33 = vld [vmem:[%s7343_s6 + $0xf8] sm:$0xff] }
  0x63   : > { %1331 = vmatpush.msra.mxu3 %v3932_v33  ;;  %v4005_v33 = vld [vmem:[%s7343_s6 + $0x220] sm:$0x1] }
  0x66   : > { %606 = vmatmul.f32.gmra.mxu0 %v452_v60  ;;  %951 = vmatmul.f32.gmra.mxu3 %v567_v61  ;;  %v3879_v60 = vld [vmem:[%s7343_s6 + $0x70] sm:$0xff]  ;;  %v3880_v61 = vld [vmem:[%s7343_s6 + $0x78] sm:$0xff] }
  0x67   : > { %1052 = vmatpush.msrb.mxu1 %v3879_v60  ;;  %1093 = vmatpush.msrb.mxu2 %v3880_v61  ;;  %v3967_v60 = vld [vmem:[%s7343_s6 + $0x180] sm:$0xff]  ;;  %v3968_v61 = vld [vmem:[%s7343_s6 + $0x188] sm:$0xff] }
  0x69   : > { %3920 = vmatpush.msk.msra.mxu1 %vm1030_vm0, %v989_v14 }
  0x6a   : > { %897 = vmatmul.f32.gmra.mxu1 %v549_v36  ;;  %924 = vmatmul.f32.gmra.mxu2 %v558_v37  ;;  %v3929_v36 = vld [vmem:[%s7343_s6 + $0xe0] sm:$0xff]  ;;  %v3930_v37 = vld [vmem:[%s7343_s6 + $0xe8] sm:$0xff] }
  0x6b   : > { %1332 = vmatpush.msra.mxu3 %v3930_v37  ;;  %v4003_v37 = vld [vmem:[%s7343_s6 + $0x210] sm:$0xff] }
  0x6e   : > { %609 = vmatmul.f32.gmra.mxu0 %v453_v62  ;;  %954 = vmatmul.f32.gmra.mxu3 %v568_v63  ;;  %v467_v63 = vld [vmem:[%s7342_s5 + $0xa0] sm:$0xff] }
  0x72   : > { %900 = vmatmul.f32.gmra.mxu1 %v550_v40  ;;  %927 = vmatmul.f32.gmra.mxu2 %v559_v41  ;;  %v475_v40 = vld [vmem:[%s7342_s5 + $0xe0] sm:$0xff] }
  0x76   : > { %612 = vmatmul.f32.gmra.mxu0 %v454_v0  ;;  %957 = vmatmul.f32.gmra.mxu3 %v569_v1  ;;  %v468_v1 = vld [vmem:[%s7342_s5 + $0xa8] sm:$0xff] }
  0x7a   : > { %903 = vmatmul.f32.gmra.mxu1 %v551_v44  ;;  %930 = vmatmul.f32.gmra.mxu2 %v560_v7  ;;  %v477_v7 = vld [vmem:[%s7342_s5 + $0xf0] sm:$0xff] }
  0x7e   : > { %615 = vmatmul.f32.gmra.mxu0 %v455_v2  ;;  %960 = vmatmul.f32.gmra.mxu3 %v570_v3  ;;  %v469_v3 = vld [vmem:[%s7342_s5 + $0xb0] sm:$0xff] }
  0x82   : > { %906 = vmatmul.f32.gmra.mxu1 %v552_v52  ;;  %933 = vmatmul.f32.gmra.mxu2 %v561_v53  ;;  %v3974_v53 = vld [vmem:[%s7343_s6 + $0x1b8] sm:$0x1] }
  0x86   : > { %618 = vmatmul.f32.gmra.mxu0 %v456_v4  ;;  %963 = vmatmul.f32.gmra.mxu3 %v571_v5  ;;  %v470_v5 = vld [vmem:[%s7342_s5 + $0xb8] sm:$0xff] }
  0x8e   : > { %621 = vmatmul.f32.gmra.mxu0 %v457_v6  ;;  %966 = vmatmul.f32.gmra.mxu3 %v572_v8  ;;  %v471_v8 = vld [vmem:[%s7342_s5 + $0xc0] sm:$0xff] }
  0x96   : > { %624 = vmatmul.f32.gmra.mxu0 %v458_v15  ;;  %969 = vmatmul.f32.gmra.mxu3 %v573_v17  ;;  %v3941_v15 = vld [vmem:[%s7343_s6 + $0x140] sm:$0x1]  ;;  %v987_v17 = vld [vmem:[%s7343_s6 + $0x58] sm:$0xff] }
  0x97   : > { %3943 = vmatpush.msk.msra.mxu2 %vm1030_vm0, %v3941_v15  ;;  %1200 = vmatpush.msra.mxu1 %v987_v17 }
  0x99   : > { %1286 = vmatpush.msra.mxu2 %v3939_v18  ;;  %1201 = vmatpush.msra.mxu1 %v985_v20 }
  0x9e   : > { %627 = vmatmul.f32.gmra.mxu0 %v459_v21  ;;  %972 = vmatmul.f32.gmra.mxu3 %v574_v24  ;;  %v3937_v21 = vld [vmem:[%s7343_s6 + $0x120] sm:$0xff]  ;;  %v474_v24 = vld [vmem:[%s7342_s5 + $0xd8] sm:$0xff] }
  0x9f   : > { %1287 = vmatpush.msra.mxu2 %v3937_v21 }
  0xa1   : > { %1288 = vmatpush.msra.mxu2 %v3935_v26 }
  0xa3   : > { %1289 = vmatpush.msra.mxu2 %v3933_v29 }
  0xa5   : > { %1290 = vmatpush.msra.mxu2 %v3931_v32 }
  0xa6   : > { %630 = vmatmul.f32.gmra.mxu0 %v460_v25  ;;  %v983_v25 = vld [vmem:[%s7343_s6 + $0x38] sm:$0xff] }
  0xa7   : > { %1202 = vmatpush.msra.mxu1 %v983_v25  ;;  %1291 = vmatpush.msra.mxu2 %v3929_v36  ;;  %v487_v25 = vld [vmem:[%s7342_s5 + $0x140] sm:$0xff] }
  0xae   : > { %633 = vmatmul.f32.gmra.mxu0 %v461_v28  ;;  %v981_v28 = vld [vmem:[%s7343_s6 + $0x28] sm:$0xff] }
  0xaf   : > { %1203 = vmatpush.msra.mxu1 %v981_v28  ;;  %v488_v28 = vld [vmem:[%s7342_s5 + $0x148] sm:$0xff] }
  0xb6   : > { %636 = vmatmul.f32.gmra.mxu0 %v462_v31  ;;  %v979_v31 = vld [vmem:[%s7343_s6 + $0x18] sm:$0xff] }
  0xb7   : > { %1204 = vmatpush.msra.mxu1 %v979_v31  ;;  %v489_v31 = vld [vmem:[%s7342_s5 + $0x150] sm:$0xff] }
  0xbb   : > { %v4964_v34 = vpop.f32.mrf.mxu0 }
  0xbc   : > { %3912 = vmatmul.msk.f32.vlgmr.msrb.gmra.mxu3 %vm1005_vm1, %v4964_v34 }
  0xbd   : > { %4007 = vmatpush.msk.msrb.mxu3 %vm1030_vm0, %v4005_v33  ;;  %v4038_v33 = vld [vmem:[%s7343_s6 + $0x298] sm:$0x1] }
  0xbe   : > { %639 = vmatmul.f32.gmra.mxu0 %v463_v35  ;;  %v977_v35 = vld [vmem:[%s7343_s6 + $0x8] sm:$0xff] }
  0xbf   : > { %1205 = vmatpush.msra.mxu1 %v977_v35  ;;  %v5240_v59 = vpop.f32.mrf.mxu1  ;;  %v4006_v35 = vld [vmem:[%s7343_s6 + $0x228] sm:$0x1]  ;;  %1572 = vmatpush.msrb.mxu3 %v4003_v37 }
  0xc0   : > { %v4036_v37 = vld [vmem:[%s7343_s6 + $0x288] sm:$0xff] }
  0xc1   : > { %v5214_v52 = vpop.f32.mrf.mxu3 }
  0xc2   : > { %7361 = vst [vmem:[#allocation6_spill] sm:$0xff] %v5214_v52 }
  0xc3   : > { %v4977_v38 = vpop.f32.mrf.mxu0 }
  0xc4   : > { %3913 = vmatmul.msk.f32.gmra.mxu3 %vm1005_vm1, %v4977_v38 }
  0xc5   : > { %v5286_v15 = vpop.f32.mrf.mxu2 }
  0xc6   : > { %642 = vmatmul.f32.gmra.mxu0 %v464_v39 }
  0xcb   : > { %v4990_v42 = vpop.f32.mrf.mxu0 }
  0xcc   : > { %3914 = vmatmul.msk.f32.gmra.mxu3 %vm1005_vm1, %v4990_v42 }
  0xce   : > { %645 = vmatmul.f32.gmra.mxu0 %v465_v43  ;;  %v476_v43 = vld [vmem:[%s7342_s5 + $0xe8] sm:$0xff] }
  0xd3   : > { %v5023_v50 = vpop.f32.mrf.mxu0 }
  0xd4   : > { %3915 = vmatmul.msk.f32.gmra.mxu3 %vm1005_vm1, %v5023_v50 }
  0xd6   : > { %648 = vmatmul.f32.gmra.mxu0 %v466_v51 }
  0xdb   : > { %v5060_v62 = vpop.f32.mrf.mxu0 }
  0xdc   : > { %3916 = vmatmul.msk.f32.gmra.mxu3 %vm1005_vm1, %v5060_v62 }
  0xde   : > { %651 = vmatmul.f32.gmra.mxu0 %v467_v63  ;;  %v5252_v63 = vpop.f32.mrf.mxu3 }
  0xdf   : > { %7362 = vst [vmem:[#allocation7_spill] sm:$0xff] %v5252_v63 }
  0xe3   : > { %v5067_v0 = vpop.f32.mrf.mxu0 }
  0xe4   : > { %3917 = vmatmul.msk.f32.gmra.mxu3 %vm1005_vm1, %v5067_v0 }
  0xe6   : > { %654 = vmatmul.f32.gmra.mxu0 %v468_v1  ;;  %v3966_v1 = vld [vmem:[%s7343_s6 + $0x178] sm:$0xff] }
  0xeb   : > { %v5074_v2 = vpop.f32.mrf.mxu0 }
  0xec   : > { %3918 = vmatmul.msk.f32.gmra.mxu3 %vm1005_vm1, %v5074_v2 }
  0xee   : > { %657 = vmatmul.f32.gmra.mxu0 %v469_v3  ;;  %v3963_v3 = vld [vmem:[%s7343_s6 + $0x160] sm:$0xff] }
  0xf3   : > { %v5081_v4 = vpop.f32.mrf.mxu0 }
  0xf4   : > { %3919 = vmatmul.msk.f32.gmra.mxu3 %vm1005_vm1, %v5081_v4 }
  0xf6   : > { %660 = vmatmul.f32.gmra.mxu0 %v470_v5  ;;  %v3964_v5 = vld [vmem:[%s7343_s6 + $0x168] sm:$0xff] }
  0xfb   : > { %v616_v6 = vpop.f32.mrf.mxu0 }
  0xfc   : > { %3894 = vmatmul.msk.f32.vlgmr.msrb.gmra.mxu1 %vm1005_vm1, %v616_v6  ;;  %3903 = vmatmul.msk.f32.vlgmr.msrb.gmra.mxu2 %vm1005_vm1, %v616_v6 }
  0xfd   : > { %3984 = vmatpush.msk.msrb.mxu2 %vm1030_vm0, %v3974_v53  ;;  %v491_v53 = vld [vmem:[%s7342_s5 + $0x160] sm:$0xff] }
  0xfe   : > { %663 = vmatmul.f32.gmra.mxu0 %v471_v8  ;;  %v483_v8 = vld [vmem:[%s7342_s5 + $0x120] sm:$0xff] }
 0x103   : > { %v619_v9 = vpop.f32.mrf.mxu0 }
 0x104   : > { %3895 = vmatmul.msk.f32.gmra.mxu1 %vm1005_vm1, %v619_v9  ;;  %3904 = vmatmul.msk.f32.gmra.mxu2 %vm1005_vm1, %v619_v9  ;;  %v3961_v9 = vld [vmem:[%s7343_s6 + $0x150] sm:$0xff] }
 0x106   : > { %666 = vmatmul.f32.gmra.mxu0 %v472_v10  ;;  %v3962_v10 = vld [vmem:[%s7343_s6 + $0x158] sm:$0xff] }
 0x10b   : > { %v622_v12 = vpop.f32.mrf.mxu0 }
 0x10c   : > { %3896 = vmatmul.msk.f32.gmra.mxu1 %vm1005_vm1, %v622_v12  ;;  %3905 = vmatmul.msk.f32.gmra.mxu2 %vm1005_vm1, %v622_v12  ;;  %v5279_v12 = vpop.f32.mrf.mxu1 }
 0x10e   : > { %669 = vmatmul.f32.gmra.mxu0 %v473_v13  ;;  %v5281_v13 = vpop.f32.mrf.mxu3 }
 0x10f   : > { %7363 = vst [vmem:[#allocation8_spill] sm:$0xff] %v5281_v13 }
 0x113   : > { %v625_v23 = vpop.f32.mrf.mxu0 }
 0x114   : > { %3897 = vmatmul.msk.f32.gmra.mxu1 %vm1005_vm1, %v625_v23  ;;  %3906 = vmatmul.msk.f32.gmra.mxu2 %vm1005_vm1, %v625_v23  ;;  %v5292_v16 = vpop.f32.mrf.mxu1 }
 0x116   : > { %672 = vmatmul.f32.gmra.mxu0 %v474_v24  ;;  %v5294_v17 = vpop.f32.mrf.mxu3 }
 0x117   : > { %7364 = vst [vmem:[#allocation9_spill] sm:$0xff] %v5294_v17 }
 0x11b   : > { %v628_v39 = vpop.f32.mrf.mxu0 }
 0x11c   : > { %3898 = vmatmul.msk.f32.gmra.mxu1 %vm1005_vm1, %v628_v39  ;;  %3907 = vmatmul.msk.f32.gmra.mxu2 %vm1005_vm1, %v628_v39  ;;  %v5305_v20 = vpop.f32.mrf.mxu1  ;;  %v4004_v39 = vld [vmem:[%s7343_s6 + $0x218] sm:$0xff] }
 0x11e   : > { %675 = vmatmul.f32.gmra.mxu0 %v475_v40 }
 0x123   : > { %v631_v41 = vpop.f32.mrf.mxu0 }
 0x124   : > { %3899 = vmatmul.msk.f32.gmra.mxu1 %vm1005_vm1, %v631_v41  ;;  %3908 = vmatmul.msk.f32.gmra.mxu2 %vm1005_vm1, %v631_v41  ;;  %v5321_v26 = vpop.f32.mrf.mxu1  ;;  %v490_v41 = vld [vmem:[%s7342_s5 + $0x158] sm:$0xff] }
 0x126   : > { %678 = vmatmul.f32.gmra.mxu0 %v476_v43  ;;  %v4001_v43 = vld [vmem:[%s7343_s6 + $0x200] sm:$0xff] }
 0x127   : > { %1573 = vmatpush.msrb.mxu3 %v4001_v43  ;;  %v4033_v43 = vld [vmem:[%s7343_s6 + $0x270] sm:$0xff] }
 0x12b   : > { %v634_v44 = vpop.f32.mrf.mxu0 }
 0x12c   : > { %3900 = vmatmul.msk.f32.gmra.mxu1 %vm1005_vm1, %v634_v44  ;;  %3909 = vmatmul.msk.f32.gmra.mxu2 %vm1005_vm1, %v634_v44  ;;  %v5332_v29 = vpop.f32.mrf.mxu1  ;;  %v4002_v44 = vld [vmem:[%s7343_s6 + $0x208] sm:$0xff] }
 0x12e   : > { %681 = vmatmul.f32.gmra.mxu0 %v477_v7  ;;  %v3999_v7 = vld [vmem:[%s7343_s6 + $0x1f0] sm:$0xff] }
 0x12f   : > { %1574 = vmatpush.msrb.mxu3 %v3999_v7  ;;  %v4031_v7 = vld [vmem:[%s7343_s6 + $0x260] sm:$0xff] }
 0x133   : > { %v637_v45 = vpop.f32.mrf.mxu0 }
 0x134   : > { %3901 = vmatmul.msk.f32.gmra.mxu1 %vm1005_vm1, %v637_v45  ;;  %3910 = vmatmul.msk.f32.gmra.mxu2 %vm1005_vm1, %v637_v45  ;;  %v5347_v36 = vpop.f32.mrf.mxu1  ;;  %v4000_v45 = vld [vmem:[%s7343_s6 + $0x1f8] sm:$0xff] }
 0x136   : > { %684 = vmatmul.f32.gmra.mxu0 %v478_v11 }
 0x13b   : > { %v640_v46 = vpop.f32.mrf.mxu0 }
 0x13c   : > { %3921 = vmatmul.msk.f32.vlgmr.msra.gmra.mxu1 %vm1005_vm1, %v4964_v34  ;;  %3944 = vmatmul.msk.f32.vlgmr.msra.gmra.mxu2 %vm1005_vm1, %v640_v46  ;;  %v481_v34 = vld [vmem:[%s7342_s5 + $0x110] sm:$0xff] }
 0x13d   : > { %3953 = vmatmul.msk.f32.vlgmr.msra.gmra.mxu3 %vm1005_vm1, %v640_v46 }
 0x13e   : > { %687 = vmatmul.f32.gmra.mxu0 %v479_v47  ;;  %v3997_v47 = vld [vmem:[%s7343_s6 + $0x1e0] sm:$0xff] }
 0x13f   : > { %1575 = vmatpush.msrb.mxu3 %v3997_v47 }
 0x143   : > { %v643_v48 = vpop.f32.mrf.mxu0 }
 0x144   : > { %3922 = vmatmul.msk.f32.gmra.mxu1 %vm1005_vm1, %v4977_v38  ;;  %3945 = vmatmul.msk.f32.gmra.mxu2 %vm1005_vm1, %v643_v48  ;;  %v3973_v38 = vld [vmem:[%s7343_s6 + $0x1b0] sm:$0x1] }
 0x145   : > { %3954 = vmatmul.msk.f32.gmra.mxu3 %vm1005_vm1, %v643_v48  ;;  %3975 = vmatpush.msk.msrb.mxu1 %vm1030_vm0, %v3973_v38  ;;  %v3998_v48 = vld [vmem:[%s7343_s6 + $0x1e8] sm:$0xff] }
 0x146   : > { %690 = vmatmul.f32.gmra.mxu0 %v480_v49  ;;  %v3995_v49 = vld [vmem:[%s7343_s6 + $0x1d0] sm:$0xff] }
 0x147   : > { %1429 = vmatpush.msrb.mxu1 %v3971_v54  ;;  %1576 = vmatpush.msrb.mxu3 %v3995_v49  ;;  %v3993_v54 = vld [vmem:[%s7343_s6 + $0x1c0] sm:$0xff]  ;;  %v4029_v49 = vld [vmem:[%s7343_s6 + $0x250] sm:$0xff] }
 0x149   : > { %1430 = vmatpush.msrb.mxu1 %v3969_v57  ;;  %1577 = vmatpush.msrb.mxu3 %v3993_v54 }
 0x14b   : > { %v646_v51 = vpop.f32.mrf.mxu0  ;;  %1431 = vmatpush.msrb.mxu1 %v3967_v60  ;;  %4048 = vmatpush.msk.msra.mxu3 %vm1030_vm0, %v4038_v33 }
 0x14c   : > { %3923 = vmatmul.msk.f32.gmra.mxu1 %vm1005_vm1, %v4990_v42  ;;  %3946 = vmatmul.msk.f32.gmra.mxu2 %vm1005_vm1, %v646_v51  ;;  %v3972_v42 = vld [vmem:[%s7343_s6 + $0x1a8] sm:$0xff] }
 0x14d   : > { %3955 = vmatmul.msk.f32.gmra.mxu3 %vm1005_vm1, %v646_v51  ;;  %1470 = vmatpush.msrb.mxu2 %v3972_v42  ;;  %v3996_v51 = vld [vmem:[%s7343_s6 + $0x1d8] sm:$0xff]  ;;  %v3994_v42 = vld [vmem:[%s7343_s6 + $0x1c8] sm:$0xff] }
 0x14e   : > { %693 = vmatmul.f32.gmra.mxu0 %v481_v34  ;;  %v5390_v34 = vpop.f32.mrf.mxu1  ;;  %1756 = vmatpush.msra.mxu3 %v4036_v37  ;;  %v502_v37 = vld [vmem:[%s7342_s5 + $0x1b8] sm:$0xff] }
 0x14f   : > { %1471 = vmatpush.msrb.mxu2 %v3970_v58  ;;  %v492_v58 = vld [vmem:[%s7342_s5 + $0x168] sm:$0xff] }
 0x151   : > { %1472 = vmatpush.msrb.mxu2 %v3968_v61 }
 0x153   : > { %v649_v55 = vpop.f32.mrf.mxu0  ;;  %1473 = vmatpush.msrb.mxu2 %v3966_v1 }
 0x154   : > { %3924 = vmatmul.msk.f32.gmra.mxu1 %vm1005_vm1, %v5023_v50  ;;  %3947 = vmatmul.msk.f32.gmra.mxu2 %vm1005_vm1, %v649_v55  ;;  %v3965_v50 = vld [vmem:[%s7343_s6 + $0x170] sm:$0xff] }
 0x155   : > { %3956 = vmatmul.msk.f32.gmra.mxu3 %vm1005_vm1, %v649_v55  ;;  %1432 = vmatpush.msrb.mxu1 %v3965_v50 }
 0x156   : > { %696 = vmatmul.f32.gmra.mxu0 %v482_v56  ;;  %1474 = vmatpush.msrb.mxu2 %v3964_v5  ;;  %v5410_v60 = vpop.f32.mrf.mxu1 }
 0x157   : > { %1433 = vmatpush.msrb.mxu1 %v3963_v3  ;;  %v493_v3 = vld [vmem:[%s7342_s5 + $0x170] sm:$0xff] }
 0x158   : > { %1475 = vmatpush.msrb.mxu2 %v3962_v10 }
 0x159   : > { %1434 = vmatpush.msrb.mxu1 %v3961_v9 }
 0x15b   : > { %v652_v6 = vpop.f32.mrf.mxu0  ;;  %4016 = vmatpush.msk.msra.mxu1 %vm1030_vm0, %v4006_v35  ;;  %v4035_v35 = vld [vmem:[%s7343_s6 + $0x280] sm:$0xff] }
 0x15c   : > { %3925 = vmatmul.msk.f32.gmra.mxu1 %vm1005_vm1, %v5060_v62  ;;  %3948 = vmatmul.msk.f32.gmra.mxu2 %vm1005_vm1, %v652_v6  ;;  %v484_v62 = vld [vmem:[%s7342_s5 + $0x128] sm:$0xff] }
 0x15d   : > { %3957 = vmatmul.msk.f32.gmra.mxu3 %vm1005_vm1, %v652_v6  ;;  %1613 = vmatpush.msra.mxu1 %v4004_v39 }
 0x15e   : > { %699 = vmatmul.f32.gmra.mxu0 %v483_v8  ;;  %v494_v8 = vld [vmem:[%s7342_s5 + $0x178] sm:$0xff] }
 0x15f   : > { %1614 = vmatpush.msra.mxu1 %v4002_v44  ;;  %v4034_v44 = vld [vmem:[%s7343_s6 + $0x278] sm:$0xff] }
 0x160   : > { %1757 = vmatpush.msra.mxu3 %v4034_v44  ;;  %v503_v44 = vld [vmem:[%s7342_s5 + $0x1c0] sm:$0xff] }
 0x161   : > { %1615 = vmatpush.msra.mxu1 %v4000_v45  ;;  %v4032_v45 = vld [vmem:[%s7343_s6 + $0x268] sm:$0xff] }
 0x162   : > { %1758 = vmatpush.msra.mxu3 %v4032_v45 }
 0x163   : > { %v655_v14 = vpop.f32.mrf.mxu0  ;;  %1616 = vmatpush.msra.mxu1 %v3998_v48 }
 0x164   : > { %3926 = vmatmul.msk.f32.gmra.mxu1 %vm1005_vm1, %v5067_v0  ;;  %3949 = vmatmul.msk.f32.gmra.mxu2 %vm1005_vm1, %v655_v14  ;;  %v5303_v0 = vpop.f32.mrf.mxu2 }
 0x165   : > { %3958 = vmatmul.msk.f32.gmra.mxu3 %vm1005_vm1, %v655_v14  ;;  %7365 = vst [vmem:[#allocation10_spill] sm:$0xff] %v5303_v0  ;;  %1617 = vmatpush.msra.mxu1 %v3996_v51  ;;  %v4030_v51 = vld [vmem:[%s7343_s6 + $0x258] sm:$0xff] }
 0x166   : > { %702 = vmatmul.f32.gmra.mxu0 %v484_v62  ;;  %1759 = vmatpush.msra.mxu3 %v4030_v51 }
 0x167   : > { %1618 = vmatpush.msra.mxu1 %v3994_v42  ;;  %v499_v42 = vld [vmem:[%s7342_s5 + $0x1a0] sm:$0xff] }
 0x16b   : > { %v658_v18 = vpop.f32.mrf.mxu0 }
 0x16c   : > { %3927 = vmatmul.msk.f32.gmra.mxu1 %vm1005_vm1, %v5074_v2  ;;  %3950 = vmatmul.msk.f32.gmra.mxu2 %vm1005_vm1, %v658_v18  ;;  %v5313_v2 = vpop.f32.mrf.mxu3  ;;  %v5316_v23 = vpop.f32.mrf.mxu2 }
 0x16d   : > { %3959 = vmatmul.msk.f32.gmra.mxu3 %vm1005_vm1, %v658_v18  ;;  %7366 = vst [vmem:[#allocation11_spill] sm:$0xff] %v5313_v2  ;;  %v495_v18 = vld [vmem:[%s7342_s5 + $0x180] sm:$0xff] }
 0x16e   : > { %705 = vmatmul.f32.gmra.mxu0 %v485_v19 }
 0x173   : > { %v661_v21 = vpop.f32.mrf.mxu0 }
 0x174   : > { %3928 = vmatmul.msk.f32.gmra.mxu1 %vm1005_vm1, %v5081_v4  ;;  %3951 = vmatmul.msk.f32.gmra.mxu2 %vm1005_vm1, %v661_v21  ;;  %v5325_v4 = vpop.f32.mrf.mxu2  ;;  %v5376_v46 = vpop.f32.mrf.mxu3 }
 0x175   : > { %3960 = vmatmul.msk.f32.gmra.mxu3 %vm1005_vm1, %v661_v21  ;;  %7367 = vst [vmem:[#allocation12_spill] sm:$0xff] %v5376_v46 }
 0x176   : > { %708 = vmatmul.f32.gmra.mxu0 %v486_v22 }
 0x179   : > { %v5423_v5 = vpop.f32.mrf.mxu1 }
 0x17b   : > { %v664_v24 = vpop.f32.mrf.mxu0 }
 0x17c   : > { %3976 = vmatmul.msk.f32.vlgmr.msrb.gmra.mxu1 %vm1005_vm1, %v664_v24  ;;  %3985 = vmatmul.msk.f32.vlgmr.msrb.gmra.mxu2 %vm1005_vm1, %v664_v24  ;;  %v5337_v32 = vpop.f32.mrf.mxu2  ;;  %v5405_v56 = vpop.f32.mrf.mxu3  ;;  %v496_v24 = vld [vmem:[%s7342_s5 + $0x188] sm:$0xff] }
 0x17d   : > { %7368 = vst [vmem:[#allocation13_spill] sm:$0xff] %v5405_v56  ;;  %v4125_v56 = vld [vmem:[%s7343_s6 + $0x3a0] sm:$0xff] }
 0x17e   : > { %711 = vmatmul.f32.gmra.mxu0 %v487_v25 }
 0x181   : > { %v5434_v14 = vpop.f32.mrf.mxu1 }
 0x183   : > { %v667_v27 = vpop.f32.mrf.mxu0 }
 0x184   : > { %3977 = vmatmul.msk.f32.gmra.mxu1 %vm1005_vm1, %v667_v27  ;;  %3986 = vmatmul.msk.f32.gmra.mxu2 %vm1005_vm1, %v667_v27  ;;  %v5374_v11 = vpop.f32.mrf.mxu2  ;;  %v5416_v50 = vpop.f32.mrf.mxu3 }
 0x185   : > { %7369 = vst [vmem:[#allocation14_spill] sm:$0xff] %v5416_v50 }
 0x186   : > { %714 = vmatmul.f32.gmra.mxu0 %v488_v28  ;;  %v497_v28 = vld [vmem:[%s7342_s5 + $0x190] sm:$0xff] }
 0x189   : > { %v5443_v21 = vpop.f32.mrf.mxu1 }
 0x18b   : > { %v670_v30 = vpop.f32.mrf.mxu0 }
 0x18c   : > { %3978 = vmatmul.msk.f32.gmra.mxu1 %vm1005_vm1, %v670_v30  ;;  %3987 = vmatmul.msk.f32.gmra.mxu2 %vm1005_vm1, %v670_v30  ;;  %v5403_v55 = vpop.f32.mrf.mxu2  ;;  %v5432_v10 = vpop.f32.mrf.mxu3 }
 0x18d   : > { %7370 = vst [vmem:[#allocation15_spill] sm:$0xff] %v5432_v10  ;;  %v518_v10 = vld [vmem:[%s7342_s5 + $0x238] sm:$0xff] }
 0x18e   : > { %717 = vmatmul.f32.gmra.mxu0 %v489_v31  ;;  %v4037_v31 = vld [vmem:[%s7343_s6 + $0x290] sm:$0x1] }
 0x18f   : > { %4039 = vmatpush.msk.msra.mxu2 %vm1030_vm0, %v4037_v31 }
 0x191   : > { %v5455_v30 = vpop.f32.mrf.mxu1  ;;  %1715 = vmatpush.msra.mxu2 %v4035_v35 }
 0x193   : > { %v673_v40 = vpop.f32.mrf.mxu0  ;;  %1716 = vmatpush.msra.mxu2 %v4033_v43 }
 0x194   : > { %3979 = vmatmul.msk.f32.gmra.mxu1 %vm1005_vm1, %v673_v40  ;;  %3988 = vmatmul.msk.f32.gmra.mxu2 %vm1005_vm1, %v673_v40  ;;  %v5414_v61 = vpop.f32.mrf.mxu2  ;;  %v5441_v19 = vpop.f32.mrf.mxu3 }
 0x195   : > { %7371 = vst [vmem:[#allocation16_spill] sm:$0xff] %v5441_v19  ;;  %1717 = vmatpush.msra.mxu2 %v4031_v7  ;;  %v516_v19 = vld [vmem:[%s7342_s5 + $0x228] sm:$0xff] }
 0x196   : > { %720 = vmatmul.f32.gmra.mxu0 %v490_v41  ;;  %v498_v41 = vld [vmem:[%s7342_s5 + $0x198] sm:$0xff] }
 0x197   : > { %1718 = vmatpush.msra.mxu2 %v4029_v49  ;;  %v504_v49 = vld [vmem:[%s7342_s5 + $0x1c8] sm:$0xff] }
 0x199   : > { %v5494_v48 = vpop.f32.mrf.mxu1 }
 0x19b   : > { %v676_v38 = vpop.f32.mrf.mxu0 }
 0x19c   : > { %3980 = vmatmul.msk.f32.gmra.mxu1 %vm1005_vm1, %v676_v38  ;;  %3989 = vmatmul.msk.f32.gmra.mxu2 %vm1005_vm1, %v676_v38  ;;  %v5428_v9 = vpop.f32.mrf.mxu2  ;;  %v5450_v25 = vpop.f32.mrf.mxu3  ;;  %v4027_v38 = vld [vmem:[%s7343_s6 + $0x240] sm:$0xff] }
 0x19d   : > { %7372 = vst [vmem:[#allocation17_spill] sm:$0xff] %v5450_v25  ;;  %1719 = vmatpush.msra.mxu2 %v4027_v38 }
 0x19e   : > { %723 = vmatmul.f32.gmra.mxu0 %v491_v53  ;;  %v4028_v53 = vld [vmem:[%s7343_s6 + $0x248] sm:$0xff] }
 0x19f   : > { %1760 = vmatpush.msra.mxu3 %v4028_v53 }
 0x1a3   : > { %v679_v57 = vpop.f32.mrf.mxu0 }
 0x1a4   : > { %3981 = vmatmul.msk.f32.gmra.mxu1 %vm1005_vm1, %v679_v57  ;;  %3990 = vmatmul.msk.f32.gmra.mxu2 %vm1005_vm1, %v679_v57  ;;  %v5473_v39 = vpop.f32.mrf.mxu3  ;;  %v5492_v47 = vpop.f32.mrf.mxu2  ;;  %v4025_v57 = vld [vmem:[%s7343_s6 + $0x230] sm:$0xff] }
 0x1a5   : > { %7373 = vst [vmem:[#allocation18_spill] sm:$0xff] %v5473_v39  ;;  %1720 = vmatpush.msra.mxu2 %v4025_v57 }
 0x1a6   : > { %726 = vmatmul.f32.gmra.mxu0 %v492_v58  ;;  %7374 = vst [vmem:[#allocation19_spill] sm:$0xff] %v5492_v47  ;;  %v4026_v58 = vld [vmem:[%s7343_s6 + $0x238] sm:$0xff]  ;;  %v4091_v47 = vld [vmem:[%s7343_s6 + $0x320] sm:$0xff] }
 0x1a7   : > { %1761 = vmatpush.msra.mxu3 %v4026_v58  ;;  %v4069_v58 = vld [vmem:[%s7343_s6 + $0x300] sm:$0x1] }
 0x1a8   : > { %4071 = vmatpush.msk.msrb.mxu1 %vm1030_vm0, %v4069_v58 }
 0x1ab   : > { %v682_v1 = vpop.f32.mrf.mxu0 }
 0x1ac   : > { %3982 = vmatmul.msk.f32.gmra.mxu1 %vm1005_vm1, %v682_v1  ;;  %3991 = vmatmul.msk.f32.gmra.mxu2 %vm1005_vm1, %v682_v1  ;;  %v5519_v1 = vpop.f32.mrf.mxu3 }
 0x1ad   : > { %7375 = vst [vmem:[#allocation20_spill] sm:$0xff] %v5519_v1 }
 0x1ae   : > { %729 = vmatmul.f32.gmra.mxu0 %v493_v3  ;;  %v5521_v3 = vpop.f32.mrf.mxu2 }
 0x1af   : > { %7376 = vst [vmem:[#allocation21_spill] sm:$0xff] %v5521_v3 }
 0x1b3   : > { %v685_v6 = vpop.f32.mrf.mxu0 }
 0x1b4   : > { %3983 = vmatmul.msk.f32.gmra.mxu1 %vm1005_vm1, %v685_v6  ;;  %3992 = vmatmul.msk.f32.gmra.mxu2 %vm1005_vm1, %v685_v6  ;;  %v5523_v6 = vpop.f32.mrf.mxu1 }
 0x1b5   : > { %7377 = vst [vmem:[#allocation22_spill] sm:$0xff] %v5523_v6 }
 0x1b6   : > { %732 = vmatmul.f32.gmra.mxu0 %v494_v8 }
 0x1bb   : > { %v688_v62 = vpop.f32.mrf.mxu0 }
 0x1bc   : > { %4008 = vmatmul.msk.f32.vlgmr.msrb.gmra.mxu3 %vm1005_vm1, %v688_v62  ;;  %4017 = vmatmul.msk.f32.vlgmr.msra.gmra.mxu1 %vm1005_vm1, %v688_v62  ;;  %v500_v62 = vld [vmem:[%s7342_s5 + $0x1a8] sm:$0xff] }
 0x1be   : > { %735 = vmatmul.f32.gmra.mxu0 %v495_v18  ;;  %v5530_v18 = vpop.f32.mrf.mxu3 }
 0x1c3   : > { %v691_v22 = vpop.f32.mrf.mxu0 }
 0x1c4   : > { %4009 = vmatmul.msk.f32.gmra.mxu3 %vm1005_vm1, %v691_v22  ;;  %4018 = vmatmul.msk.f32.gmra.mxu1 %vm1005_vm1, %v691_v22  ;;  %v5532_v22 = vpop.f32.mrf.mxu2 }
 0x1c5   : > { %7378 = vst [vmem:[#allocation23_spill] sm:$0xff] %v5532_v22 }
 0x1c6   : > { %738 = vmatmul.f32.gmra.mxu0 %v496_v24  ;;  %v5534_v24 = vpop.f32.mrf.mxu1  ;;  %v5541_v31 = vpop.f32.mrf.mxu3 }
 0x1c7   : > { %7379 = vst [vmem:[#allocation24_spill] sm:$0xff] %v5534_v24  ;;  %v538_v24 = vld [vmem:[%s7342_s5 + $0x2d8] sm:$0xff] }
 0x1cb   : > { %v694_v27 = vpop.f32.mrf.mxu0 }
 0x1cc   : > { %4010 = vmatmul.msk.f32.gmra.mxu3 %vm1005_vm1, %v694_v27  ;;  %4019 = vmatmul.msk.f32.gmra.mxu1 %vm1005_vm1, %v694_v27  ;;  %v5543_v33 = vpop.f32.mrf.mxu2 }
 0x1cd   : > { %7380 = vst [vmem:[#allocation25_spill] sm:$0xff] %v5543_v33 }
 0x1ce   : > { %741 = vmatmul.f32.gmra.mxu0 %v497_v28  ;;  %v501_v28 = vld [vmem:[%s7342_s5 + $0x1b0] sm:$0xff] }
 0x1d3   : > { %v697_v40 = vpop.f32.mrf.mxu0 }
 0x1d4   : > { %4011 = vmatmul.msk.f32.gmra.mxu3 %vm1005_vm1, %v697_v40  ;;  %4020 = vmatmul.msk.f32.gmra.mxu1 %vm1005_vm1, %v697_v40  ;;  %v5548_v40 = vpop.f32.mrf.mxu1  ;;  %v5559_v7 = vpop.f32.mrf.mxu2 }
 0x1d5   : > { %7381 = vst [vmem:[#allocation26_spill] sm:$0xff] %v5548_v40  ;;  %v530_v40 = vld [vmem:[%s7342_s5 + $0x298] sm:$0xff] }
 0x1d6   : > { %744 = vmatmul.f32.gmra.mxu0 %v498_v41  ;;  %v5552_v41 = vpop.f32.mrf.mxu3  ;;  %7382 = vst [vmem:[#allocation27_spill] sm:$0xff] %v5559_v7  ;;  %v522_v7 = vld [vmem:[%s7342_s5 + $0x258] sm:$0xff] }
 0x1db   : > { %v700_v54 = vpop.f32.mrf.mxu0 }
 0x1dc   : > { %4012 = vmatmul.msk.f32.gmra.mxu3 %vm1005_vm1, %v700_v54  ;;  %4021 = vmatmul.msk.f32.gmra.mxu1 %vm1005_vm1, %v700_v54  ;;  %v5568_v38 = vpop.f32.mrf.mxu2  ;;  %v505_v54 = vld [vmem:[%s7342_s5 + $0x1d0] sm:$0xff] }
 0x1dd   : > { %7383 = vst [vmem:[#allocation28_spill] sm:$0xff] %v5568_v38 }
 0x1de   : > { %747 = vmatmul.f32.gmra.mxu0 %v499_v42  ;;  %v5566_v51 = vpop.f32.mrf.mxu3  ;;  %v5575_v42 = vpop.f32.mrf.mxu1 }
 0x1df   : > { %7384 = vst [vmem:[#allocation29_spill] sm:$0xff] %v5575_v42 }
 0x1e3   : > { %v703_v8 = vpop.f32.mrf.mxu0 }
 0x1e4   : > { %4013 = vmatmul.msk.f32.gmra.mxu3 %vm1005_vm1, %v703_v8  ;;  %4022 = vmatmul.msk.f32.gmra.mxu1 %vm1005_vm1, %v703_v8  ;;  %v4070_v8 = vld [vmem:[%s7343_s6 + $0x308] sm:$0x1] }
 0x1e5   : > { %4080 = vmatpush.msk.msrb.mxu2 %vm1030_vm0, %v4070_v8 }
 0x1e6   : > { %750 = vmatmul.f32.gmra.mxu0 %v500_v62  ;;  %v5577_v57 = vpop.f32.mrf.mxu3  ;;  %v5587_v62 = vpop.f32.mrf.mxu2 }
 0x1e7   : > { %7385 = vst [vmem:[#allocation30_spill] sm:$0xff] %v5587_v62  ;;  %v5618_v58 = vpop.f32.mrf.mxu1 }
 0x1e8   : > { %7386 = vst [vmem:[#allocation31_spill] sm:$0xff] %v5618_v58 }
 0x1eb   : > { %v706_v27 = vpop.f32.mrf.mxu0 }
 0x1ec   : > { %4014 = vmatmul.msk.f32.gmra.mxu3 %vm1005_vm1, %v706_v27  ;;  %4023 = vmatmul.msk.f32.gmra.mxu1 %vm1005_vm1, %v706_v27  ;;  %v4067_v27 = vld [vmem:[%s7343_s6 + $0x2f0] sm:$0xff] }
 0x1ed   : > { %1858 = vmatpush.msrb.mxu1 %v4067_v27  ;;  %v4059_v27 = vld [vmem:[%s7343_s6 + $0x2b0] sm:$0xff] }
 0x1ee   : > { %753 = vmatmul.f32.gmra.mxu0 %v501_v28  ;;  %v4068_v28 = vld [vmem:[%s7343_s6 + $0x2f8] sm:$0xff]  ;;  %v5620_v8 = vpop.f32.mrf.mxu3 }
 0x1ef   : > { %1899 = vmatpush.msrb.mxu2 %v4068_v28  ;;  %7387 = vst [vmem:[#allocation32_spill] sm:$0xff] %v5620_v8  ;;  %v4060_v28 = vld [vmem:[%s7343_s6 + $0x2b8] sm:$0xff] }
 0x1f3   : > { %v709_v35 = vpop.f32.mrf.mxu0 }
 0x1f4   : > { %4015 = vmatmul.msk.f32.gmra.mxu3 %vm1005_vm1, %v709_v35  ;;  %4024 = vmatmul.msk.f32.gmra.mxu1 %vm1005_vm1, %v709_v35 }
 0x1f6   : > { %756 = vmatmul.f32.gmra.mxu0 %v502_v37  ;;  %v506_v37 = vld [vmem:[%s7342_s5 + $0x1d8] sm:$0xff] }
 0x1fb   : > { %v712_v43 = vpop.f32.mrf.mxu0 }
 0x1fc   : > { %4040 = vmatmul.msk.f32.vlgmr.msra.gmra.mxu2 %vm1005_vm1, %v712_v43  ;;  %4049 = vmatmul.msk.f32.vlgmr.msra.gmra.mxu3 %vm1005_vm1, %v712_v43  ;;  %v4065_v43 = vld [vmem:[%s7343_s6 + $0x2e0] sm:$0xff] }
 0x1fd   : > { %1859 = vmatpush.msrb.mxu1 %v4065_v43  ;;  %v507_v43 = vld [vmem:[%s7342_s5 + $0x1e0] sm:$0xff] }
 0x1fe   : > { %759 = vmatmul.f32.gmra.mxu0 %v503_v44  ;;  %v4066_v44 = vld [vmem:[%s7343_s6 + $0x2e8] sm:$0xff] }
 0x1ff   : > { %1900 = vmatpush.msrb.mxu2 %v4066_v44  ;;  %v4057_v44 = vld [vmem:[%s7343_s6 + $0x2a0] sm:$0xff] }
 0x203   : > { %v715_v45 = vpop.f32.mrf.mxu0 }
 0x204   : > { %4041 = vmatmul.msk.f32.gmra.mxu2 %vm1005_vm1, %v715_v45  ;;  %4050 = vmatmul.msk.f32.gmra.mxu3 %vm1005_vm1, %v715_v45  ;;  %v4063_v45 = vld [vmem:[%s7343_s6 + $0x2d0] sm:$0xff] }
 0x205   : > { %1860 = vmatpush.msrb.mxu1 %v4063_v45  ;;  %v4058_v45 = vld [vmem:[%s7343_s6 + $0x2a8] sm:$0xff] }
 0x206   : > { %762 = vmatmul.f32.gmra.mxu0 %v504_v49  ;;  %v4064_v49 = vld [vmem:[%s7343_s6 + $0x2d8] sm:$0xff] }
 0x207   : > { %1901 = vmatpush.msrb.mxu2 %v4064_v49  ;;  %v5641_v49 = vpop.f32.mrf.mxu1 }
 0x208   : > { %7389 = vst [vmem:[#allocation34_spill] sm:$0xff] %v5641_v49 }
 0x20b   : > { %v718_v53 = vpop.f32.mrf.mxu0 }
 0x20c   : > { %4042 = vmatmul.msk.f32.gmra.mxu2 %vm1005_vm1, %v718_v53  ;;  %4051 = vmatmul.msk.f32.gmra.mxu3 %vm1005_vm1, %v718_v53  ;;  %v4061_v53 = vld [vmem:[%s7343_s6 + $0x2c0] sm:$0xff] }
 0x20d   : > { %1861 = vmatpush.msrb.mxu1 %v4061_v53  ;;  %v5643_v53 = vpop.f32.mrf.mxu3 }
 0x20e   : > { %765 = vmatmul.f32.gmra.mxu0 %v505_v54  ;;  %v4062_v54 = vld [vmem:[%s7343_s6 + $0x2c8] sm:$0xff]  ;;  %7390 = vst [vmem:[#allocation35_spill] sm:$0xff] %v5643_v53 }
 0x20f   : > { %1902 = vmatpush.msrb.mxu2 %v4062_v54  ;;  %1862 = vmatpush.msrb.mxu1 %v4059_v27  ;;  %v508_v27 = vld [vmem:[%s7342_s5 + $0x1e8] sm:$0xff] }
 0x211   : > { %1903 = vmatpush.msrb.mxu2 %v4060_v28  ;;  %1863 = vmatpush.msrb.mxu1 %v4057_v44  ;;  %v5655_v44 = vpop.f32.mrf.mxu1 }
 0x212   : > { %7391 = vst [vmem:[#allocation36_spill] sm:$0xff] %v5655_v44 }
 0x213   : > { %v721_v35 = vpop.f32.mrf.mxu0  ;;  %1904 = vmatpush.msrb.mxu2 %v4058_v45 }
 0x214   : > { %4043 = vmatmul.msk.f32.gmra.mxu2 %vm1005_vm1, %v721_v35  ;;  %4052 = vmatmul.msk.f32.gmra.mxu3 %vm1005_vm1, %v721_v35  ;;  %v5628_v35 = vpop.f32.mrf.mxu2 }
 0x215   : > { %7388 = vst [vmem:[#allocation33_spill] sm:$0xff] %v5628_v35  ;;  %v5659_v45 = vpop.f32.mrf.mxu3  ;;  %v514_v35 = vld [vmem:[%s7342_s5 + $0x218] sm:$0xff] }
 0x216   : > { %768 = vmatmul.f32.gmra.mxu0 %v506_v37  ;;  %7392 = vst [vmem:[#allocation37_spill] sm:$0xff] %v5659_v45 }
 0x219   : > { %v5670_v44 = vpop.f32.mrf.mxu1 }
 0x21a   : > { %7394 = vst [vmem:[#allocation39_spill] sm:$0xff] %v5670_v44 }
 0x21b   : > { %v724_v37 = vpop.f32.mrf.mxu0 }
 0x21c   : > { %4044 = vmatmul.msk.f32.gmra.mxu2 %vm1005_vm1, %v724_v37  ;;  %4053 = vmatmul.msk.f32.gmra.mxu3 %vm1005_vm1, %v724_v37  ;;  %v5650_v28 = vpop.f32.mrf.mxu2 }
 0x21d   : > { %v5668_v1 = vpop.f32.mrf.mxu3 }
 0x21e   : > { %771 = vmatmul.f32.gmra.mxu0 %v507_v43  ;;  %v509_v43 = vld [vmem:[%s7342_s5 + $0x1f0] sm:$0xff]  ;;  %7393 = vst [vmem:[#allocation38_spill] sm:$0xff] %v5668_v1 }
 0x223   : > { %v727_v54 = vpop.f32.mrf.mxu0 }
 0x224   : > { %4045 = vmatmul.msk.f32.gmra.mxu2 %vm1005_vm1, %v727_v54  ;;  %4054 = vmatmul.msk.f32.gmra.mxu3 %vm1005_vm1, %v727_v54  ;;  %v5661_v33 = vpop.f32.mrf.mxu2 }
 0x225   : > { %v5679_v22 = vpop.f32.mrf.mxu3 }
 0x226   : > { %774 = vmatmul.f32.gmra.mxu0 %v508_v27  ;;  %v510_v27 = vld [vmem:[%s7342_s5 + $0x1f8] sm:$0xff]  ;;  %7395 = vst [vmem:[#allocation40_spill] sm:$0xff] %v5679_v22  ;;  %v513_v22 = vld [vmem:[%s7342_s5 + $0x210] sm:$0xff] }
 0x22b   : > { %v730_v37 = vpop.f32.mrf.mxu0 }
 0x22c   : > { %4046 = vmatmul.msk.f32.gmra.mxu2 %vm1005_vm1, %v730_v37  ;;  %4055 = vmatmul.msk.f32.gmra.mxu3 %vm1005_vm1, %v730_v37  ;;  %v5672_v37 = vpop.f32.mrf.mxu2 }
 0x22d   : > { %v5690_v3 = vpop.f32.mrf.mxu3 }
 0x22e   : > { %777 = vmatmul.f32.gmra.mxu0 %v509_v43  ;;  %v511_v43 = vld [vmem:[%s7342_s5 + $0x200] sm:$0xff]  ;;  %7397 = vst [vmem:[#allocation42_spill] sm:$0xff] %v5690_v3 }
 0x22f   : > { %v4099_v3 = vld [vmem:[%s7343_s6 + $0x360] sm:$0xff] }
 0x233   : > { %v733_v54 = vpop.f32.mrf.mxu0 }
 0x234   : > { %4047 = vmatmul.msk.f32.gmra.mxu2 %vm1005_vm1, %v733_v54  ;;  %4056 = vmatmul.msk.f32.gmra.mxu3 %vm1005_vm1, %v733_v54  ;;  %v5681_v54 = vpop.f32.mrf.mxu1  ;;  %v5683_v39 = vpop.f32.mrf.mxu2 }
 0x235   : > { %7396 = vst [vmem:[#allocation41_spill] sm:$0xff] %v5681_v54 }
 0x236   : > { %780 = vmatmul.f32.gmra.mxu0 %v510_v27  ;;  %v512_v27 = vld [vmem:[%s7342_s5 + $0x208] sm:$0xff] }
 0x23b   : > { %v736_v49 = vpop.f32.mrf.mxu0 }
 0x23c   : > { %4072 = vmatmul.msk.f32.vlgmr.msrb.gmra.mxu1 %vm1005_vm1, %v736_v49  ;;  %4081 = vmatmul.msk.f32.vlgmr.msrb.gmra.mxu2 %vm1005_vm1, %v736_v49  ;;  %v5692_v49 = vpop.f32.mrf.mxu1  ;;  %v5699_v25 = vpop.f32.mrf.mxu2 }
 0x23d   : > { %7398 = vst [vmem:[#allocation43_spill] sm:$0xff] %v5692_v49 }
 0x23e   : > { %783 = vmatmul.f32.gmra.mxu0 %v511_v43  ;;  %7399 = vst [vmem:[#allocation44_spill] sm:$0xff] %v5699_v25 }
 0x243   : > { %v739_v58 = vpop.f32.mrf.mxu0 }
 0x244   : > { %4073 = vmatmul.msk.f32.gmra.mxu1 %vm1005_vm1, %v739_v58  ;;  %4082 = vmatmul.msk.f32.gmra.mxu2 %vm1005_vm1, %v739_v58  ;;  %v4101_v58 = vld [vmem:[%s7343_s6 + $0x370] sm:$0x1]  ;;  %v5726_v42 = vpop.f32.mrf.mxu1 }
 0x245   : > { %4103 = vmatpush.msk.msrb.mxu3 %vm1030_vm0, %v4101_v58  ;;  %v4097_v58 = vld [vmem:[%s7343_s6 + $0x350] sm:$0xff]  ;;  %7401 = vst [vmem:[#allocation46_spill] sm:$0xff] %v5726_v42 }
 0x246   : > { %786 = vmatmul.f32.gmra.mxu0 %v512_v27  ;;  %v4102_v27 = vld [vmem:[%s7343_s6 + $0x378] sm:$0x1]  ;;  %v4093_v42 = vld [vmem:[%s7343_s6 + $0x330] sm:$0xff] }
 0x247   : > { %4112 = vmatpush.msk.msra.mxu1 %vm1030_vm0, %v4102_v27  ;;  %2001 = vmatpush.msrb.mxu3 %v4099_v3  ;;  %v4098_v27 = vld [vmem:[%s7343_s6 + $0x358] sm:$0xff]  ;;  %v4095_v3 = vld [vmem:[%s7343_s6 + $0x340] sm:$0xff] }
 0x249   : > { %2002 = vmatpush.msrb.mxu3 %v4097_v58 }
 0x24b   : > { %v742_v43 = vpop.f32.mrf.mxu0  ;;  %2003 = vmatpush.msrb.mxu3 %v4095_v3  ;;  %v4089_v3 = vld [vmem:[%s7343_s6 + $0x310] sm:$0xff] }
 0x24c   : > { %4074 = vmatmul.msk.f32.gmra.mxu1 %vm1005_vm1, %v742_v43  ;;  %4083 = vmatmul.msk.f32.gmra.mxu2 %vm1005_vm1, %v742_v43  ;;  %v5715_v43 = vpop.f32.mrf.mxu3 }
 0x24d   : > { %7400 = vst [vmem:[#allocation45_spill] sm:$0xff] %v5715_v43  ;;  %v5736_v43 = vpop.f32.mrf.mxu2  ;;  %2004 = vmatpush.msrb.mxu3 %v4093_v42 }
 0x24e   : > { %789 = vmatmul.f32.gmra.mxu0 %v513_v22  ;;  %v4100_v22 = vld [vmem:[%s7343_s6 + $0x368] sm:$0xff]  ;;  %7402 = vst [vmem:[#allocation47_spill] sm:$0xff] %v5736_v43 }
 0x24f   : > { %2042 = vmatpush.msra.mxu1 %v4100_v22  ;;  %v4096_v22 = vld [vmem:[%s7343_s6 + $0x348] sm:$0xff]  ;;  %2005 = vmatpush.msrb.mxu3 %v4091_v47 }
 0x250   : > { %v4186_v43 = vld [vmem:[%s7343_s6 + $0x468] sm:$0xff] }
 0x251   : > { %2043 = vmatpush.msra.mxu1 %v4098_v27  ;;  %v515_v27 = vld [vmem:[%s7342_s5 + $0x220] sm:$0xff]  ;;  %2006 = vmatpush.msrb.mxu3 %v4089_v3 }
 0x253   : > { %v745_v1 = vpop.f32.mrf.mxu0  ;;  %2044 = vmatpush.msra.mxu1 %v4096_v22  ;;  %v4090_v22 = vld [vmem:[%s7343_s6 + $0x318] sm:$0xff] }
 0x254   : > { %4075 = vmatmul.msk.f32.gmra.mxu1 %vm1005_vm1, %v745_v1  ;;  %4084 = vmatmul.msk.f32.gmra.mxu2 %vm1005_vm1, %v745_v1  ;;  %v4094_v1 = vld [vmem:[%s7343_s6 + $0x338] sm:$0xff]  ;;  %v5761_v42 = vpop.f32.mrf.mxu3 }
 0x255   : > { %2045 = vmatpush.msra.mxu1 %v4094_v1  ;;  %7403 = vst [vmem:[#allocation48_spill] sm:$0xff] %v5761_v42  ;;  %v5763_v1 = vpop.f32.mrf.mxu1  ;;  %v5765_v47 = vpop.f32.mrf.mxu2 }
 0x256   : > { %792 = vmatmul.f32.gmra.mxu0 %v514_v35  ;;  %v4092_v35 = vld [vmem:[%s7343_s6 + $0x328] sm:$0xff]  ;;  %7404 = vst [vmem:[#allocation49_spill] sm:$0xff] %v5765_v47 }
 0x257   : > { %2046 = vmatpush.msra.mxu1 %v4092_v35  ;;  %v532_v47 = vld [vmem:[%s7342_s5 + $0x2a8] sm:$0xff] }
 0x259   : > { %2047 = vmatpush.msra.mxu1 %v4090_v22 }
 0x25b   : > { %v748_v58 = vpop.f32.mrf.mxu0 }
 0x25c   : > { %4076 = vmatmul.msk.f32.gmra.mxu1 %vm1005_vm1, %v748_v58  ;;  %4085 = vmatmul.msk.f32.gmra.mxu2 %vm1005_vm1, %v748_v58  ;;  %v5772_v58 = vpop.f32.mrf.mxu3 }
 0x25d   : > { %7405 = vst [vmem:[#allocation50_spill] sm:$0xff] %v5772_v58  ;;  %v5774_v49 = vpop.f32.mrf.mxu1  ;;  %v5776_v3 = vpop.f32.mrf.mxu2 }
 0x25e   : > { %795 = vmatmul.f32.gmra.mxu0 %v515_v27  ;;  %7406 = vst [vmem:[#allocation51_spill] sm:$0xff] %v5776_v3  ;;  %v517_v27 = vld [vmem:[%s7342_s5 + $0x230] sm:$0xff] }
 0x263   : > { %v751_v35 = vpop.f32.mrf.mxu0 }
 0x264   : > { %4077 = vmatmul.msk.f32.gmra.mxu1 %vm1005_vm1, %v751_v35  ;;  %4086 = vmatmul.msk.f32.gmra.mxu2 %vm1005_vm1, %v751_v35  ;;  %v5783_v62 = vpop.f32.mrf.mxu3 }
 0x265   : > { %7407 = vst [vmem:[#allocation52_spill] sm:$0xff] %v5783_v62  ;;  %v5785_v35 = vpop.f32.mrf.mxu1  ;;  %v5792_v58 = vpop.f32.mrf.mxu2 }
 0x266   : > { %798 = vmatmul.f32.gmra.mxu0 %v516_v19  ;;  %7408 = vst [vmem:[#allocation53_spill] sm:$0xff] %v5792_v58 }
 0x26b   : > { %v754_v22 = vpop.f32.mrf.mxu0 }
 0x26c   : > { %4078 = vmatmul.msk.f32.gmra.mxu1 %vm1005_vm1, %v754_v22  ;;  %4087 = vmatmul.msk.f32.gmra.mxu2 %vm1005_vm1, %v754_v22  ;;  %v5794_v54 = vpop.f32.mrf.mxu3 }
 0x26d   : > { %7409 = vst [vmem:[#allocation54_spill] sm:$0xff] %v5794_v54  ;;  %v5799_v62 = vpop.f32.mrf.mxu1  ;;  %v5803_v38 = vpop.f32.mrf.mxu2 }
 0x26e   : > { %801 = vmatmul.f32.gmra.mxu0 %v517_v27  ;;  %v519_v27 = vld [vmem:[%s7342_s5 + $0x240] sm:$0xff]  ;;  %7410 = vst [vmem:[#allocation55_spill] sm:$0xff] %v5803_v38 }
 0x273   : > { %v757_v19 = vpop.f32.mrf.mxu0 }
 0x274   : > { %4079 = vmatmul.msk.f32.gmra.mxu1 %vm1005_vm1, %v757_v19  ;;  %4088 = vmatmul.msk.f32.gmra.mxu2 %vm1005_vm1, %v757_v19  ;;  %v5805_v19 = vpop.f32.mrf.mxu3 }
 0x275   : > { %v5812_v54 = vpop.f32.mrf.mxu1  ;;  %v5814_v50 = vpop.f32.mrf.mxu2 }
 0x276   : > { %804 = vmatmul.f32.gmra.mxu0 %v518_v10  ;;  %v520_v10 = vld [vmem:[%s7342_s5 + $0x248] sm:$0xff]  ;;  %7411 = vst [vmem:[#allocation56_spill] sm:$0xff] %v5812_v54  ;;  %v4289_v54 = vld [vmem:[%s7343_s6 + $0x5f0] sm:$0xff] }
 0x277   : > { %7412 = vst [vmem:[#allocation57_spill] sm:$0xff] %v5814_v50 }
 0x27b   : > { %v760_v22 = vpop.f32.mrf.mxu0 }
 0x27c   : > { %4104 = vmatmul.msk.f32.vlgmr.msrb.gmra.mxu3 %vm1005_vm1, %v760_v22  ;;  %4113 = vmatmul.msk.f32.vlgmr.msra.gmra.mxu1 %vm1005_vm1, %v760_v22  ;;  %v5821_v38 = vpop.f32.mrf.mxu3 }
 0x27d   : > { %v5829_v50 = vpop.f32.mrf.mxu1  ;;  %v5839_v42 = vpop.f32.mrf.mxu2 }
 0x27e   : > { %807 = vmatmul.f32.gmra.mxu0 %v519_v27  ;;  %v521_v27 = vld [vmem:[%s7342_s5 + $0x250] sm:$0xff]  ;;  %7413 = vst [vmem:[#allocation58_spill] sm:$0xff] %v5829_v50  ;;  %v4185_v50 = vld [vmem:[%s7343_s6 + $0x460] sm:$0xff] }
 0x27f   : > { %7414 = vst [vmem:[#allocation59_spill] sm:$0xff] %v5839_v42 }
 0x283   : > { %v763_v58 = vpop.f32.mrf.mxu0 }
 0x284   : > { %4105 = vmatmul.msk.f32.gmra.mxu3 %vm1005_vm1, %v763_v58  ;;  %4114 = vmatmul.msk.f32.gmra.mxu1 %vm1005_vm1, %v763_v58  ;;  %v4133_v58 = vld [vmem:[%s7343_s6 + $0x3e0] sm:$0x1]  ;;  %v5858_v42 = vpop.f32.mrf.mxu3 }
 0x285   : > { %4135 = vmatpush.msk.msra.mxu2 %vm1030_vm0, %v4133_v58  ;;  %v4129_v58 = vld [vmem:[%s7343_s6 + $0x3c0] sm:$0xff]  ;;  %v5885_v46 = vpop.f32.mrf.mxu2 }
 0x286   : > { %810 = vmatmul.f32.gmra.mxu0 %v520_v10  ;;  %v4134_v10 = vld [vmem:[%s7343_s6 + $0x3e8] sm:$0x1]  ;;  %7416 = vst [vmem:[#allocation61_spill] sm:$0xff] %v5885_v46 }
 0x287   : > { %4144 = vmatpush.msk.msra.mxu3 %vm1030_vm0, %v4134_v10  ;;  %v4130_v10 = vld [vmem:[%s7343_s6 + $0x3c8] sm:$0xff] }
 0x28b   : > { %v766_v22 = vpop.f32.mrf.mxu0 }
 0x28c   : > { %4106 = vmatmul.msk.f32.gmra.mxu3 %vm1005_vm1, %v766_v22  ;;  %4115 = vmatmul.msk.f32.gmra.mxu1 %vm1005_vm1, %v766_v22  ;;  %v4131_v22 = vld [vmem:[%s7343_s6 + $0x3d0] sm:$0xff]  ;;  %v5887_v2 = vpop.f32.mrf.mxu3 }
 0x28d   : > { %2144 = vmatpush.msra.mxu2 %v4131_v22  ;;  %v4127_v22 = vld [vmem:[%s7343_s6 + $0x3b0] sm:$0xff] }
 0x28e   : > { %813 = vmatmul.f32.gmra.mxu0 %v521_v27  ;;  %v4132_v27 = vld [vmem:[%s7343_s6 + $0x3d8] sm:$0xff] }
 0x28f   : > { %2185 = vmatpush.msra.mxu3 %v4132_v27  ;;  %v4128_v27 = vld [vmem:[%s7343_s6 + $0x3b8] sm:$0xff]  ;;  %2145 = vmatpush.msra.mxu2 %v4129_v58  ;;  %v4123_v58 = vld [vmem:[%s7343_s6 + $0x390] sm:$0xff] }
 0x291   : > { %2186 = vmatpush.msra.mxu3 %v4130_v10  ;;  %2146 = vmatpush.msra.mxu2 %v4127_v22  ;;  %v5872_v10 = vpop.f32.mrf.mxu1 }
 0x292   : > { %7415 = vst [vmem:[#allocation60_spill] sm:$0xff] %v5872_v10  ;;  %v4158_v10 = vld [vmem:[%s7343_s6 + $0x418] sm:$0xff] }
 0x293   : > { %v769_v44 = vpop.f32.mrf.mxu0  ;;  %2187 = vmatpush.msra.mxu3 %v4128_v27  ;;  %2147 = vmatpush.msra.mxu2 %v4125_v56  ;;  %v523_v27 = vld [vmem:[%s7342_s5 + $0x260] sm:$0xff] }
 0x294   : > { %4107 = vmatmul.msk.f32.gmra.mxu3 %vm1005_vm1, %v769_v44  ;;  %4116 = vmatmul.msk.f32.gmra.mxu1 %vm1005_vm1, %v769_v44  ;;  %v4126_v44 = vld [vmem:[%s7343_s6 + $0x3a8] sm:$0xff]  ;;  %v4121_v56 = vld [vmem:[%s7343_s6 + $0x380] sm:$0xff]  ;;  %v5898_v46 = vpop.f32.mrf.mxu3 }
 0x295   : > { %2188 = vmatpush.msra.mxu3 %v4126_v44  ;;  %2148 = vmatpush.msra.mxu2 %v4123_v58  ;;  %v4122_v44 = vld [vmem:[%s7343_s6 + $0x388] sm:$0xff]  ;;  %7419 = vst [vmem:[#allocation64_spill] sm:$0xff] %v5898_v46 }
 0x296   : > { %816 = vmatmul.f32.gmra.mxu0 %v522_v7  ;;  %v4124_v7 = vld [vmem:[%s7343_s6 + $0x398] sm:$0xff] }
 0x297   : > { %2189 = vmatpush.msra.mxu3 %v4124_v7  ;;  %2149 = vmatpush.msra.mxu2 %v4121_v56  ;;  %v524_v7 = vld [vmem:[%s7342_s5 + $0x268] sm:$0xff] }
 0x299   : > { %2190 = vmatpush.msra.mxu3 %v4122_v44  ;;  %v5892_v17 = vpop.f32.mrf.mxu1 }
 0x29a   : > { %7417 = vst [vmem:[#allocation62_spill] sm:$0xff] %v5892_v17 }
 0x29b   : > { %v772_v22 = vpop.f32.mrf.mxu0 }
 0x29c   : > { %4108 = vmatmul.msk.f32.gmra.mxu3 %vm1005_vm1, %v772_v22  ;;  %4117 = vmatmul.msk.f32.gmra.mxu1 %vm1005_vm1, %v772_v22  ;;  %v5896_v22 = vpop.f32.mrf.mxu2 }
 0x29d   : > { %7418 = vst [vmem:[#allocation63_spill] sm:$0xff] %v5896_v22  ;;  %v5914_v22 = vpop.f32.mrf.mxu3 }
 0x29e   : > { %819 = vmatmul.f32.gmra.mxu0 %v523_v27  ;;  %v525_v27 = vld [vmem:[%s7342_s5 + $0x270] sm:$0xff]  ;;  %7422 = vst [vmem:[#allocation67_spill] sm:$0xff] %v5914_v22 }
 0x29f   : > { %v4187_v22 = vld [vmem:[%s7343_s6 + $0x470] sm:$0xff] }
 0x2a1   : > { %v5905_v44 = vpop.f32.mrf.mxu1 }
 0x2a2   : > { %7420 = vst [vmem:[#allocation65_spill] sm:$0xff] %v5905_v44 }
 0x2a3   : > { %v775_v58 = vpop.f32.mrf.mxu0 }
 0x2a4   : > { %4109 = vmatmul.msk.f32.gmra.mxu3 %vm1005_vm1, %v775_v58  ;;  %4118 = vmatmul.msk.f32.gmra.mxu1 %vm1005_vm1, %v775_v58  ;;  %v5907_v17 = vpop.f32.mrf.mxu2 }
 0x2a5   : > { %7421 = vst [vmem:[#allocation66_spill] sm:$0xff] %v5907_v17  ;;  %v5925_v17 = vpop.f32.mrf.mxu3 }
 0x2a6   : > { %822 = vmatmul.f32.gmra.mxu0 %v524_v7  ;;  %v526_v7 = vld [vmem:[%s7342_s5 + $0x278] sm:$0xff]  ;;  %7425 = vst [vmem:[#allocation70_spill] sm:$0xff] %v5925_v17 }
 0x2a9   : > { %v5916_v3 = vpop.f32.mrf.mxu1 }
 0x2aa   : > { %7423 = vst [vmem:[#allocation68_spill] sm:$0xff] %v5916_v3  ;;  %v528_v3 = vld [vmem:[%s7342_s5 + $0x288] sm:$0xff] }
 0x2ab   : > { %v778_v56 = vpop.f32.mrf.mxu0 }
 0x2ac   : > { %4110 = vmatmul.msk.f32.gmra.mxu3 %vm1005_vm1, %v778_v56  ;;  %4119 = vmatmul.msk.f32.gmra.mxu1 %vm1005_vm1, %v778_v56  ;;  %v5918_v56 = vpop.f32.mrf.mxu2 }
 0x2ad   : > { %7424 = vst [vmem:[#allocation69_spill] sm:$0xff] %v5918_v56  ;;  %v5936_v56 = vpop.f32.mrf.mxu3 }
 0x2ae   : > { %825 = vmatmul.f32.gmra.mxu0 %v525_v27  ;;  %v527_v27 = vld [vmem:[%s7342_s5 + $0x280] sm:$0xff]  ;;  %7427 = vst [vmem:[#allocation72_spill] sm:$0xff] %v5936_v56 }
 0x2b3   : > { %v781_v58 = vpop.f32.mrf.mxu0 }
 0x2b4   : > { %4111 = vmatmul.msk.f32.gmra.mxu3 %vm1005_vm1, %v781_v58  ;;  %4120 = vmatmul.msk.f32.gmra.mxu1 %vm1005_vm1, %v781_v58  ;;  %v5927_v58 = vpop.f32.mrf.mxu1  ;;  %v5929_v13 = vpop.f32.mrf.mxu2 }
 0x2b5   : > { %7426 = vst [vmem:[#allocation71_spill] sm:$0xff] %v5927_v58 }
 0x2b6   : > { %828 = vmatmul.f32.gmra.mxu0 %v526_v7 }
 0x2bb   : > { %v784_v44 = vpop.f32.mrf.mxu0 }
 0x2bc   : > { %4136 = vmatmul.msk.f32.vlgmr.msra.gmra.mxu2 %vm1005_vm1, %v784_v44  ;;  %4145 = vmatmul.msk.f32.vlgmr.msra.gmra.mxu3 %vm1005_vm1, %v784_v44  ;;  %v5941_v58 = vpop.f32.mrf.mxu1  ;;  %v5945_v45 = vpop.f32.mrf.mxu2 }
 0x2bd   : > { %7428 = vst [vmem:[#allocation73_spill] sm:$0xff] %v5941_v58  ;;  %v4163_v58 = vld [vmem:[%s7343_s6 + $0x440] sm:$0xff] }
 0x2be   : > { %831 = vmatmul.f32.gmra.mxu0 %v527_v27  ;;  %v529_v27 = vld [vmem:[%s7342_s5 + $0x290] sm:$0xff] }
 0x2c3   : > { %v787_v7 = vpop.f32.mrf.mxu0 }
 0x2c4   : > { %4137 = vmatmul.msk.f32.gmra.mxu2 %vm1005_vm1, %v787_v7  ;;  %4146 = vmatmul.msk.f32.gmra.mxu3 %vm1005_vm1, %v787_v7  ;;  %v4166_v7 = vld [vmem:[%s7343_s6 + $0x458] sm:$0x1]  ;;  %v5982_v17 = vpop.f32.mrf.mxu2 }
 0x2c5   : > { %4176 = vmatpush.msk.msrb.mxu2 %vm1030_vm0, %v4166_v7  ;;  %v4162_v7 = vld [vmem:[%s7343_s6 + $0x438] sm:$0xff] }
 0x2c6   : > { %834 = vmatmul.f32.gmra.mxu0 %v528_v3  ;;  %v4165_v3 = vld [vmem:[%s7343_s6 + $0x450] sm:$0x1] }
 0x2c7   : > { %4167 = vmatpush.msk.msrb.mxu1 %vm1030_vm0, %v4165_v3  ;;  %v4161_v3 = vld [vmem:[%s7343_s6 + $0x430] sm:$0xff] }
 0x2c9   : > { %2287 = vmatpush.msrb.mxu1 %v4163_v58  ;;  %v4159_v58 = vld [vmem:[%s7343_s6 + $0x420] sm:$0xff] }
 0x2cb   : > { %v790_v44 = vpop.f32.mrf.mxu0  ;;  %2288 = vmatpush.msrb.mxu1 %v4161_v3  ;;  %v4155_v3 = vld [vmem:[%s7343_s6 + $0x400] sm:$0xff] }
 0x2cc   : > { %4138 = vmatmul.msk.f32.gmra.mxu2 %vm1005_vm1, %v790_v44  ;;  %4147 = vmatmul.msk.f32.gmra.mxu3 %vm1005_vm1, %v790_v44  ;;  %v4164_v44 = vld [vmem:[%s7343_s6 + $0x448] sm:$0xff] }
 0x2cd   : > { %2328 = vmatpush.msrb.mxu2 %v4164_v44  ;;  %v4160_v44 = vld [vmem:[%s7343_s6 + $0x428] sm:$0xff]  ;;  %2289 = vmatpush.msrb.mxu1 %v4159_v58  ;;  %v531_v58 = vld [vmem:[%s7342_s5 + $0x2a0] sm:$0xff] }
 0x2ce   : > { %837 = vmatmul.f32.gmra.mxu0 %v529_v27  ;;  %v5961_v27 = vpop.f32.mrf.mxu3 }
 0x2cf   : > { %7429 = vst [vmem:[#allocation74_spill] sm:$0xff] %v5961_v27  ;;  %2329 = vmatpush.msrb.mxu2 %v4162_v7  ;;  %v5980_v27 = vpop.f32.mrf.mxu1 }
 0x2d0   : > { %7430 = vst [vmem:[#allocation75_spill] sm:$0xff] %v5980_v27 }
 0x2d1   : > { %2330 = vmatpush.msrb.mxu2 %v4160_v44  ;;  %v4153_v44 = vld [vmem:[%s7343_s6 + $0x3f0] sm:$0xff] }
 0x2d3   : > { %v793_v56 = vpop.f32.mrf.mxu0  ;;  %2331 = vmatpush.msrb.mxu2 %v4158_v10  ;;  %v4154_v10 = vld [vmem:[%s7343_s6 + $0x3f8] sm:$0xff] }
 0x2d4   : > { %4139 = vmatmul.msk.f32.gmra.mxu2 %vm1005_vm1, %v793_v56  ;;  %4148 = vmatmul.msk.f32.gmra.mxu3 %vm1005_vm1, %v793_v56  ;;  %v4157_v56 = vld [vmem:[%s7343_s6 + $0x410] sm:$0xff] }
 0x2d5   : > { %2290 = vmatpush.msrb.mxu1 %v4157_v56 }
 0x2d6   : > { %840 = vmatmul.f32.gmra.mxu0 %v530_v40  ;;  %v4156_v40 = vld [vmem:[%s7343_s6 + $0x408] sm:$0xff]  ;;  %v6007_v56 = vpop.f32.mrf.mxu3 }
 0x2d7   : > { %2291 = vmatpush.msrb.mxu1 %v4155_v3  ;;  %2332 = vmatpush.msrb.mxu2 %v4156_v40  ;;  %7431 = vst [vmem:[#allocation76_spill] sm:$0xff] %v6007_v56  ;;  %v6009_v27 = vpop.f32.mrf.mxu1  ;;  %v6011_v3 = vpop.f32.mrf.mxu2 }
 0x2d8   : > { %7432 = vst [vmem:[#allocation77_spill] sm:$0xff] %v6009_v27 }
 0x2d9   : > { %2292 = vmatpush.msrb.mxu1 %v4153_v44  ;;  %2333 = vmatpush.msrb.mxu2 %v4154_v10  ;;  %v533_v10 = vld [vmem:[%s7342_s5 + $0x2b0] sm:$0xff] }
 0x2db   : > { %v796_v7 = vpop.f32.mrf.mxu0 }
 0x2dc   : > { %4140 = vmatmul.msk.f32.gmra.mxu2 %vm1005_vm1, %v796_v7  ;;  %4149 = vmatmul.msk.f32.gmra.mxu3 %vm1005_vm1, %v796_v7 }
 0x2de   : > { %843 = vmatmul.f32.gmra.mxu0 %v531_v58  ;;  %v6018_v7 = vpop.f32.mrf.mxu3 }
 0x2df   : > { %7433 = vst [vmem:[#allocation78_spill] sm:$0xff] %v6018_v7  ;;  %v6020_v56 = vpop.f32.mrf.mxu1  ;;  %v6022_v44 = vpop.f32.mrf.mxu2 }
 0x2e0   : > { %7434 = vst [vmem:[#allocation79_spill] sm:$0xff] %v6020_v56 }
 0x2e1   : > { %7435 = vst [vmem:[#allocation80_spill] sm:$0xff] %v6022_v44 }
 0x2e3   : > { %v799_v40 = vpop.f32.mrf.mxu0 }
 0x2e4   : > { %4141 = vmatmul.msk.f32.gmra.mxu2 %vm1005_vm1, %v799_v40  ;;  %4150 = vmatmul.msk.f32.gmra.mxu3 %vm1005_vm1, %v799_v40 }
 0x2e6   : > { %846 = vmatmul.f32.gmra.mxu0 %v532_v47  ;;  %v6029_v27 = vpop.f32.mrf.mxu3  ;;  %v534_v47 = vld [vmem:[%s7342_s5 + $0x2b8] sm:$0xff] }
 0x2e7   : > { %7436 = vst [vmem:[#allocation81_spill] sm:$0xff] %v6029_v27  ;;  %v6034_v7 = vpop.f32.mrf.mxu1  ;;  %v6038_v56 = vpop.f32.mrf.mxu2 }
 0x2e8   : > { %7437 = vst [vmem:[#allocation82_spill] sm:$0xff] %v6034_v7 }
 0x2e9   : > { %7438 = vst [vmem:[#allocation83_spill] sm:$0xff] %v6038_v56 }
 0x2eb   : > { %v802_v58 = vpop.f32.mrf.mxu0 }
 0x2ec   : > { %4142 = vmatmul.msk.f32.gmra.mxu2 %vm1005_vm1, %v802_v58  ;;  %4151 = vmatmul.msk.f32.gmra.mxu3 %vm1005_vm1, %v802_v58 }
 0x2ee   : > { %849 = vmatmul.f32.gmra.mxu0 %v533_v10  ;;  %v6040_v63 = vpop.f32.mrf.mxu3  ;;  %v535_v10 = vld [vmem:[%s7342_s5 + $0x2c0] sm:$0xff] }
 0x2ef   : > { %7439 = vst [vmem:[#allocation84_spill] sm:$0xff] %v6040_v63  ;;  %v6045_v27 = vpop.f32.mrf.mxu1  ;;  %v6049_v7 = vpop.f32.mrf.mxu2 }
 0x2f0   : > { %7440 = vst [vmem:[#allocation85_spill] sm:$0xff] %v6049_v7 }
 0x2f3   : > { %v805_v40 = vpop.f32.mrf.mxu0 }
 0x2f4   : > { %4143 = vmatmul.msk.f32.gmra.mxu2 %vm1005_vm1, %v805_v40  ;;  %4152 = vmatmul.msk.f32.gmra.mxu3 %vm1005_vm1, %v805_v40 }
 0x2f6   : > { %852 = vmatmul.f32.gmra.mxu0 %v534_v47  ;;  %v536_v47 = vld [vmem:[%s7342_s5 + $0x2c8] sm:$0xff]  ;;  %v6056_v63 = vpop.f32.mrf.mxu3 }
 0x2f7   : > { %7441 = vst [vmem:[#allocation86_spill] sm:$0xff] %v6056_v63  ;;  %v6058_v56 = vpop.f32.mrf.mxu1  ;;  %v6060_v53 = vpop.f32.mrf.mxu2 }
 0x2f8   : > { %7442 = vst [vmem:[#allocation87_spill] sm:$0xff] %v6060_v53 }
 0x2fb   : > { %v808_v58 = vpop.f32.mrf.mxu0 }
 0x2fc   : > { %4168 = vmatmul.msk.f32.vlgmr.msrb.gmra.mxu1 %vm1005_vm1, %v808_v58  ;;  %4177 = vmatmul.msk.f32.vlgmr.msrb.gmra.mxu2 %vm1005_vm1, %v808_v58 }
 0x2fe   : > { %855 = vmatmul.f32.gmra.mxu0 %v535_v10  ;;  %v537_v10 = vld [vmem:[%s7342_s5 + $0x2d0] sm:$0xff]  ;;  %v6067_v7 = vpop.f32.mrf.mxu3 }
 0x2ff   : > { %7443 = vst [vmem:[#allocation88_spill] sm:$0xff] %v6067_v7  ;;  %v6075_v63 = vpop.f32.mrf.mxu1  ;;  %v6085_v7 = vpop.f32.mrf.mxu2 }
 0x300   : > { %7444 = vst [vmem:[#allocation89_spill] sm:$0xff] %v6085_v7  ;;  %v4189_v7 = vld [vmem:[%s7343_s6 + $0x480] sm:$0xff] }
 0x303   : > { %v811_v40 = vpop.f32.mrf.mxu0 }
 0x304   : > { %4169 = vmatmul.msk.f32.gmra.mxu1 %vm1005_vm1, %v811_v40  ;;  %4178 = vmatmul.msk.f32.gmra.mxu2 %vm1005_vm1, %v811_v40  ;;  %v4197_v40 = vld [vmem:[%s7343_s6 + $0x4c0] sm:$0x1] }
 0x305   : > { %4199 = vmatpush.msk.msrb.mxu3 %vm1030_vm0, %v4197_v40  ;;  %v4193_v40 = vld [vmem:[%s7343_s6 + $0x4a0] sm:$0xff] }
 0x306   : > { %858 = vmatmul.f32.gmra.mxu0 %v536_v47  ;;  %v4198_v47 = vld [vmem:[%s7343_s6 + $0x4c8] sm:$0x1] }
 0x307   : > { %4208 = vmatpush.msk.msra.mxu1 %vm1030_vm0, %v4198_v47  ;;  %v4194_v47 = vld [vmem:[%s7343_s6 + $0x4a8] sm:$0xff] }
 0x30b   : > { %v814_v58 = vpop.f32.mrf.mxu0 }
 0x30c   : > { %4170 = vmatmul.msk.f32.gmra.mxu1 %vm1005_vm1, %v814_v58  ;;  %4179 = vmatmul.msk.f32.gmra.mxu2 %vm1005_vm1, %v814_v58  ;;  %v4195_v58 = vld [vmem:[%s7343_s6 + $0x4b0] sm:$0xff] }
 0x30d   : > { %2430 = vmatpush.msrb.mxu3 %v4195_v58  ;;  %v4191_v58 = vld [vmem:[%s7343_s6 + $0x490] sm:$0xff] }
 0x30e   : > { %861 = vmatmul.f32.gmra.mxu0 %v537_v10  ;;  %v4196_v10 = vld [vmem:[%s7343_s6 + $0x4b8] sm:$0xff] }
 0x30f   : > { %2471 = vmatpush.msra.mxu1 %v4196_v10  ;;  %v4192_v10 = vld [vmem:[%s7343_s6 + $0x498] sm:$0xff]  ;;  %2431 = vmatpush.msrb.mxu3 %v4193_v40 }
 0x310   : > { %v4188_v40 = vld [vmem:[%s7343_s6 + $0x478] sm:$0xff] }
 0x311   : > { %2472 = vmatpush.msra.mxu1 %v4194_v47  ;;  %2432 = vmatpush.msrb.mxu3 %v4191_v58  ;;  %v6116_v47 = vpop.f32.mrf.mxu3 }
 0x312   : > { %7445 = vst [vmem:[#allocation90_spill] sm:$0xff] %v6116_v47 }
 0x313   : > { %v817_v53 = vpop.f32.mrf.mxu0  ;;  %2473 = vmatpush.msra.mxu1 %v4192_v10  ;;  %2433 = vmatpush.msrb.mxu3 %v4189_v7  ;;  %v539_v10 = vld [vmem:[%s7342_s5 + $0x2e0] sm:$0xff]  ;;  %v6131_v7 = vpop.f32.mrf.mxu2 }
 0x314   : > { %4171 = vmatmul.msk.f32.gmra.mxu1 %vm1005_vm1, %v817_v53  ;;  %4180 = vmatmul.msk.f32.gmra.mxu2 %vm1005_vm1, %v817_v53  ;;  %v4190_v53 = vld [vmem:[%s7343_s6 + $0x488] sm:$0xff]  ;;  %7447 = vst [vmem:[#allocation92_spill] sm:$0xff] %v6131_v7 }
 0x315   : > { %2474 = vmatpush.msra.mxu1 %v4190_v53  ;;  %2434 = vmatpush.msrb.mxu3 %v4187_v22 }
 0x316   : > { %864 = vmatmul.f32.gmra.mxu0 %v538_v24  ;;  %v6118_v24 = vpop.f32.mrf.mxu1 }
 0x317   : > { %7446 = vst [vmem:[#allocation91_spill] sm:$0xff] %v6118_v24  ;;  %2475 = vmatpush.msra.mxu1 %v4188_v40  ;;  %2435 = vmatpush.msrb.mxu3 %v4185_v50  ;;  %v540_v40 = vld [vmem:[%s7342_s5 + $0x2e8] sm:$0xff] }
 0x319   : > { %2476 = vmatpush.msra.mxu1 %v4186_v43  ;;  %v6133_v53 = vpop.f32.mrf.mxu3  ;;  %v541_v43 = vld [vmem:[%s7342_s5 + $0x2f0] sm:$0xff] }
 0x31b   : > { %v820_v58 = vpop.f32.mrf.mxu0 }
 0x31c   : > { %4172 = vmatmul.msk.f32.gmra.mxu1 %vm1005_vm1, %v820_v58  ;;  %4181 = vmatmul.msk.f32.gmra.mxu2 %vm1005_vm1, %v820_v58  ;;  %v6142_v58 = vpop.f32.mrf.mxu2 }
 0x31d   : > { %7449 = vst [vmem:[#allocation94_spill] sm:$0xff] %v6142_v58 }
 0x31e   : > { %867 = vmatmul.f32.gmra.mxu0 %v539_v10  ;;  %v6138_v47 = vpop.f32.mrf.mxu1 }
 0x31f   : > { %7448 = vst [vmem:[#allocation93_spill] sm:$0xff] %v6138_v47 }
 0x321   : > { %v6144_v7 = vpop.f32.mrf.mxu3 }
 0x323   : > { %v823_v22 = vpop.f32.mrf.mxu0 }
 0x324   : > { %4173 = vmatmul.msk.f32.gmra.mxu1 %vm1005_vm1, %v823_v22  ;;  %4182 = vmatmul.msk.f32.gmra.mxu2 %vm1005_vm1, %v823_v22  ;;  %v6153_v47 = vpop.f32.mrf.mxu2 }
 0x325   : > { %7451 = vst [vmem:[#allocation96_spill] sm:$0xff] %v6153_v47 }
 0x326   : > { %870 = vmatmul.f32.gmra.mxu0 %v540_v40  ;;  %v6151_v10 = vpop.f32.mrf.mxu1  ;;  %v542_v40 = vld [vmem:[%s7342_s5 + $0x2f8] sm:$0xff] }
 0x327   : > { %7450 = vst [vmem:[#allocation95_spill] sm:$0xff] %v6151_v10 }
 0x329   : > { %v6160_v58 = vpop.f32.mrf.mxu3 }
 0x32b   : > { %v826_v50 = vpop.f32.mrf.mxu0 }
 0x32c   : > { %4174 = vmatmul.msk.f32.gmra.mxu1 %vm1005_vm1, %v826_v50  ;;  %4183 = vmatmul.msk.f32.gmra.mxu2 %vm1005_vm1, %v826_v50  ;;  %v6164_v50 = vpop.f32.mrf.mxu2 }
 0x32d   : > { %7453 = vst [vmem:[#allocation98_spill] sm:$0xff] %v6164_v50 }
 0x32e   : > { %873 = vmatmul.f32.gmra.mxu0 %v541_v43  ;;  %v6162_v52 = vpop.f32.mrf.mxu1  ;;  %v543_v43 = vld [vmem:[%s7342_s5 + $0x300] sm:$0xff] }
 0x32f   : > { %7452 = vst [vmem:[#allocation97_spill] sm:$0xff] %v6162_v52 }
 0x331   : > { %v6171_v47 = vpop.f32.mrf.mxu3 }
 0x332   : > { %7454 = vst [vmem:[#allocation99_spill] sm:$0xff] %v6171_v47 }
 0x333   : > { %v829_v22 = vpop.f32.mrf.mxu0 }
 0x334   : > { %4175 = vmatmul.msk.f32.gmra.mxu1 %vm1005_vm1, %v829_v22  ;;  %4184 = vmatmul.msk.f32.gmra.mxu2 %vm1005_vm1, %v829_v22 }
 0x336   : > { %876 = vmatmul.f32.gmra.mxu0 %v542_v40  ;;  %v6173_v22 = vpop.f32.mrf.mxu1  ;;  %v6177_v40 = vpop.f32.mrf.mxu2 }
 0x337   : > { %7455 = vst [vmem:[#allocation100_spill] sm:$0xff] %v6173_v22  ;;  %v4225_v22 = vld [vmem:[%s7343_s6 + $0x510] sm:$0xff] }
 0x338   : > { %7456 = vst [vmem:[#allocation101_spill] sm:$0xff] %v6177_v40 }
 0x339   : > { %v6179_v50 = vpop.f32.mrf.mxu3 }
 0x33a   : > { %7457 = vst [vmem:[#allocation102_spill] sm:$0xff] %v6179_v50 }
 0x33b   : > { %v832_v10 = vpop.f32.mrf.mxu0 }
 0x33c   : > { %4200 = vmatmul.msk.f32.vlgmr.msrb.gmra.mxu3 %vm1005_vm1, %v832_v10  ;;  %4209 = vmatmul.msk.f32.vlgmr.msra.gmra.mxu1 %vm1005_vm1, %v832_v10 }
 0x33e   : > { %879 = vmatmul.f32.gmra.mxu0 %v543_v43  ;;  %v6181_v8 = vpop.f32.mrf.mxu1  ;;  %v6185_v10 = vpop.f32.mrf.mxu2  ;;  %v4229_v43 = vld [vmem:[%s7343_s6 + $0x530] sm:$0x1] }
 0x33f   : > { %7458 = vst [vmem:[#allocation103_spill] sm:$0xff] %v6181_v8  ;;  %4231 = vmatpush.msk.msra.mxu2 %vm1030_vm0, %v4229_v43  ;;  %v4227_v8 = vld [vmem:[%s7343_s6 + $0x520] sm:$0xff]  ;;  %v4226_v43 = vld [vmem:[%s7343_s6 + $0x518] sm:$0xff] }
 0x340   : > { %7459 = vst [vmem:[#allocation104_spill] sm:$0xff] %v6185_v10 }
 0x341   : > { %2573 = vmatpush.msra.mxu2 %v4227_v8  ;;  %v6201_v10 = vpop.f32.mrf.mxu3  ;;  %v4223_v8 = vld [vmem:[%s7343_s6 + $0x500] sm:$0xff] }
 0x342   : > { %7460 = vst [vmem:[#allocation105_spill] sm:$0xff] %v6201_v10  ;;  %v4221_v10 = vld [vmem:[%s7343_s6 + $0x4f0] sm:$0xff] }
 0x343   : > { %v835_v44 = vpop.f32.mrf.mxu0  ;;  %2574 = vmatpush.msra.mxu2 %v4225_v22  ;;  %v4219_v22 = vld [vmem:[%s7343_s6 + $0x4e0] sm:$0xff] }
 0x344   : > { %4201 = vmatmul.msk.f32.gmra.mxu3 %vm1005_vm1, %v835_v44  ;;  %4210 = vmatmul.msk.f32.gmra.mxu1 %vm1005_vm1, %v835_v44  ;;  %v4230_v44 = vld [vmem:[%s7343_s6 + $0x538] sm:$0x1] }
 0x345   : > { %4240 = vmatpush.msk.msra.mxu3 %vm1030_vm0, %v4230_v44  ;;  %v4224_v44 = vld [vmem:[%s7343_s6 + $0x508] sm:$0xff]  ;;  %2575 = vmatpush.msra.mxu2 %v4223_v8 }
 0x346   : > { %v6225_v50 = vpop.f32.mrf.mxu2 }
 0x347   : > { %7462 = vst [vmem:[#allocation107_spill] sm:$0xff] %v6225_v50  ;;  %2576 = vmatpush.msra.mxu2 %v4221_v10  ;;  %v4218_v10 = vld [vmem:[%s7343_s6 + $0x4d8] sm:$0xff] }
 0x349   : > { %2577 = vmatpush.msra.mxu2 %v4219_v22 }
 0x34b   : > { %v838_v52 = vpop.f32.mrf.mxu0 }
 0x34c   : > { %4202 = vmatmul.msk.f32.gmra.mxu3 %vm1005_vm1, %v838_v52  ;;  %4211 = vmatmul.msk.f32.gmra.mxu1 %vm1005_vm1, %v838_v52  ;;  %v4228_v52 = vld [vmem:[%s7343_s6 + $0x528] sm:$0xff] }
 0x34d   : > { %2614 = vmatpush.msra.mxu3 %v4228_v52  ;;  %v6217_v52 = vpop.f32.mrf.mxu1 }
 0x34e   : > { %7461 = vst [vmem:[#allocation106_spill] sm:$0xff] %v6217_v52  ;;  %v6245_v22 = vpop.f32.mrf.mxu2 }
 0x34f   : > { %2615 = vmatpush.msra.mxu3 %v4226_v43  ;;  %v4220_v43 = vld [vmem:[%s7343_s6 + $0x4e8] sm:$0xff] }
 0x351   : > { %2616 = vmatpush.msra.mxu3 %v4224_v44  ;;  %v4217_v44 = vld [vmem:[%s7343_s6 + $0x4d0] sm:$0xff] }
 0x352   : > { %2578 = vmatpush.msra.mxu2 %v4217_v44 }
 0x353   : > { %v841_v40 = vpop.f32.mrf.mxu0 }
 0x354   : > { %4203 = vmatmul.msk.f32.gmra.mxu3 %vm1005_vm1, %v841_v40  ;;  %4212 = vmatmul.msk.f32.gmra.mxu1 %vm1005_vm1, %v841_v40  ;;  %v4222_v40 = vld [vmem:[%s7343_s6 + $0x4f8] sm:$0xff] }
 0x355   : > { %2617 = vmatpush.msra.mxu3 %v4222_v40  ;;  %v6241_v40 = vpop.f32.mrf.mxu3  ;;  %v6243_v52 = vpop.f32.mrf.mxu1 }
 0x356   : > { %7463 = vst [vmem:[#allocation108_spill] sm:$0xff] %v6241_v40  ;;  %v6253_v46 = vpop.f32.mrf.mxu2 }
 0x357   : > { %2618 = vmatpush.msra.mxu3 %v4220_v43  ;;  %7464 = vst [vmem:[#allocation109_spill] sm:$0xff] %v6243_v52 }
 0x359   : > { %2619 = vmatpush.msra.mxu3 %v4218_v10 }
 0x35b   : > { %v844_v8 = vpop.f32.mrf.mxu0 }
 0x35c   : > { %4204 = vmatmul.msk.f32.gmra.mxu3 %vm1005_vm1, %v844_v8  ;;  %4213 = vmatmul.msk.f32.gmra.mxu1 %vm1005_vm1, %v844_v8 }
 0x35d   : > { %v6249_v50 = vpop.f32.mrf.mxu3  ;;  %v6251_v6 = vpop.f32.mrf.mxu1 }
 0x35e   : > { %7465 = vst [vmem:[#allocation110_spill] sm:$0xff] %v6249_v50 }
 0x35f   : > { %7466 = vst [vmem:[#allocation111_spill] sm:$0xff] %v6251_v6 }
 0x363   : > { %v847_v43 = vpop.f32.mrf.mxu0 }
 0x364   : > { %4205 = vmatmul.msk.f32.gmra.mxu3 %vm1005_vm1, %v847_v43  ;;  %4214 = vmatmul.msk.f32.gmra.mxu1 %vm1005_vm1, %v847_v43  ;;  %v6263_v43 = vpop.f32.mrf.mxu2 }
 0x365   : > { %v6257_v44 = vpop.f32.mrf.mxu3  ;;  %v6259_v52 = vpop.f32.mrf.mxu1 }
 0x366   : > { %7467 = vst [vmem:[#allocation112_spill] sm:$0xff] %v6257_v44 }
 0x367   : > { %7468 = vst [vmem:[#allocation113_spill] sm:$0xff] %v6259_v52 }
 0x36b   : > { %v850_v8 = vpop.f32.mrf.mxu0 }
 0x36c   : > { %4206 = vmatmul.msk.f32.gmra.mxu3 %vm1005_vm1, %v850_v8  ;;  %4215 = vmatmul.msk.f32.gmra.mxu1 %vm1005_vm1, %v850_v8  ;;  %v6271_v8 = vpop.f32.mrf.mxu2 }
 0x36d   : > { %v6265_v50 = vpop.f32.mrf.mxu3  ;;  %v6269_v40 = vpop.f32.mrf.mxu1  ;;  %7471 = vst [vmem:[#allocation116_spill] sm:$0xff] %v6271_v8  ;;  %v4258_v8 = vld [vmem:[%s7343_s6 + $0x588] sm:$0xff] }
 0x36e   : > { %7469 = vst [vmem:[#allocation114_spill] sm:$0xff] %v6265_v50 }
 0x36f   : > { %7470 = vst [vmem:[#allocation115_spill] sm:$0xff] %v6269_v40 }
 0x373   : > { %v853_v10 = vpop.f32.mrf.mxu0 }
 0x374   : > { %4207 = vmatmul.msk.f32.gmra.mxu3 %vm1005_vm1, %v853_v10  ;;  %4216 = vmatmul.msk.f32.gmra.mxu1 %vm1005_vm1, %v853_v10  ;;  %v6279_v47 = vpop.f32.mrf.mxu2 }
 0x375   : > { %v6275_v52 = vpop.f32.mrf.mxu3  ;;  %v6277_v10 = vpop.f32.mrf.mxu1  ;;  %7474 = vst [vmem:[#allocation119_spill] sm:$0xff] %v6279_v47 }
 0x376   : > { %7472 = vst [vmem:[#allocation117_spill] sm:$0xff] %v6275_v52  ;;  %v4293_v52 = vld [vmem:[%s7343_s6 + $0x610] sm:$0x1] }
 0x377   : > { %7473 = vst [vmem:[#allocation118_spill] sm:$0xff] %v6277_v10  ;;  %4295 = vmatpush.msk.msrb.mxu3 %vm1030_vm0, %v4293_v52  ;;  %v4257_v52 = vld [vmem:[%s7343_s6 + $0x580] sm:$0xff] }
 0x37b   : > { %v856_v6 = vpop.f32.mrf.mxu0 }
 0x37c   : > { %4232 = vmatmul.msk.f32.vlgmr.msra.gmra.mxu2 %vm1005_vm1, %v856_v6  ;;  %4241 = vmatmul.msk.f32.vlgmr.msra.gmra.mxu3 %vm1005_vm1, %v856_v6  ;;  %v4261_v6 = vld [vmem:[%s7343_s6 + $0x5a0] sm:$0x1]  ;;  %v6308_v47 = vpop.f32.mrf.mxu2 }
 0x37d   : > { %4263 = vmatpush.msk.msrb.mxu1 %vm1030_vm0, %v4261_v6  ;;  %v6287_v40 = vpop.f32.mrf.mxu3  ;;  %v4260_v6 = vld [vmem:[%s7343_s6 + $0x598] sm:$0xff]  ;;  %v6306_v10 = vpop.f32.mrf.mxu1  ;;  %7477 = vst [vmem:[#allocation122_spill] sm:$0xff] %v6308_v47  ;;  %v4283_v47 = vld [vmem:[%s7343_s6 + $0x5c0] sm:$0xff] }
 0x37e   : > { %7475 = vst [vmem:[#allocation120_spill] sm:$0xff] %v6287_v40  ;;  %v4291_v40 = vld [vmem:[%s7343_s6 + $0x600] sm:$0xff] }
 0x37f   : > { %7476 = vst [vmem:[#allocation121_spill] sm:$0xff] %v6306_v10  ;;  %2859 = vmatpush.msrb.mxu3 %v4291_v40  ;;  %v4255_v40 = vld [vmem:[%s7343_s6 + $0x570] sm:$0xff]  ;;  %v4254_v10 = vld [vmem:[%s7343_s6 + $0x568] sm:$0xff] }
 0x381   : > { %2860 = vmatpush.msrb.mxu3 %v4289_v54  ;;  %v4251_v54 = vld [vmem:[%s7343_s6 + $0x550] sm:$0xff] }
 0x383   : > { %v859_v44 = vpop.f32.mrf.mxu0 }
 0x384   : > { %4233 = vmatmul.msk.f32.gmra.mxu2 %vm1005_vm1, %v859_v44  ;;  %4242 = vmatmul.msk.f32.gmra.mxu3 %vm1005_vm1, %v859_v44  ;;  %v4262_v44 = vld [vmem:[%s7343_s6 + $0x5a8] sm:$0x1] }
 0x385   : > { %4272 = vmatpush.msk.msrb.mxu2 %vm1030_vm0, %v4262_v44 }
 0x387   : > { %2757 = vmatpush.msrb.mxu2 %v4260_v6  ;;  %v4287_v6 = vld [vmem:[%s7343_s6 + $0x5e0] sm:$0xff] }
 0x388   : > { %2861 = vmatpush.msrb.mxu3 %v4287_v6 }
 0x389   : > { %2758 = vmatpush.msrb.mxu2 %v4258_v8  ;;  %v6339_v8 = vpop.f32.mrf.mxu3 }
 0x38a   : > { %7478 = vst [vmem:[#allocation123_spill] sm:$0xff] %v6339_v8  ;;  %v6363_v8 = vpop.f32.mrf.mxu2 }
 0x38b   : > { %v862_v50 = vpop.f32.mrf.mxu0  ;;  %7479 = vst [vmem:[#allocation124_spill] sm:$0xff] %v6363_v8 }
 0x38c   : > { %4234 = vmatmul.msk.f32.gmra.mxu2 %vm1005_vm1, %v862_v50  ;;  %4243 = vmatmul.msk.f32.gmra.mxu3 %vm1005_vm1, %v862_v50  ;;  %v4259_v50 = vld [vmem:[%s7343_s6 + $0x590] sm:$0xff] }
 0x38d   : > { %2716 = vmatpush.msrb.mxu1 %v4259_v50  ;;  %v4256_v50 = vld [vmem:[%s7343_s6 + $0x578] sm:$0xff] }
 0x38e   : > { %2759 = vmatpush.msrb.mxu2 %v4256_v50  ;;  %v6347_v50 = vpop.f32.mrf.mxu1 }
 0x38f   : > { %2717 = vmatpush.msrb.mxu1 %v4257_v52  ;;  %v4285_v52 = vld [vmem:[%s7343_s6 + $0x5d0] sm:$0xff] }
 0x390   : > { %2760 = vmatpush.msrb.mxu2 %v4254_v10  ;;  %2862 = vmatpush.msrb.mxu3 %v4285_v52  ;;  %v4249_v10 = vld [vmem:[%s7343_s6 + $0x540] sm:$0xff]  ;;  %v4281_v52 = vld [vmem:[%s7343_s6 + $0x5b0] sm:$0xff] }
 0x391   : > { %2718 = vmatpush.msrb.mxu1 %v4255_v40  ;;  %v4252_v40 = vld [vmem:[%s7343_s6 + $0x558] sm:$0xff] }
 0x392   : > { %2761 = vmatpush.msrb.mxu2 %v4252_v40  ;;  %2863 = vmatpush.msrb.mxu3 %v4283_v47 }
 0x393   : > { %v865_v44 = vpop.f32.mrf.mxu0 }
 0x394   : > { %4235 = vmatmul.msk.f32.gmra.mxu2 %vm1005_vm1, %v865_v44  ;;  %4244 = vmatmul.msk.f32.gmra.mxu3 %vm1005_vm1, %v865_v44  ;;  %v4253_v44 = vld [vmem:[%s7343_s6 + $0x560] sm:$0xff] }
 0x395   : > { %2719 = vmatpush.msrb.mxu1 %v4253_v44  ;;  %v4250_v44 = vld [vmem:[%s7343_s6 + $0x548] sm:$0xff]  ;;  %2864 = vmatpush.msrb.mxu3 %v4281_v52 }
 0x396   : > { %2762 = vmatpush.msrb.mxu2 %v4250_v44  ;;  %v6367_v24 = vpop.f32.mrf.mxu1 }
 0x397   : > { %2720 = vmatpush.msrb.mxu1 %v4251_v54  ;;  %v6365_v54 = vpop.f32.mrf.mxu3 }
 0x398   : > { %7480 = vst [vmem:[#allocation125_spill] sm:$0xff] %v6365_v54 }
 0x399   : > { %2721 = vmatpush.msrb.mxu1 %v4249_v10 }
 0x39b   : > { %v868_v6 = vpop.f32.mrf.mxu0 }
 0x39c   : > { %4236 = vmatmul.msk.f32.gmra.mxu2 %vm1005_vm1, %v868_v6  ;;  %4245 = vmatmul.msk.f32.gmra.mxu3 %vm1005_vm1, %v868_v6  ;;  %v6371_v6 = vpop.f32.mrf.mxu2 }
 0x39d   : > { %7481 = vst [vmem:[#allocation126_spill] sm:$0xff] %v6371_v6 }
 0x39e   : > { %v6377_v10 = vpop.f32.mrf.mxu1 }
 0x39f   : > { %v6375_v47 = vpop.f32.mrf.mxu3 }
 0x3a0   : > { %7482 = vst [vmem:[#allocation127_spill] sm:$0xff] %v6375_v47  ;;  %v4325_v47 = vld [vmem:[%s7343_s6 + $0x680] sm:$0x1] }
 0x3a1   : > { %4327 = vmatpush.msk.msra.mxu2 %vm1030_vm0, %v4325_v47  ;;  %v4290_v47 = vld [vmem:[%s7343_s6 + $0x5f8] sm:$0xff] }
 0x3a3   : > { %v871_v40 = vpop.f32.mrf.mxu0 }
 0x3a4   : > { %4237 = vmatmul.msk.f32.gmra.mxu2 %vm1005_vm1, %v871_v40  ;;  %4246 = vmatmul.msk.f32.gmra.mxu3 %vm1005_vm1, %v871_v40  ;;  %v6379_v44 = vpop.f32.mrf.mxu2 }
 0x3a5   : > { %7483 = vst [vmem:[#allocation128_spill] sm:$0xff] %v6379_v44 }
 0x3a6   : > { %v6385_v40 = vpop.f32.mrf.mxu1 }
 0x3a7   : > { %v6383_v54 = vpop.f32.mrf.mxu3  ;;  %7485 = vst [vmem:[#allocation130_spill] sm:$0xff] %v6385_v40 }
 0x3a8   : > { %7484 = vst [vmem:[#allocation129_spill] sm:$0xff] %v6383_v54 }
 0x3ab   : > { %v874_v25 = vpop.f32.mrf.mxu0 }
 0x3ac   : > { %4238 = vmatmul.msk.f32.gmra.mxu2 %vm1005_vm1, %v874_v25  ;;  %4247 = vmatmul.msk.f32.gmra.mxu3 %vm1005_vm1, %v874_v25  ;;  %v6387_v6 = vpop.f32.mrf.mxu2 }
 0x3ad   : > { %7486 = vst [vmem:[#allocation131_spill] sm:$0xff] %v6387_v6 }
 0x3ae   : > { %v6395_v44 = vpop.f32.mrf.mxu1 }
 0x3af   : > { %7487 = vst [vmem:[#allocation132_spill] sm:$0xff] %v6395_v44  ;;  %v4322_v44 = vld [vmem:[%s7343_s6 + $0x668] sm:$0xff] }
 0x3b3   : > { %v877_v52 = vpop.f32.mrf.mxu0 }
 0x3b4   : > { %4239 = vmatmul.msk.f32.gmra.mxu2 %vm1005_vm1, %v877_v52  ;;  %4248 = vmatmul.msk.f32.gmra.mxu3 %vm1005_vm1, %v877_v52  ;;  %v6401_v52 = vpop.f32.mrf.mxu2 }
 0x3b5   : > { %7488 = vst [vmem:[#allocation133_spill] sm:$0xff] %v6401_v52 }
 0x3bb   : > { %v880_v8 = vpop.f32.mrf.mxu0 }
 0x3bc   : > { %4264 = vmatmul.msk.f32.vlgmr.msrb.gmra.mxu1 %vm1005_vm1, %v880_v8  ;;  %4273 = vmatmul.msk.f32.vlgmr.msrb.gmra.mxu2 %vm1005_vm1, %v880_v8  ;;  %v6407_v8 = vpop.f32.mrf.mxu1  ;;  %v6419_v52 = vpop.f32.mrf.mxu2 }
 0x3bd   : > { %4296 = vmatmul.msk.f32.vlgmr.msrb.gmra.mxu3 %vm1005_vm1, %v5390_v34  ;;  %7489 = vst [vmem:[#allocation134_spill] sm:$0xff] %v6407_v8  ;;  %v4324_v8 = vld [vmem:[%s7343_s6 + $0x678] sm:$0xff] }
 0x3be   : > { %7490 = vst [vmem:[#allocation135_spill] sm:$0xff] %v6419_v52  ;;  %v4323_v52 = vld [vmem:[%s7343_s6 + $0x670] sm:$0xff] }
 0x3bf   : > { %v6393_v25 = vpop.f32.mrf.mxu3  ;;  %3002 = vmatpush.msra.mxu2 %v4323_v52  ;;  %v4288_v52 = vld [vmem:[%s7343_s6 + $0x5e8] sm:$0xff] }
 0x3c4   : > { %4265 = vmatmul.msk.f32.gmra.mxu1 %vm1005_vm1, %v5240_v59  ;;  %4274 = vmatmul.msk.f32.gmra.mxu2 %vm1005_vm1, %v5240_v59  ;;  %v4294_v59 = vld [vmem:[%s7343_s6 + $0x618] sm:$0x1]  ;;  %v6464_v40 = vpop.f32.mrf.mxu1 }
 0x3c5   : > { %4297 = vmatmul.msk.f32.gmra.mxu3 %vm1005_vm1, %v5410_v60  ;;  %4304 = vmatpush.msk.msra.mxu1 %vm1030_vm0, %v4294_v59  ;;  %v4292_v59 = vld [vmem:[%s7343_s6 + $0x608] sm:$0xff]  ;;  %7492 = vst [vmem:[#allocation137_spill] sm:$0xff] %v6464_v40  ;;  %v4316_v40 = vld [vmem:[%s7343_s6 + $0x638] sm:$0xff] }
 0x3c7   : > { %v6405_v6 = vpop.f32.mrf.mxu3  ;;  %2900 = vmatpush.msra.mxu1 %v4292_v59  ;;  %v4320_v59 = vld [vmem:[%s7343_s6 + $0x658] sm:$0xff] }
 0x3c9   : > { %2901 = vmatpush.msra.mxu1 %v4290_v47  ;;  %v4286_v47 = vld [vmem:[%s7343_s6 + $0x5d8] sm:$0xff] }
 0x3cb   : > { %2902 = vmatpush.msra.mxu1 %v4288_v52  ;;  %v4315_v52 = vld [vmem:[%s7343_s6 + $0x630] sm:$0xff] }
 0x3cc   : > { %4266 = vmatmul.msk.f32.gmra.mxu1 %vm1005_vm1, %v5279_v12  ;;  %4275 = vmatmul.msk.f32.gmra.mxu2 %vm1005_vm1, %v5279_v12  ;;  %v4326_v12 = vld [vmem:[%s7343_s6 + $0x688] sm:$0x1] }
 0x3cd   : > { %4298 = vmatmul.msk.f32.gmra.mxu3 %vm1005_vm1, %v5286_v15  ;;  %2903 = vmatpush.msra.mxu1 %v4286_v47  ;;  %v6505_v47 = vpop.f32.mrf.mxu1 }
 0x3ce   : > { %4336 = vmatpush.msk.msra.mxu3 %vm1030_vm0, %v4326_v12  ;;  %v4321_v12 = vld [vmem:[%s7343_s6 + $0x660] sm:$0xff] }
 0x3cf   : > { %v6421_v54 = vpop.f32.mrf.mxu3  ;;  %3003 = vmatpush.msra.mxu2 %v4321_v12  ;;  %v6480_v12 = vpop.f32.mrf.mxu2 }
 0x3d0   : > { %7491 = vst [vmem:[#allocation136_spill] sm:$0xff] %v6421_v54  ;;  %3043 = vmatpush.msra.mxu3 %v4324_v8  ;;  %v4319_v8 = vld [vmem:[%s7343_s6 + $0x650] sm:$0xff]  ;;  %v4318_v54 = vld [vmem:[%s7343_s6 + $0x648] sm:$0xff] }
 0x3d1   : > { %3004 = vmatpush.msra.mxu2 %v4319_v8  ;;  %v4282_v8 = vld [vmem:[%s7343_s6 + $0x5b8] sm:$0xff] }
 0x3d2   : > { %3044 = vmatpush.msra.mxu3 %v4322_v44  ;;  %v4284_v44 = vld [vmem:[%s7343_s6 + $0x5c8] sm:$0xff] }
 0x3d3   : > { %2904 = vmatpush.msra.mxu1 %v4284_v44 }
 0x3d4   : > { %4267 = vmatmul.msk.f32.gmra.mxu1 %vm1005_vm1, %v5292_v16  ;;  %4276 = vmatmul.msk.f32.gmra.mxu2 %vm1005_vm1, %v5292_v16 }
 0x3d5   : > { %4299 = vmatmul.msk.f32.gmra.mxu3 %vm1005_vm1, %v5303_v0  ;;  %v4317_v0 = vld [vmem:[%s7343_s6 + $0x640] sm:$0xff]  ;;  %2905 = vmatpush.msra.mxu1 %v4282_v8 }
 0x3d6   : > { %3045 = vmatpush.msra.mxu3 %v4320_v59  ;;  %3005 = vmatpush.msra.mxu2 %v4317_v0  ;;  %v4313_v0 = vld [vmem:[%s7343_s6 + $0x620] sm:$0xff] }
 0x3d7   : > { %v6466_v16 = vpop.f32.mrf.mxu3 }
 0x3d8   : > { %3046 = vmatpush.msra.mxu3 %v4318_v54  ;;  %3006 = vmatpush.msra.mxu2 %v4315_v52  ;;  %v4314_v54 = vld [vmem:[%s7343_s6 + $0x628] sm:$0xff]  ;;  %v1167_v52 = vadd.f32 %v5530_v18, %v5423_v5  ;;  %v1170_v5 = vadd.f32 %v5541_v31, %v5434_v14 }
 0x3da   : > { %3047 = vmatpush.msra.mxu3 %v4316_v40  ;;  %3007 = vmatpush.msra.mxu2 %v4313_v0  ;;  %v6517_v40 = vpop.f32.mrf.mxu1 }
 0x3db   : > { %7494 = vst [vmem:[#allocation139_spill] sm:$0xff] %v6517_v40 }
 0x3dc   : > { %4268 = vmatmul.msk.f32.gmra.mxu1 %vm1005_vm1, %v5305_v20  ;;  %4277 = vmatmul.msk.f32.gmra.mxu2 %vm1005_vm1, %v5305_v20  ;;  %v6507_v20 = vpop.f32.mrf.mxu2 }
 0x3dd   : > { %4300 = vmatmul.msk.f32.gmra.mxu3 %vm1005_vm1, %v5316_v23  ;;  %7493 = vst [vmem:[#allocation138_spill] sm:$0xff] %v6507_v20 }
 0x3de   : > { %3048 = vmatpush.msra.mxu3 %v4314_v54 }
 0x3df   : > { %v6503_v59 = vpop.f32.mrf.mxu3 }
 0x3e2   : > { %v6537_v20 = vpop.f32.mrf.mxu1 }
 0x3e4   : > { %4269 = vmatmul.msk.f32.gmra.mxu1 %vm1005_vm1, %v5321_v26  ;;  %4278 = vmatmul.msk.f32.gmra.mxu2 %vm1005_vm1, %v5321_v26  ;;  %v6525_v8 = vpop.f32.mrf.mxu2  ;;  %v1358_v26 = vadd.f32 %v5650_v28, %v1167_v52 }
 0x3e5   : > { %4301 = vmatmul.msk.f32.gmra.mxu3 %vm1005_vm1, %v5325_v4 }
 0x3e6   : > { %v1501_v54 = vadd.f32 %v5763_v1, %v1358_v26 }
 0x3e7   : > { %v6515_v44 = vpop.f32.mrf.mxu3 }
 0x3e8   : > { %v1644_v40 = vadd.f32 %v5805_v19, %v1501_v54  ;;  %v4358_v54 = vld [vmem:[%s7343_s6 + $0x6f8] sm:$0x1] }
 0x3e9   : > { %4368 = vmatpush.msk.msrb.mxu2 %vm1030_vm0, %v4358_v54  ;;  %v7512_v54 = vld [vmem:[#allocation67_spill] sm:$0xff] }
 0x3ea   : > { %v1787_v18 = vadd.f32 %v5929_v13, %v1644_v40 }
 0x3ec   : > { %4270 = vmatmul.msk.f32.gmra.mxu1 %vm1005_vm1, %v5332_v29  ;;  %4279 = vmatmul.msk.f32.gmra.mxu2 %vm1005_vm1, %v5332_v29  ;;  %v1360_v29 = vadd.f32 %v5661_v33, %v1170_v5  ;;  %v1930_v28 = vadd.f32 %v6045_v27, %v1787_v18  ;;  %v6547_v1 = vpop.f32.mrf.mxu2  ;;  %v7499_v18 = vld [vmem:[#allocation99_spill] sm:$0xff] }
 0x3ed   : > { %4302 = vmatmul.msk.f32.gmra.mxu3 %vm1005_vm1, %v5337_v32 }
 0x3ee   : > { %v1503_v13 = vadd.f32 %v5774_v49, %v1360_v29  ;;  %v2073_v31 = vadd.f32 %v6133_v53, %v1930_v28 }
 0x3ef   : > { %v6530_v0 = vpop.f32.mrf.mxu3 }
 0x3f0   : > { %v1646_v19 = vadd.f32 %v5821_v38, %v1503_v13  ;;  %v2216_v40 = vadd.f32 %v6245_v22, %v2073_v31  ;;  %v4355_v13 = vld [vmem:[%s7343_s6 + $0x6e0] sm:$0xff]  ;;  %v4356_v31 = vld [vmem:[%s7343_s6 + $0x6e8] sm:$0xff] }
 0x3f1   : > { %3186 = vmatpush.msrb.mxu2 %v4356_v31  ;;  %v7514_v31 = vld [vmem:[#allocation24_spill] sm:$0xff] }
 0x3f2   : > { %v1789_v52 = vadd.f32 %v5945_v45, %v1646_v19  ;;  %v2359_v33 = vadd.f32 %v6347_v50, %v2216_v40  ;;  %v4353_v19 = vld [vmem:[%s7343_s6 + $0x6d0] sm:$0xff] }
 0x3f3   : > { %v7500_v40 = vld [vmem:[#allocation64_spill] sm:$0xff] }
 0x3f4   : > { %4271 = vmatmul.msk.f32.gmra.mxu1 %vm1005_vm1, %v5347_v36  ;;  %4280 = vmatmul.msk.f32.gmra.mxu2 %vm1005_vm1, %v5347_v36  ;;  %v1173_v36 = vadd.f32 %v5552_v41, %v5443_v21  ;;  %v1932_v49 = vadd.f32 %v6058_v56, %v1789_v52  ;;  %v2502_v27 = vadd.f32 %v6393_v25, %v2359_v33  ;;  %v6568_v21 = vpop.f32.mrf.mxu1  ;;  %v7501_v52 = vld [vmem:[#allocation116_spill] sm:$0xff] }
 0x3f5   : > { %4303 = vmatmul.msk.f32.gmra.mxu3 %vm1005_vm1, %v5374_v11 }
 0x3f6   : > { %v1362_v38 = vadd.f32 %v5672_v37, %v1173_v36  ;;  %v1176_v37 = vadd.f32 %v5566_v51, %v5455_v30 }
 0x3f7   : > { %v6549_v14 = vpop.f32.mrf.mxu3 }
 0x3f8   : > { %v1505_v53 = vadd.f32 %v5785_v35, %v1362_v38 }
 0x3fa   : > { %v1648_v50 = vadd.f32 %v5858_v42, %v1505_v53  ;;  %v1364_v42 = vadd.f32 %v5683_v39, %v1176_v37 }
 0x3fc   : > { %4305 = vmatmul.msk.f32.vlgmr.msra.gmra.mxu1 %vm1005_vm1, %v5390_v34  ;;  %4328 = vmatmul.msk.f32.vlgmr.msra.gmra.mxu2 %vm1005_vm1, %v5403_v55  ;;  %v2075_v34 = vadd.f32 %v6144_v7, %v1932_v49  ;;  %v1791_v56 = vadd.f32 %v5982_v17, %v1648_v50  ;;  %v1507_v17 = vadd.f32 %v5799_v62, %v1364_v42  ;;  %v7495_v62 = vld [vmem:[#allocation44_spill] sm:$0xff]  ;;  %v4354_v49 = vld [vmem:[%s7343_s6 + $0x6d8] sm:$0xff]  ;;  %v4351_v42 = vld [vmem:[%s7343_s6 + $0x6c0] sm:$0xff] }
 0x3fd   : > { %4337 = vmatmul.msk.f32.vlgmr.msra.gmra.mxu3 %vm1005_vm1, %v5403_v55  ;;  %3187 = vmatpush.msrb.mxu2 %v4354_v49 }
 0x3fe   : > { %v2218_v55 = vadd.f32 %v6253_v46, %v2075_v34  ;;  %v1934_v46 = vadd.f32 %v6075_v63, %v1791_v56  ;;  %v1650_v26 = vadd.f32 %v5887_v2, %v1507_v17  ;;  %v1179_v63 = vadd.f32 %v5577_v57, %v5494_v48  ;;  %v4357_v2 = vld [vmem:[%s7343_s6 + $0x6f0] sm:$0x1]  ;;  %v7496_v48 = vld [vmem:[#allocation91_spill] sm:$0xff]  ;;  %v7506_v56 = vld [vmem:[#allocation10_spill] sm:$0xff] }
 0x3ff   : > { %v2580_v41 = vpop.f32.mrf.mxu2  ;;  %v6570_v45 = vpop.f32.mrf.mxu3  ;;  %4359 = vmatpush.msk.msrb.mxu1 %vm1030_vm0, %v4357_v2  ;;  %v7504_v34 = vld [vmem:[#allocation80_spill] sm:$0xff]  ;;  %v7509_v17 = vld [vmem:[#allocation93_spill] sm:$0xff]  ;;  %v7510_v2 = vld [vmem:[#allocation58_spill] sm:$0xff] }
 0x400   : > { %v6574_v22 = vadd.f32 %v2580_v41, %v2502_v27  ;;  %v2361_v25 = vadd.f32 %v6367_v24, %v2218_v55  ;;  %v2077_v24 = vadd.f32 %v6160_v58, %v1934_v46  ;;  %v1793_v39 = vadd.f32 %v6011_v3, %v1650_v26  ;;  %v7497_v3 = vld [vmem:[#allocation136_spill] sm:$0xff]  ;;  %v7502_v27 = vld [vmem:[#allocation22_spill] sm:$0xff]  ;;  %v4352_v46 = vld [vmem:[%s7343_s6 + $0x6c8] sm:$0xff] }
 0x401   : > { %v1366_v58 = vadd.f32 %v7495_v62, %v1179_v63  ;;  %3145 = vmatpush.msrb.mxu1 %v4355_v13  ;;  %v7503_v41 = vld [vmem:[#allocation32_spill] sm:$0xff]  ;;  %v7505_v55 = vld [vmem:[#allocation130_spill] sm:$0xff]  ;;  %3188 = vmatpush.msrb.mxu2 %v4352_v46  ;;  %v4346_v13 = vld [vmem:[%s7343_s6 + $0x698] sm:$0xff] }
 0x402   : > { %v2504_v35 = vadd.f32 %v6405_v6, %v2361_v25  ;;  %v1936_v57 = vadd.f32 %v7496_v48, %v1793_v39  ;;  %v1182_v53 = vadd.f32 %v7503_v41, %v7502_v27  ;;  %v7507_v25 = vld [vmem:[#allocation6_spill] sm:$0xff]  ;;  %v4349_v39 = vld [vmem:[%s7343_s6 + $0x6b0] sm:$0xff]  ;;  %v7518_v41 = vld [vmem:[#allocation7_spill] sm:$0xff] }
 0x403   : > { %3146 = vmatpush.msrb.mxu1 %v4353_v19  ;;  %v7515_v19 = vld [vmem:[#allocation35_spill] sm:$0xff]  ;;  %v7522_v46 = vld [vmem:[#allocation105_spill] sm:$0xff] }
 0x404   : > { %4306 = vmatmul.msk.f32.gmra.mxu1 %vm1005_vm1, %v5410_v60  ;;  %4329 = vmatmul.msk.f32.gmra.mxu2 %vm1005_vm1, %v5414_v61  ;;  %v6595_v60 = vpop.f32.mrf.mxu1  ;;  %v2079_v29 = vadd.f32 %v7499_v18, %v1936_v57 }
 0x405   : > { %4338 = vmatmul.msk.f32.gmra.mxu3 %vm1005_vm1, %v5414_v61  ;;  %v2220_v61 = vadd.f32 %v6263_v43, %v2077_v24  ;;  %3147 = vmatpush.msrb.mxu1 %v4351_v42  ;;  %v7521_v42 = vld [vmem:[#allocation60_spill] sm:$0xff] }
 0x406   : > { %v2222_v33 = vadd.f32 %v7501_v52, %v2079_v29  ;;  %v4345_v29 = vld [vmem:[%s7343_s6 + $0x690] sm:$0xff] }
 0x407   : > { %v2583_v30 = vpop.f32.mrf.mxu2  ;;  %v6591_v51 = vpop.f32.mrf.mxu3  ;;  %v2363_v6 = vadd.f32 %v6377_v10, %v2220_v61  ;;  %3148 = vmatpush.msrb.mxu1 %v4349_v39 }
 0x408   : > { %v6597_v7 = vadd.f32 %v2583_v30, %v2504_v35  ;;  %v2365_v37 = vadd.f32 %v7505_v55, %v2222_v33  ;;  %v7508_v35 = vld [vmem:[#allocation47_spill] sm:$0xff]  ;;  %v7517_v33 = vld [vmem:[#allocation132_spill] sm:$0xff] }
 0x409   : > { %v2506_v43 = vadd.f32 %v7497_v3, %v2363_v6  ;;  %v1368_v30 = vadd.f32 %v7508_v35, %v1182_v53  ;;  %v4350_v6 = vld [vmem:[%s7343_s6 + $0x6b8] sm:$0xff]  ;;  %v4532_v3 = vmov 0  }
 0x40a   : > { %v2508_v26 = vadd.f32 %v6466_v16, %v2365_v37  ;;  %v3238_v16 = vld [vmem:[%s7344_s7 + $0x28] sm:$0xff]  ;;  %3189 = vmatpush.msrb.mxu2 %v4350_v6  ;;  %4470 = vset.pattern.permute.xlu1 %v4532_v3  ;;  %v7519_v53 = vld [vmem:[#allocation49_spill] sm:$0xff]  ;;  %v7525_v6 = vld [vmem:[#allocation26_spill] sm:$0xff] }
 0x40b   : > { %v1511_v62 = vadd.f32 %v7510_v2, %v1368_v30  ;;  %3268 = vperm.xlu1 %4470, %v3238_v16   ;;  %4469 = vset.pattern.permute.xlu0 %v4532_v3  ;;  %v7526_v2 = vld [vmem:[#allocation37_spill] sm:$0xff]  ;;  %v7528_v16 = vld [vmem:[#allocation134_spill] sm:$0xff] }
 0x40c   : > { %4307 = vmatmul.msk.f32.gmra.mxu1 %vm1005_vm1, %v5286_v15  ;;  %4330 = vmatmul.msk.f32.gmra.mxu2 %vm1005_vm1, %v5428_v9  ;;  %v6639_v38 = vpop.f32.mrf.mxu1 }
 0x40d   : > { %4339 = vmatmul.msk.f32.gmra.mxu3 %vm1005_vm1, %v5428_v9  ;;  %v7498_v9 = vld [vmem:[#allocation56_spill] sm:$0xff]  ;;  %4471 = vset.pattern.permute.xlu2 %v4532_v3 }
 0x40e   : > { %v1509_v5 = vadd.f32 %v7498_v9, %v1366_v58  ;;  %v7511_v58 = vld [vmem:[#allocation102_spill] sm:$0xff]  ;;  %v1654_v9 = vadd.f32 %v7512_v54, %v1511_v62  ;;  %v1188_v62 = vadd.f32 %v7526_v2, %v7525_v6 }
 0x40f   : > { %v2586_v10 = vpop.f32.mrf.mxu2  ;;  %v6618_v15 = vpop.f32.mrf.mxu3  ;;  %v7541_v6 = vld [vmem:[#allocation126_spill] sm:$0xff] }
 0x410   : > { %v6625_v28 = vadd.f32 %v2586_v10, %v2506_v43  ;;  %v1652_v36 = vadd.f32 %v7500_v40, %v1509_v5  ;;  %v4347_v43 = vld [vmem:[%s7343_s6 + $0x6a0] sm:$0xff]  ;;  %v4348_v10 = vld [vmem:[%s7343_s6 + $0x6a8] sm:$0xff]  ;;  %v1185_v40 = vadd.f32 %v7515_v19, %v7514_v31 }
 0x411   : > { %v7513_v5 = vld [vmem:[#allocation119_spill] sm:$0xff]  ;;  %3149 = vmatpush.msrb.mxu1 %v4347_v43  ;;  %3190 = vmatpush.msrb.mxu2 %v4348_v10  ;;  %v7529_v43 = vld [vmem:[#allocation8_spill] sm:$0xff]  ;;  %v7532_v19 = vld [vmem:[#allocation62_spill] sm:$0xff] }
 0x412   : > { %v1795_v50 = vadd.f32 %v7504_v34, %v1652_v36  ;;  %v7516_v36 = vld [vmem:[#allocation83_spill] sm:$0xff]  ;;  %v1370_v34 = vadd.f32 %v7519_v53, %v1185_v40  ;;  %v7535_v53 = vld [vmem:[#allocation124_spill] sm:$0xff] }
 0x413   : > { %v1797_v52 = vadd.f32 %v7516_v36, %v1654_v9  ;;  %3150 = vmatpush.msrb.mxu1 %v4345_v29  ;;  %3191 = vmatpush.msrb.mxu2 %v4346_v13  ;;  %v7530_v10 = vld [vmem:[#allocation51_spill] sm:$0xff]  ;;  %v7531_v9 = vld [vmem:[#allocation97_spill] sm:$0xff] }
 0x414   : > { %4308 = vmatmul.msk.f32.gmra.mxu1 %vm1005_vm1, %v7506_v56  ;;  %4331 = vmatmul.msk.f32.gmra.mxu2 %vm1005_vm1, %v7507_v25  ;;  %v1938_v24 = vadd.f32 %v7509_v17, %v1795_v50  ;;  %v6696_v27 = vpop.f32.mrf.mxu1  ;;  %v7520_v50 = vld [vmem:[#allocation95_spill] sm:$0xff]  ;;  %v3240_v17 = vld [vmem:[%s7344_s7 + $0x38] sm:$0xff]  ;;  %v1372_v54 = vadd.f32 %v7530_v10, %v1188_v62 }
 0x415   : > { %4340 = vmatmul.msk.f32.gmra.mxu3 %vm1005_vm1, %v7507_v25  ;;  %v1940_v55 = vadd.f32 %v7520_v50, %v1797_v52  ;;  %3278 = vperm.xlu0 %4469, %v3240_v17   ;;  %v7536_v50 = vld [vmem:[#allocation87_spill] sm:$0xff] }
 0x416   : > { %v2081_v48 = vadd.f32 %v7511_v58, %v1938_v24  ;;  %v3237_v24 = vld [vmem:[%s7344_s7 + $0x20] sm:$0xff]  ;;  %v7527_v58 = vld [vmem:[#allocation85_spill] sm:$0xff]  ;;  %v1515_v40 = vadd.f32 %v7532_v19, %v1372_v54 }
 0x417   : > { %v2589_v61 = vpop.f32.mrf.mxu2  ;;  %v6663_v63 = vpop.f32.mrf.mxu3  ;;  %v2083_v35 = vadd.f32 %v7522_v46, %v1940_v55  ;;  %3263 = vperm.xlu1 %4470, %v3237_v24  }
 0x418   : > { %v6673_v57 = vadd.f32 %v2589_v61, %v2508_v26  ;;  %v2224_v18 = vadd.f32 %v7513_v5, %v2081_v48  ;;  %v7524_v61 = vld [vmem:[#allocation122_spill] sm:$0xff] }
 0x419   : > { %v2226_v39 = vadd.f32 %v7524_v61, %v2083_v35 }
 0x41a   : > { %v2367_v49 = vadd.f32 %v7517_v33, %v2224_v18  ;;  %v3239_v33 = vld [vmem:[%s7344_s7 + $0x30] sm:$0xff] }
 0x41b   : > { %v2369_v3 = vadd.f32 %v7528_v16, %v2226_v39 }
 0x41c   : > { %4309 = vmatmul.msk.f32.gmra.mxu1 %vm1005_vm1, %v5316_v23  ;;  %4332 = vmatmul.msk.f32.gmra.mxu2 %vm1005_vm1, %v7518_v41  ;;  %v2510_v37 = vadd.f32 %v6503_v59, %v2367_v49  ;;  %v1513_v23 = vadd.f32 %v7521_v42, %v1370_v34  ;;  %v7523_v59 = vld [vmem:[#allocation70_spill] sm:$0xff]  ;;  %v6734_v29 = vpop.f32.mrf.mxu1  ;;  %v7538_v42 = vld [vmem:[#allocation9_spill] sm:$0xff] }
 0x41d   : > { %4341 = vmatmul.msk.f32.gmra.mxu3 %vm1005_vm1, %v7518_v41  ;;  %v2512_v18 = vadd.f32 %v6515_v44, %v2369_v3  ;;  %v3233_v49 = vld [vmem:[%s7344_s7] sm:$0xff]  ;;  %v7534_v44 = vld [vmem:[#allocation72_spill] sm:$0xff]  ;;  %3273 = vperm.xlu0 %4469, %v3239_v33   ;;  %v7546_v33 = vld [vmem:[#allocation39_spill] sm:$0xff] }
 0x41e   : > { %v1656_v26 = vadd.f32 %v7523_v59, %v1513_v23  ;;  %v1658_v41 = vadd.f32 %v7534_v44, %v1515_v40  ;;  %v7539_v23 = vld [vmem:[#allocation100_spill] sm:$0xff]  ;;  %v7540_v59 = vld [vmem:[#allocation110_spill] sm:$0xff] }
 0x41f   : > { %v2592_v56 = vpop.f32.mrf.mxu2  ;;  %v6707_v25 = vpop.f32.mrf.mxu3  ;;  %3243 = vperm.xlu1 %4470, %v3233_v49   ;;  %v7547_v44 = vld [vmem:[#allocation48_spill] sm:$0xff] }
 0x420   : > { %v6711_v30 = vadd.f32 %v2592_v56, %v2510_v37  ;;  %v1799_v48 = vadd.f32 %v7527_v58, %v1656_v26  ;;  %v1801_v55 = vadd.f32 %v7536_v50, %v1658_v41  ;;  %v7537_v37 = vld [vmem:[#allocation137_spill] sm:$0xff] }
 0x422   : > { %v1942_v5 = vadd.f32 %v7531_v9, %v1799_v48  ;;  %v1944_v46 = vadd.f32 %v7539_v23, %v1801_v55 }
 0x424   : > { %4310 = vmatmul.msk.f32.gmra.mxu1 %vm1005_vm1, %v5325_v4  ;;  %4333 = vmatmul.msk.f32.gmra.mxu2 %vm1005_vm1, %v7529_v43  ;;  %v7533_v4 = vld [vmem:[#allocation108_spill] sm:$0xff]  ;;  %v2087_v26 = vadd.f32 %v7540_v59, %v1944_v46  ;;  %v6765_v39 = vpop.f32.mrf.mxu1 }
 0x425   : > { %4342 = vmatmul.msk.f32.gmra.mxu3 %vm1005_vm1, %v7529_v43  ;;  %v2085_v36 = vadd.f32 %v7533_v4, %v1942_v5  ;;  %v3236_v4 = vld [vmem:[%s7344_s7 + $0x18] sm:$0xff] }
 0x426   : > { %v2230_v2 = vadd.f32 %v7541_v6, %v2087_v26  ;;  %3258 = vperm.xlu2 %4471, %v3236_v4   ;;  %v7553_v26 = vld [vmem:[#allocation84_spill] sm:$0xff] }
 0x427   : > { %v2595_v13 = vpop.f32.mrf.mxu2  ;;  %v6736_v31 = vpop.f32.mrf.mxu3  ;;  %v2228_v34 = vadd.f32 %v7535_v53, %v2085_v36  ;;  %v7545_v36 = vld [vmem:[#allocation27_spill] sm:$0xff]  ;;  %v7548_v53 = vld [vmem:[#allocation14_spill] sm:$0xff] }
 0x428   : > { %v6740_v52 = vadd.f32 %v2595_v13, %v2512_v18  ;;  %v2373_v62 = vadd.f32 %v6505_v47, %v2230_v2  ;;  %v7543_v47 = vld [vmem:[#allocation12_spill] sm:$0xff]  ;;  %v7544_v18 = vld [vmem:[#allocation13_spill] sm:$0xff]  ;;  %v1220_v49 = vadd.f32 %v7546_v33, %v7545_v36  ;;  %v7554_v2 = vld [vmem:[#allocation50_spill] sm:$0xff] }
 0x429   : > { %v2371_v56 = vadd.f32 %v7537_v37, %v2228_v34  ;;  %v7549_v34 = vld [vmem:[#allocation61_spill] sm:$0xff]  ;;  %v7550_v37 = vld [vmem:[#allocation75_spill] sm:$0xff]  ;;  %v7561_v33 = vld [vmem:[#allocation30_spill] sm:$0xff] }
 0x42a   : > { %v2516_v58 = vadd.f32 %v6549_v14, %v2373_v62  ;;  %v1367_v41 = vadd.f32 %v7547_v44, %v1220_v49  ;;  %v7562_v49 = vld [vmem:[#allocation43_spill] sm:$0xff]  ;;  %v7563_v44 = vld [vmem:[#allocation86_spill] sm:$0xff] }
 0x42b   : > { %v2514_v35 = vadd.f32 %v6530_v0, %v2371_v56  ;;  %v7542_v0 = vld [vmem:[#allocation11_spill] sm:$0xff] }
 0x42c   : > { %4311 = vmatmul.msk.f32.gmra.mxu1 %vm1005_vm1, %v5337_v32  ;;  %4334 = vmatmul.msk.f32.gmra.mxu2 %vm1005_vm1, %v7538_v42  ;;  %v3234_v32 = vld [vmem:[%s7344_s7 + $0x8] sm:$0xff]  ;;  %v1510_v50 = vadd.f32 %v7549_v34, %v1367_v41 }
 0x42d   : > { %4343 = vmatmul.msk.f32.gmra.mxu3 %vm1005_vm1, %v7538_v42  ;;  %3248 = vperm.xlu0 %4469, %v3234_v32  }
 0x42e   : > { %v1653_v56 = vadd.f32 %v7550_v37, %v1510_v50  ;;  %v7564_v50 = vld [vmem:[#allocation52_spill] sm:$0xff] }
 0x42f   : > { %v2598_v17 = vpop.f32.mrf.mxu2  ;;  %v6760_v24 = vpop.f32.mrf.mxu3 }
 0x430   : > { %v6763_v61 = vadd.f32 %v2598_v17, %v2514_v35  ;;  %v7551_v35 = vld [vmem:[#allocation28_spill] sm:$0xff]  ;;  %v7552_v17 = vld [vmem:[#allocation41_spill] sm:$0xff]  ;;  %v1796_v32 = vadd.f32 %v7553_v26, %v1653_v56 }
 0x431   : > { %v1223_v59 = vadd.f32 %v7552_v17, %v7551_v35  ;;  %v7565_v56 = vld [vmem:[#allocation101_spill] sm:$0xff]  ;;  %v7567_v35 = vld [vmem:[#allocation66_spill] sm:$0xff] }
 0x433   : > { %v1369_v62 = vadd.f32 %v7554_v2, %v1223_v59  ;;  %v7568_v59 = vld [vmem:[#allocation115_spill] sm:$0xff]  ;;  %v7570_v2 = vld [vmem:[#allocation125_spill] sm:$0xff] }
 0x434   : > { %4312 = vmatmul.msk.f32.gmra.mxu1 %vm1005_vm1, %v5374_v11  ;;  %4335 = vmatmul.msk.f32.gmra.mxu2 %vm1005_vm1, %v7542_v0 }
 0x435   : > { %4344 = vmatmul.msk.f32.gmra.mxu3 %vm1005_vm1, %v7542_v0  ;;  %v7555_v0 = vld [vmem:[#allocation98_spill] sm:$0xff] }
 0x437   : > { %v2601_v48 = vpop.f32.mrf.mxu2  ;;  %v6779_v16 = vpop.f32.mrf.mxu3 }
 0x438   : > { %v6781_v3 = vadd.f32 %v2601_v48, %v2516_v58  ;;  %v1939_v58 = vadd.f32 %v7555_v0, %v1796_v32  ;;  %v7556_v48 = vld [vmem:[#allocation15_spill] sm:$0xff] }
 0x439   : > { %v2723_v43 = vpop.f32.mrf.mxu1 }
 0x43a   : > { %v2788_v10 = vadd.f32 %v2723_v43, %v6574_v22  ;;  %v7557_v43 = vld [vmem:[#allocation63_spill] sm:$0xff] }
 0x43c   : > { %4360 = vmatmul.msk.f32.vlgmr.msrb.gmra.mxu1 %vm1005_vm1, %v7543_v47  ;;  %4369 = vmatmul.msk.f32.vlgmr.msrb.gmra.mxu2 %vm1005_vm1, %v7543_v47  ;;  %v7558_v47 = vld [vmem:[#allocation113_spill] sm:$0xff] }
 0x43f   : > { %v6788_v11 = vpop.f32.mrf.mxu2 }
 0x440   : > { %v2866_v54 = vpop.f32.mrf.mxu3 }
 0x441   : > { %v6790_v9 = vadd.f32 %v2866_v54, %v2788_v10  ;;  %v2726_v14 = vpop.f32.mrf.mxu1  ;;  %v1512_v10 = vadd.f32 %v7557_v43, %v1369_v62  ;;  %v2082_v54 = vadd.f32 %v7558_v47, %v1939_v58  ;;  %v7571_v58 = vld [vmem:[#allocation19_spill] sm:$0xff] }
 0x442   : > { %v2790_v5 = vadd.f32 %v2726_v14, %v6597_v7 }
 0x444   : > { %4361 = vmatmul.msk.f32.gmra.mxu1 %vm1005_vm1, %v7544_v18  ;;  %4370 = vmatmul.msk.f32.gmra.mxu2 %vm1005_vm1, %v7544_v18 }
 0x447   : > { %v6797_v22 = vpop.f32.mrf.mxu2 }
 0x448   : > { %v2869_v13 = vpop.f32.mrf.mxu3 }
 0x449   : > { %v6799_v19 = vadd.f32 %v2869_v13, %v2790_v5  ;;  %v2729_v40 = vpop.f32.mrf.mxu1  ;;  %v7559_v5 = vld [vmem:[#allocation77_spill] sm:$0xff] }
 0x44a   : > { %v2792_v7 = vadd.f32 %v2729_v40, %v6625_v28  ;;  %v3235_v28 = vld [vmem:[%s7344_s7 + $0x10] sm:$0xff]  ;;  %v1655_v18 = vadd.f32 %v7559_v5, %v1512_v10  ;;  %v7574_v5 = vld [vmem:[#allocation46_spill] sm:$0xff] }
 0x44b   : > { %3253 = vperm.xlu2 %4471, %v3235_v28   ;;  %v7566_v28 = vld [vmem:[#allocation16_spill] sm:$0xff] }
 0x44c   : > { %4362 = vmatmul.msk.f32.gmra.mxu1 %vm1005_vm1, %v7548_v53  ;;  %4371 = vmatmul.msk.f32.gmra.mxu2 %vm1005_vm1, %v7548_v53  ;;  %v1798_v41 = vadd.f32 %v7563_v44, %v1655_v18 }
 0x44f   : > { %v6813_v55 = vpop.f32.mrf.mxu2 }
 0x450   : > { %v2872_v42 = vpop.f32.mrf.mxu3 }
 0x451   : > { %v6816_v23 = vadd.f32 %v2872_v42, %v2792_v7  ;;  %v2732_v46 = vpop.f32.mrf.mxu1  ;;  %v1226_v7 = vadd.f32 %v7562_v49, %v7561_v33  ;;  %v1941_v42 = vadd.f32 %v7565_v56, %v1798_v41  ;;  %v7577_v33 = vld [vmem:[#allocation38_spill] sm:$0xff]  ;;  %v7579_v41 = vld [vmem:[#allocation104_spill] sm:$0xff] }
 0x452   : > { %v2794_v6 = vadd.f32 %v2732_v46, %v6673_v57  ;;  %v7560_v57 = vld [vmem:[#allocation123_spill] sm:$0xff] }
 0x453   : > { %v2225_v13 = vadd.f32 %v7560_v57, %v2082_v54  ;;  %v1371_v37 = vadd.f32 %v7564_v50, %v1226_v7  ;;  %v2084_v26 = vadd.f32 %v7568_v59, %v1941_v42  ;;  %v7573_v54 = vld [vmem:[#allocation33_spill] sm:$0xff]  ;;  %v7575_v57 = vld [vmem:[#allocation88_spill] sm:$0xff]  ;;  %v7578_v7 = vld [vmem:[#allocation54_spill] sm:$0xff] }
 0x454   : > { %4363 = vmatmul.msk.f32.gmra.mxu1 %vm1005_vm1, %v7556_v48  ;;  %4372 = vmatmul.msk.f32.gmra.mxu2 %vm1005_vm1, %v7556_v48  ;;  %v7572_v48 = vld [vmem:[#allocation29_spill] sm:$0xff]  ;;  %v1229_v18 = vadd.f32 %v7574_v5, %v7573_v54  ;;  %v7590_v5 = vld [vmem:[#allocation90_spill] sm:$0xff] }
 0x455   : > { %v2368_v53 = vadd.f32 %v6480_v12, %v2225_v13  ;;  %v1514_v17 = vadd.f32 %v7567_v35, %v1371_v37  ;;  %v2227_v62 = vadd.f32 %v7570_v2, %v2084_v26  ;;  %v1208_v43 = vadd.f32 %v7572_v48, %v7571_v58  ;;  %v7581_v37 = vld [vmem:[#allocation53_spill] sm:$0xff] }
 0x456   : > { %v1373_v44 = vadd.f32 %v7578_v7, %v1229_v18  ;;  %v7582_v42 = vld [vmem:[#allocation69_spill] sm:$0xff] }
 0x457   : > { %v6833_v14 = vpop.f32.mrf.mxu2  ;;  %v2511_v46 = vadd.f32 %v6639_v38, %v2368_v53  ;;  %v1359_v49 = vadd.f32 %v7577_v33, %v1208_v43  ;;  %v7584_v59 = vld [vmem:[#allocation65_spill] sm:$0xff] }
 0x458   : > { %v2875_v40 = vpop.f32.mrf.mxu3 }
 0x459   : > { %v6837_v4 = vadd.f32 %v2875_v40, %v2794_v6  ;;  %v2735_v36 = vpop.f32.mrf.mxu1  ;;  %v2654_v12 = vadd.f32 %v6707_v25, %v2511_v46  ;;  %v7576_v25 = vld [vmem:[#allocation138_spill] sm:$0xff]  ;;  %v1502_v56 = vadd.f32 %v7581_v37, %v1359_v49  ;;  %v1516_v46 = vadd.f32 %v7582_v42, %v1373_v44  ;;  %v7593_v49 = vld [vmem:[#allocation107_spill] sm:$0xff]  ;;  %v7598_v42 = vld [vmem:[#allocation68_spill] sm:$0xff] }
 0x45a   : > { %v2796_v34 = vadd.f32 %v2735_v36, %v6711_v30  ;;  %v7569_v30 = vld [vmem:[#allocation79_spill] sm:$0xff]  ;;  %v2370_v40 = vadd.f32 %v7576_v25, %v2227_v62  ;;  %v7587_v62 = vld [vmem:[#allocation21_spill] sm:$0xff] }
 0x45b   : > { %v1657_v6 = vadd.f32 %v7569_v30, %v1514_v17  ;;  %v1645_v26 = vadd.f32 %v7584_v59, %v1502_v56 }
 0x45c   : > { %4364 = vmatmul.msk.f32.gmra.mxu1 %vm1005_vm1, %v7566_v28  ;;  %4373 = vmatmul.msk.f32.gmra.mxu2 %vm1005_vm1, %v7566_v28  ;;  %v2513_v50 = vadd.f32 %v6696_v27, %v2370_v40  ;;  %v7583_v28 = vld [vmem:[#allocation118_spill] sm:$0xff]  ;;  %v7586_v27 = vld [vmem:[#allocation127_spill] sm:$0xff]  ;;  %v7592_v40 = vld [vmem:[#allocation89_spill] sm:$0xff] }
 0x45d   : > { %v1800_v13 = vadd.f32 %v7575_v57, %v1657_v6 }
 0x45e   : > { %v2656_v35 = vadd.f32 %v6736_v31, %v2513_v50 }
 0x45f   : > { %v2776_v32 = vpop.f32.mrf.mxu2  ;;  %v1943_v53 = vadd.f32 %v7579_v41, %v1800_v13  ;;  %v7591_v13 = vld [vmem:[#allocation40_spill] sm:$0xff]  ;;  %v7595_v41 = vld [vmem:[#allocation55_spill] sm:$0xff] }
 0x460   : > { %v6856_v0 = vadd.f32 %v2776_v32, %v2654_v12  ;;  %v2878_v38 = vpop.f32.mrf.mxu3  ;;  %v7585_v12 = vld [vmem:[#allocation82_spill] sm:$0xff] }
 0x461   : > { %v6860_v10 = vadd.f32 %v2878_v38, %v2796_v34  ;;  %v2738_v47 = vpop.f32.mrf.mxu1  ;;  %v7580_v34 = vld [vmem:[#allocation17_spill] sm:$0xff]  ;;  %v1659_v32 = vadd.f32 %v7585_v12, %v1516_v46  ;;  %v7588_v38 = vld [vmem:[#allocation31_spill] sm:$0xff]  ;;  %v7602_v12 = vld [vmem:[#allocation34_spill] sm:$0xff] }
 0x462   : > { %v2798_v36 = vadd.f32 %v2738_v47, %v6740_v52  ;;  %v2086_v52 = vadd.f32 %v7583_v28, %v1943_v53  ;;  %v1211_v58 = vadd.f32 %v7588_v38, %v7587_v62  ;;  %v7589_v47 = vld [vmem:[#allocation74_spill] sm:$0xff]  ;;  %v7599_v28 = vld [vmem:[#allocation112_spill] sm:$0xff] }
 0x463   : > { %v1788_v54 = vadd.f32 %v7589_v47, %v1645_v26  ;;  %v1802_v31 = vadd.f32 %v7590_v5, %v1659_v32  ;;  %v7601_v26 = vld [vmem:[#allocation23_spill] sm:$0xff]  ;;  %v7604_v62 = vld [vmem:[#allocation128_spill] sm:$0xff] }
 0x464   : > { %4365 = vmatmul.msk.f32.gmra.mxu1 %vm1005_vm1, %v7580_v34  ;;  %4374 = vmatmul.msk.f32.gmra.mxu2 %vm1005_vm1, %v7580_v34  ;;  %v2229_v30 = vadd.f32 %v7586_v27, %v2086_v52  ;;  %v1361_v25 = vadd.f32 %v7591_v13, %v1211_v58  ;;  %v1214_v32 = vadd.f32 %v7602_v12, %v7601_v26  ;;  %v7618_v26 = vld [vmem:[#allocation94_spill] sm:$0xff] }
 0x465   : > { %v1931_v33 = vadd.f32 %v7592_v40, %v1788_v54  ;;  %v1945_v7 = vadd.f32 %v7593_v49, %v1802_v31  ;;  %v7606_v54 = vld [vmem:[#allocation92_spill] sm:$0xff]  ;;  %v7607_v31 = vld [vmem:[#allocation139_spill] sm:$0xff]  ;;  %v7609_v40 = vld [vmem:[#allocation57_spill] sm:$0xff] }
 0x466   : > { %v2372_v18 = vadd.f32 %v6525_v8, %v2229_v30  ;;  %v1504_v53 = vadd.f32 %v7595_v41, %v1361_v25  ;;  %v7596_v8 = vld [vmem:[#allocation103_spill] sm:$0xff]  ;;  %v7603_v30 = vld [vmem:[#allocation76_spill] sm:$0xff] }
 0x467   : > { %v2779_v17 = vpop.f32.mrf.mxu2  ;;  %v2074_v50 = vadd.f32 %v7596_v8, %v1931_v33  ;;  %v7608_v25 = vld [vmem:[#allocation20_spill] sm:$0xff] }
 0x468   : > { %v6882_v6 = vadd.f32 %v2779_v17, %v2656_v35  ;;  %v2881_v2 = vpop.f32.mrf.mxu3  ;;  %v2515_v44 = vadd.f32 %v6734_v29, %v2372_v18  ;;  %v1647_v46 = vadd.f32 %v7598_v42, %v1504_v53  ;;  %v7600_v29 = vld [vmem:[#allocation129_spill] sm:$0xff]  ;;  %v7612_v53 = vld [vmem:[#allocation114_spill] sm:$0xff] }
 0x469   : > { %v6886_v48 = vadd.f32 %v2881_v2, %v2798_v36  ;;  %v2741_v43 = vpop.f32.mrf.mxu1  ;;  %v7594_v36 = vld [vmem:[#allocation18_spill] sm:$0xff]  ;;  %v2217_v52 = vadd.f32 %v7599_v28, %v2074_v50 }
 0x46a   : > { %v6892_v57 = vadd.f32 %v2741_v43, %v6763_v61  ;;  %v7597_v61 = vld [vmem:[#allocation121_spill] sm:$0xff]  ;;  %v2658_v37 = vadd.f32 %v6760_v24, %v2515_v44  ;;  %v1790_v2 = vadd.f32 %v7603_v30, %v1647_v46  ;;  %v7605_v43 = vld [vmem:[#allocation42_spill] sm:$0xff] }
 0x46b   : > { %v2088_v34 = vadd.f32 %v7597_v61, %v1945_v7  ;;  %v2360_v38 = vadd.f32 %v7604_v62, %v2217_v52  ;;  %v1363_v47 = vadd.f32 %v7605_v43, %v1214_v32  ;;  %v7615_v46 = vld [vmem:[#allocation78_spill] sm:$0xff]  ;;  %v7616_v52 = vld [vmem:[#allocation131_spill] sm:$0xff]  ;;  %v7620_v30 = vld [vmem:[#allocation109_spill] sm:$0xff] }
 0x46c   : > { %4366 = vmatmul.msk.f32.gmra.mxu1 %vm1005_vm1, %v7594_v36  ;;  %4375 = vmatmul.msk.f32.gmra.mxu2 %vm1005_vm1, %v7594_v36  ;;  %v1933_v5 = vadd.f32 %v7606_v54, %v1790_v2  ;;  %v7611_v36 = vld [vmem:[#allocation71_spill] sm:$0xff] }
 0x46d   : > { %v2231_v35 = vadd.f32 %v7600_v29, %v2088_v34  ;;  %v2503_v18 = vadd.f32 %v7607_v31, %v2360_v38  ;;  %v1506_v33 = vadd.f32 %v7609_v40, %v1363_v47  ;;  %v7622_v47 = vld [vmem:[#allocation117_spill] sm:$0xff] }
 0x46e   : > { %v7623_v40 = vld [vmem:[#allocation81_spill] sm:$0xff] }
 0x46f   : > { %v2782_v56 = vpop.f32.mrf.mxu2  ;;  %v2374_v24 = vadd.f32 %v6547_v1, %v2231_v35  ;;  %v7610_v1 = vld [vmem:[#allocation106_spill] sm:$0xff]  ;;  %v1649_v41 = vadd.f32 %v7611_v36, %v1506_v33  ;;  %v7624_v33 = vld [vmem:[#allocation133_spill] sm:$0xff] }
 0x470   : > { %v6909_v17 = vadd.f32 %v2782_v56, %v2658_v37  ;;  %v6911_v59 = vpop.f32.mrf.mxu3  ;;  %v2076_v49 = vadd.f32 %v7610_v1, %v1933_v5  ;;  %v7613_v37 = vld [vmem:[#allocation25_spill] sm:$0xff]  ;;  %v7614_v56 = vld [vmem:[#allocation36_spill] sm:$0xff] }
 0x471   : > { %v2744_v27 = vpop.f32.mrf.mxu1  ;;  %v2517_v13 = vadd.f32 %v6765_v39, %v2374_v24  ;;  %v1217_v42 = vadd.f32 %v7614_v56, %v7613_v37  ;;  %v1792_v28 = vadd.f32 %v7615_v46, %v1649_v41  ;;  %v7621_v24 = vld [vmem:[#allocation73_spill] sm:$0xff]  ;;  %v7628_v37 = vld [vmem:[#allocation135_spill] sm:$0xff] }
 0x472   : > { %v6919_v58 = vadd.f32 %v2744_v27, %v6781_v3  ;;  %v2646_v3 = vadd.f32 %v6570_v45, %v2503_v18  ;;  %v2219_v8 = vadd.f32 %v7612_v53, %v2076_v49  ;;  %v7619_v27 = vld [vmem:[#allocation59_spill] sm:$0xff]  ;;  %v7627_v53 = vld [vmem:[#allocation120_spill] sm:$0xff] }
 0x473   : > { %v2660_v7 = vadd.f32 %v6779_v16, %v2517_v13  ;;  %v7617_v16 = vld [vmem:[#allocation45_spill] sm:$0xff]  ;;  %v1935_v12 = vadd.f32 %v7618_v26, %v1792_v28 }
 0x474   : > { %4367 = vmatmul.msk.f32.gmra.mxu1 %vm1005_vm1, %v7608_v25  ;;  %4376 = vmatmul.msk.f32.gmra.mxu2 %vm1005_vm1, %v7608_v25  ;;  %v2789_v39 = vadd.f32 %v6788_v11, %v2646_v3  ;;  %v2362_v45 = vadd.f32 %v7616_v52, %v2219_v8  ;;  %v1365_v35 = vadd.f32 %v7617_v16, %v1217_v42  ;;  %v7625_v3 = vld [vmem:[#allocation96_spill] sm:$0xff] }
 0x475   : > { %v2078_v2 = vadd.f32 %v7620_v30, %v1935_v12 }
 0x476   : > { %v2505_v32 = vadd.f32 %v6537_v20, %v2362_v45  ;;  %v1508_v11 = vadd.f32 %v7619_v27, %v1365_v35 }
 0x477   : > { %v2785_v44 = vpop.f32.mrf.mxu2  ;;  %v2221_v54 = vadd.f32 %v7622_v47, %v2078_v2 }
 0x478   : > { %v2803_v50 = vadd.f32 %v2785_v44, %v2660_v7  ;;  %v6936_v61 = vpop.f32.mrf.mxu3  ;;  %v2648_v62 = vadd.f32 %v6591_v51, %v2505_v32  ;;  %v1651_v43 = vadd.f32 %v7621_v24, %v1508_v11  ;;  %v7626_v44 = vld [vmem:[#allocation111_spill] sm:$0xff] }
 0x479   : > { %v2907_v34 = vpop.f32.mrf.mxu1  ;;  %v2364_v1 = vadd.f32 %v7624_v33, %v2221_v54 }
 0x47a   : > { %v2932_v29 = vadd.f32 %v2907_v34, %v2789_v39  ;;  %v2791_v5 = vadd.f32 %v6797_v22, %v2648_v62  ;;  %v1794_v20 = vadd.f32 %v7623_v40, %v1651_v43 }
 0x47b   : > { %v2507_v7 = vadd.f32 %v6568_v21, %v2364_v1 }
 0x47c   : > { %v1937_v51 = vadd.f32 %v7625_v3, %v1794_v20 }
 0x47d   : > { %v2650_v41 = vadd.f32 %v6618_v15, %v2507_v7  ;;  %v3269_v1 = vpop.permute.xlu1 %3268  ;;  %v2945_v7 = vadd.f32 %v6936_v61, %v6919_v58 }
 0x47e   : > { %v2080_v36 = vadd.f32 %v7626_v44, %v1937_v51  ;;  %v2943_v51 = vadd.f32 %v6911_v59, %v6892_v57 }
 0x47f   : > { %v3009_v38 = vpop.f32.mrf.mxu2  ;;  %v2793_v8 = vadd.f32 %v6813_v55, %v2650_v41 }
 0x480   : > { %v3074_v31 = vadd.f32 %v3009_v38, %v6790_v9  ;;  %v3050_v18 = vpop.f32.mrf.mxu3  ;;  %v2223_v9 = vadd.f32 %v7627_v53, %v2080_v36  ;;  %v7006_v41 = vpop.permute.xlu2 %3258 }
 0x481   : > { %v3075_v13 = vadd.f32 %v3050_v18, %v2932_v29  ;;  %v2910_v25 = vpop.f32.mrf.mxu1 }
 0x482   : > { %v6954_v49 = vadd.f32 %v2910_v25, %v2791_v5  ;;  %v2366_v56 = vadd.f32 %v7628_v37, %v2223_v9 }
 0x484   : > { %v2509_v46 = vadd.f32 %v6595_v60, %v2366_v56 }
 0x486   : > { %v2652_v21 = vadd.f32 %v6663_v63, %v2509_v46 }
 0x487   : > { %v3012_v22 = vpop.f32.mrf.mxu2 }
 0x488   : > { %v6963_v39 = vadd.f32 %v3012_v22, %v6799_v19  ;;  %v2795_v15 = vadd.f32 %v6833_v14, %v2652_v21  ;;  %v6988_v38 = vpop.f32.mrf.mxu3 }
 0x489   : > { %v2913_v34 = vpop.f32.mrf.mxu1  ;;  %v3264_v46 = vpop.permute.xlu1 %3263 }
 0x48a   : > { %v6966_v42 = vadd.f32 %v2913_v34, %v2793_v8 }
 0x48f   : > { %v3015_v28 = vpop.f32.mrf.mxu2 }
 0x490   : > { %v3078_v52 = vadd.f32 %v3015_v28, %v6816_v23  ;;  %v6992_v43 = vpop.f32.mrf.mxu3 }
 0x491   : > { %v2916_v45 = vpop.f32.mrf.mxu1 }
 0x492   : > { %v6972_v29 = vadd.f32 %v2916_v45, %v2795_v15 }
 0x497   : > { %v3018_v55 = vpop.f32.mrf.mxu2 }
 0x498   : > { %v3080_v19 = vadd.f32 %v3018_v55, %v6837_v4  ;;  %v6998_v54 = vpop.f32.mrf.mxu3 }
 0x499   : > { %v2919_v16 = vpop.f32.mrf.mxu1 }
 0x49a   : > { %v6976_v35 = vadd.f32 %v2919_v16, %v6856_v0 }
 0x49f   : > { %v3021_v26 = vpop.f32.mrf.mxu2 }
 0x4a0   : > { %v3082_v60 = vadd.f32 %v3021_v26, %v6860_v10  ;;  %v3062_v18 = vpop.f32.mrf.mxu3 }
 0x4a1   : > { %v2922_v12 = vpop.f32.mrf.mxu1 }
 0x4a2   : > { %v6980_v63 = vadd.f32 %v2922_v12, %v6882_v6 }
 0x4a5   : > { %v3254_v26 = vpop.permute.xlu2 %3253 }
 0x4a7   : > { %v3024_v14 = vpop.f32.mrf.mxu2 }
 0x4a8   : > { %v3084_v23 = vadd.f32 %v3024_v14, %v6886_v48  ;;  %v3065_v20 = vpop.f32.mrf.mxu3 }
 0x4a9   : > { %v2925_v32 = vpop.f32.mrf.mxu1 }
 0x4aa   : > { %v6984_v27 = vadd.f32 %v2925_v32, %v6909_v17 }
 0x4af   : > { %v3027_v11 = vpop.f32.mrf.mxu2 }
 0x4b0   : > { %v3086_v44 = vadd.f32 %v3027_v11, %v2943_v51  ;;  %v3068_v36 = vpop.f32.mrf.mxu3 }
 0x4b1   : > { %v2928_v4 = vpop.f32.mrf.mxu1 }
 0x4b2   : > { %v2946_v30 = vadd.f32 %v2928_v4, %v2803_v50 }
 0x4b7   : > { %v3030_v2 = vpop.f32.mrf.mxu2 }
 0x4b8   : > { %v3088_v22 = vadd.f32 %v3030_v2, %v2945_v7  ;;  %v3071_v16 = vpop.f32.mrf.mxu3 }
 0x4b9   : > { %v3152_v0 = vpop.f32.mrf.mxu1 }
 0x4ba   : > { %v6986_v62 = vadd.f32 %v3152_v0, %v3074_v31 }
 0x4bf   : > { %v3193_v10 = vpop.f32.mrf.mxu2 }
 0x4c0   : > { %v6990_v24 = vadd.f32 %v3193_v10, %v3075_v13  ;;  %v3279_v13 = vpop.permute.xlu0 %3278 }
 0x4c1   : > { %v3155_v6 = vpop.f32.mrf.mxu1 }
 0x4c2   : > { %v3219_v12 = vadd.f32 %v3155_v6, %v6963_v39 }
 0x4c7   : > { %v6994_v48 = vpop.f32.mrf.mxu2 }
 0x4c8   : > { %v3274_v53 = vpop.permute.xlu0 %3273 }
 0x4c9   : > { %v3158_v47 = vpop.f32.mrf.mxu1 }
 0x4ca   : > { %v3221_v55 = vadd.f32 %v3158_v47, %v3078_v52  ;;  %v3087_v52 = vadd.f32 %v3068_v36, %v6984_v27  ;;  %v3081_v27 = vadd.f32 %v6998_v54, %v6972_v29  ;;  %v3077_v29 = vadd.f32 %v6988_v38, %v6954_v49 }
 0x4cc   : > { %v3285_v4 = vadd.f32 %v3254_v26, %v3221_v55 }
 0x4ce   : > { %v3301_v6 = vmax.f32 %v3285_v4, 0.0  ;;  %v3368_v4 = vld [vmem:[%s7339_s2] ss:$2 sm:$0x3] }
 0x4cf   : > { %v6996_v17 = vpop.f32.mrf.mxu2 }
 0x4d1   : > { %v3161_v50 = vpop.f32.mrf.mxu1 }
 0x4d2   : > { %v3223_v45 = vadd.f32 %v3161_v50, %v3080_v19  ;;  %v3244_v19 = vpop.permute.xlu1 %3243  ;;  %v3085_v50 = vadd.f32 %v3065_v20, %v6980_v63  ;;  %v3313_v63 = vld [vmem:[%s7345_s8] sm:$0xff] }
 0x4d3   : > { %v3281_v39 = vadd.f32 %v3244_v19, %v6986_v62  ;;  %v3079_v62 = vadd.f32 %v6992_v43, %v6966_v42  ;;  %v3282_v38 = vadd.f32 %v3244_v19, %v6990_v24  ;;  %v3388_v19 = vperm.slane %v3368_v4, 0 }
 0x4d4   : > { %v3287_v14 = vadd.f32 %v7006_v41, %v3223_v45 }
 0x4d5   : > { %v3297_v7 = vmax.f32 %v3281_v39, 0.0  ;;  %v3222_v54 = vadd.f32 %v6996_v17, %v3079_v62 }
 0x4d6   : > { %v3303_v10 = vmax.f32 %v3287_v14, 0.0 }
 0x4d7   : > { %v7000_v5 = vpop.f32.mrf.mxu2  ;;  %v3286_v43 = vadd.f32 %v3254_v26, %v3222_v54 }
 0x4d9   : > { %v3164_v31 = vpop.f32.mrf.mxu1  ;;  %v3302_v17 = vmax.f32 %v3286_v43, 0.0 }
 0x4da   : > { %v3225_v21 = vadd.f32 %v3164_v31, %v3082_v60  ;;  %v3089_v60 = vadd.f32 %v3071_v16, %v2946_v30 }
 0x4dc   : > { %v3289_v58 = vadd.f32 %v3264_v46, %v3225_v21 }
 0x4de   : > { %v3305_v2 = vmax.f32 %v3289_v58, 0.0 }
 0x4df   : > { %v3205_v25 = vpop.f32.mrf.mxu2 }
 0x4e1   : > { %v3167_v40 = vpop.f32.mrf.mxu1 }
 0x4e2   : > { %v3227_v37 = vadd.f32 %v3167_v40, %v3084_v23  ;;  %v3249_v23 = vpop.permute.xlu0 %3248  ;;  %v3083_v40 = vadd.f32 %v3062_v18, %v6976_v35  ;;  %v3224_v35 = vadd.f32 %v7000_v5, %v3081_v27 }
 0x4e3   : > { %v3283_v0 = vadd.f32 %v3249_v23, %v3219_v12 }
 0x4e4   : > { %v3291_v57 = vadd.f32 %v3269_v1, %v3227_v37 }
 0x4e5   : > { %v3299_v30 = vmax.f32 %v3283_v0, 0.0 }
 0x4e6   : > { %v3307_v32 = vmax.f32 %v3291_v57, 0.0 }
 0x4e7   : > { %v3208_v33 = vpop.f32.mrf.mxu2 }
 0x4e9   : > { %v3170_v3 = vpop.f32.mrf.mxu1 }
 0x4ea   : > { %v3229_v9 = vadd.f32 %v3170_v3, %v3086_v44  ;;  %v3228_v3 = vadd.f32 %v3208_v33, %v3085_v50  ;;  %v3226_v44 = vadd.f32 %v3205_v25, %v3083_v40  ;;  %v3220_v33 = vadd.f32 %v6994_v48, %v3077_v29 }
 0x4ec   : > { %v3293_v28 = vadd.f32 %v3274_v53, %v3229_v9  ;;  %v3292_v18 = vadd.f32 %v3269_v1, %v3228_v3  ;;  %v3290_v25 = vadd.f32 %v3264_v46, %v3226_v44  ;;  %v3314_v1 = vld [vmem:[%s7345_s8 + $0x8] sm:$0xff] }
 0x4ee   : > { %v3309_v61 = vmax.f32 %v3293_v28, 0.0  ;;  %v3308_v42 = vmax.f32 %v3292_v18, 0.0  ;;  %v3306_v5 = vmax.f32 %v3290_v25, 0.0 }
 0x4ef   : > { %v3211_v8 = vpop.f32.mrf.mxu2 }
 0x4f0   : > { %v3230_v31 = vadd.f32 %v3211_v8, %v3087_v52 }
 0x4f1   : > { %v3173_v34 = vpop.f32.mrf.mxu1 }
 0x4f2   : > { %v3231_v56 = vadd.f32 %v3173_v34, %v3088_v22  ;;  %v3294_v36 = vadd.f32 %v3274_v53, %v3230_v31  ;;  %v3288_v22 = vadd.f32 %v7006_v41, %v3224_v35  ;;  %v3284_v53 = vadd.f32 %v3249_v23, %v3220_v33 }
 0x4f3   : > { %v3298_v41 = vmax.f32 %v3282_v38, 0.0 }
 0x4f4   : > { %v3295_v15 = vadd.f32 %v3279_v13, %v3231_v56  ;;  %v3304_v49 = vmax.f32 %v3288_v22, 0.0  ;;  %v3300_v48 = vmax.f32 %v3284_v53, 0.0 }
 0x4f6   : > { %v3311_v59 = vmax.f32 %v3295_v15, 0.0 }
 0x4f7   : > { %v3214_v11 = vpop.f32.mrf.mxu2 }
 0x4f8   : > { %3330 = vmatpush.msrb.mxu3 %v3311_v59  ;;  %v3232_v47 = vadd.f32 %v3214_v11, %v3089_v60 }
 0x4fa   : > { %3331 = vmatpush.msrb.mxu3 %v3309_v61  ;;  %v3296_v51 = vadd.f32 %v3279_v13, %v3232_v47  ;;  %v3310_v13 = vmax.f32 %v3294_v36, 0.0  ;;  %v7082_v47 = vperm.slane %v3368_v4, 1 }
 0x4fc   : > { %3332 = vmatpush.msrb.mxu3 %v3307_v32  ;;  %v3312_v20 = vmax.f32 %v3296_v51, 0.0 }
 0x4fe   : > { %3333 = vmatpush.msrb.mxu3 %v3305_v2 }
 0x500   : > { %3334 = vmatpush.msrb.mxu3 %v3303_v10 }
 0x502   : > { %3335 = vmatpush.msrb.mxu3 %v3301_v6  ;;  %v4381_v6 = vld [vmem:[%s7339_s2 + $0x1] ss:$2 sm:$0x3] }
 0x503   : > { %v7090_v27 = vperm.slane %v4381_v6, 0 }
 0x504   : > { %3336 = vmatpush.msrb.mxu3 %v3299_v30 }
 0x506   : > { %3337 = vmatpush.msrb.mxu3 %v3297_v7 }
 0x507   : > { %4377 = vmatmul.msk.f32.vlgmr.msrb.gmra.mxu3 %vm3315_vm2, %v3313_v63 }
 0x508   : > { %3353 = vmatpush.msra.mxu3 %v3312_v20 }
 0x50a   : > { %3354 = vmatpush.msra.mxu3 %v3310_v13 }
 0x50c   : > { %3355 = vmatpush.msra.mxu3 %v3308_v42 }
 0x50e   : > { %3356 = vmatpush.msra.mxu3 %v3306_v5 }
 0x50f   : > { %4378 = vmatmul.msk.f32.gmra.mxu3 %vm3315_vm2, %v3314_v1 }
 0x510   : > { %3357 = vmatpush.msra.mxu3 %v3304_v49 }
 0x512   : > { %3358 = vmatpush.msra.mxu3 %v3302_v17 }
 0x514   : > { %3359 = vmatpush.msra.mxu3 %v3300_v48 }
 0x516   : > { %3360 = vmatpush.msra.mxu3 %v3298_v41 }
 0x517   : > { %4379 = vmatmul.msk.f32.vlgmr.msra.gmra.mxu3 %vm3315_vm2, %v3313_v63 }
 0x51f   : > { %4380 = vmatmul.msk.f32.gmra.mxu3 %vm3315_vm2, %v3314_v1 }
 0x58a   : > { %v7035_v9 = vpop.f32.mrf.mxu3 }
 0x58b   : > { %3597 = vrot.lane.b32.xlu2 %v7035_v9, %s4533_s17  ;;  %3483 = vrot.lane.b32.xlu1 %v7035_v9, %s4534_s22  ;;  %v3376_v37 = vrot.slane %v7035_v9, 7  ;;  %v3502_v1 = vrot.slane %v7035_v9, 2 }
 0x592   : > { %v7040_v24 = vpop.f32.mrf.mxu3 }
 0x593   : > { %3585 = vrot.lane.b32.xlu2 %v7035_v9, %s4535_s19  ;;  %v3619_v8 = vrot.slane %v7040_v24, 3  ;;  %v3508_v34 = vrot.slane %v7040_v24, 4  ;;  %v3404_v46 = vrot.slane %v7040_v24, 5  ;;  %v3421_v21 = vrot.slane %v7040_v24, 7 }
 0x594   : > { %v3529_v15 = vrot.slane %v7040_v24, 6 }
 0x595   : > { %3621 = vrot.lane.b32.xlu1 %v3619_v8, %s4536_s23  ;;  %3510 = vrot.lane.b32.xlu0 %v3508_v34, %s4537_s24 }
 0x59a   : > { %v7046_v56 = vpop.f32.mrf.mxu3 }
 0x59b   : > { %3378 = vrot.lane.b32.xlu2 %v3376_v37, %s4536_s23  ;;  %v3377_v59 = vrot.slane %v7046_v56, 7 }
 0x59d   : > { %3406 = vrot.lane.b32.xlu0 %v3404_v46, %s4538_s25  ;;  %3599 = vrot.lane.b32.xlu1 %v7046_v56, %s4533_s17 }
 0x5a2   : > { %v7051_v28 = vpop.f32.mrf.mxu3 }
 0x5a3   : > { %3423 = vrot.lane.b32.xlu2 %v3421_v21, %s4539_s26  ;;  %v3509_v45 = vrot.slane %v7051_v28, 4  ;;  %v3405_v57 = vrot.slane %v7051_v28, 5  ;;  %v3530_v55 = vrot.slane %v7051_v28, 6  ;;  %v3620_v58 = vrot.slane %v7051_v28, 3 }
 0x5a4   : > { %v3422_v61 = vrot.slane %v7051_v28, 7 }
 0x5a5   : > { %3531 = vrot.lane.b32.xlu0 %v3529_v15, %s4538_s25  ;;  %3512 = vrot.lane.b32.xlu1 %v3509_v45, %s4537_s24 }
 0x5ab   : > { %3485 = vrot.lane.b32.xlu2 %v7046_v56, %s4534_s22 }
 0x5ad   : > { %3681 = vrot.lane.b32.xlu0 %v7046_v56, %s4540_s27  ;;  %3408 = vrot.lane.b32.xlu1 %v3405_v57, %s4538_s25 }
 0x5b3   : > { %3587 = vrot.lane.b32.xlu2 %v7046_v56, %s4535_s19 }
 0x5b5   : > { %3380 = vrot.lane.b32.xlu0 %v3377_v59, %s4536_s23  ;;  %3533 = vrot.lane.b32.xlu1 %v3530_v55, %s4538_s25  ;;  %v7115_v55 = vstv %s3371_s13 }
 0x5bb   : > { %3623 = vrot.lane.b32.xlu2 %v3620_v58, %s4536_s23 }
 0x5bd   : > { %3425 = vrot.lane.b32.xlu0 %v3422_v61, %s4539_s26  ;;  %3702 = vrot.lane.b32.xlu1 %v7051_v28, %s4534_s22  ;;  %v3495_v61 = vperm.slane %v4381_v6, 1  ;;  %v3503_v6 = vrot.slane %v7046_v56, 2 }
 0x5c3   : > { %3700 = vrot.lane.b32.xlu2 %v7040_v24, %s4534_s22 }
 0x5c5   : > { %3679 = vrot.lane.b32.xlu0 %v7035_v9, %s4540_s27 }
 0x5e5   : > { %v3598_v16 = vpop.permute.xlu2 %3597 }
 0x5ed   : > { %v3586_v26 = vpop.permute.xlu2 %3585 }
 0x5f5   : > { %v7069_v12 = vpop.permute.xlu2 %3378 }
 0x5f6   : > { %v3386_v52 = vsel %vm3382_vm3, 0.0, %v7069_v12 }
 0x5f7   : > { %v3392_v39 = vmul.f32 %v3388_v19, %v3386_v52 }
 0x5f9   : > { %v3396_v3 = vrot.slane %v3392_v39, 3 }
 0x5fb   : > { %v3400_v54 = vadd.f32 %v3396_v3, %v7035_v9 }
 0x5fd   : > { %v7071_v14 = vpop.permute.xlu2 %3423  ;;  %v3484_v32 = vpop.permute.xlu1 %3483 }
 0x5fe   : > { %v3431_v62 = vsel %vm3427_vm7, 0.0, %v7071_v14 }
 0x5ff   : > { %v3432_v13 = vmul.f32 %v3431_v62, %v3388_v19 }
 0x601   : > { %v3436_v41 = vrot.slane %v3432_v13, 3 }
 0x605   : > { %v7073_v23 = vpop.permute.xlu2 %3485 }
 0x606   : > { %v3488_v20 = vsel %vm3487_vm9, %v3484_v32, %v7073_v23  ;;  %v3492_v32 = vsel %vm3491_vm12, %v7073_v23, 0.0 }
 0x607   : > { %v3622_v11 = vpop.permute.xlu1 %3621  ;;  %v3511_v60 = vpop.permute.xlu0 %3510  ;;  %v3498_v43 = vmul.f32 %v7090_v27, %v3488_v20 }
 0x608   : > { %v3518_v35 = vsel %vm3514_vm8, 0.0, %v3511_v60  ;;  %v3628_v49 = vsel %vm3382_vm3, 0.0, %v3622_v11 }
 0x609   : > { %v3519_v33 = vmul.f32 %v3518_v35, %v7090_v27  ;;  %v3506_v21 = vadd.f32 %v3502_v1, %v3498_v43  ;;  %v3629_v9 = vmul.f32 %v3628_v49, %v3388_v19 }
 0x60b   : > { %v3523_v8 = vrot.slane %v3519_v33, 4  ;;  %v3633_v4 = vrot.slane %v3629_v9, 7 }
 0x60d   : > { %v3588_v2 = vpop.permute.xlu2 %3587 }
 0x60e   : > { %v7101_v22 = vsel %vm3593_vm10, %v3588_v2, 0.0  ;;  %v7107_v38 = vsel %vm3589_vm11, %v3586_v26, %v3588_v2 }
 0x60f   : > { %v7080_v0 = vpop.permute.xlu0 %3406  ;;  %v3600_v10 = vpop.permute.xlu1 %3599 }
 0x610   : > { %v3606_v50 = vsel %vm3605_vm4, %v3600_v10, 0.0  ;;  %v3602_v31 = vsel %vm3601_vm5, %v3598_v16, %v3600_v10  ;;  %v3413_v51 = vsel %vm3410_vm6, 0.0, %v7080_v0  ;;  %v3527_v16 = vadd.f32 %v3523_v8, %v3506_v21 }
 0x611   : > { %v3608_v40 = vmul.f32 %v3606_v50, %v7082_v47  ;;  %v3607_v7 = vmul.f32 %v3602_v31, %v3388_v19  ;;  %v3415_v29 = vrot.slane %v3413_v51, 3  ;;  %v3499_v10 = vmul.f32 %v3495_v61, %v3492_v32 }
 0x613   : > { %v3612_v18 = vrot.slane %v3608_v40, 2  ;;  %v3611_v42 = vrot.slane %v3607_v7, 2  ;;  %v3419_v53 = vadd.f32 %v3415_v29, %v3400_v54 }
 0x615   : > { %v3624_v30 = vpop.permute.xlu2 %3623  ;;  %v3616_v5 = vadd.f32 %v3612_v18, %v7101_v22  ;;  %v3615_v34 = vadd.f32 %v3611_v42, %v7107_v38  ;;  %v3440_v45 = vadd.f32 %v3436_v41, %v3419_v53 }
 0x616   : > { %v3625_v44 = vsel %vm3382_vm3, %v3622_v11, %v3624_v30 }
 0x617   : > { %v3532_v36 = vpop.permute.xlu0 %3531  ;;  %v3513_v63 = vpop.permute.xlu1 %3512  ;;  %v3630_v25 = vmul.f32 %v3625_v44, %v7082_v47  ;;  %v3618_v15 = vadd.f32 %v3616_v5, %v7051_v28  ;;  %v3617_v26 = vadd.f32 %v3615_v34, %v7040_v24  ;;  %v3443_v2 = vadd.f32 %v7115_v55, %v3440_v45 }
 0x618   : > { %v3537_v48 = vsel %vm3410_vm6, 0.0, %v3532_v36  ;;  %v3515_v59 = vsel %vm3514_vm8, %v3511_v60, %v3513_v63  ;;  %v3507_v63 = vadd.f32 %v3503_v6, %v3499_v10  ;;  %v3712_v6 = vrot.slane %v7040_v24, 2 }
 0x619   : > { %v3634_v17 = vrot.slane %v3630_v25, 7  ;;  %v3539_v57 = vrot.slane %v3537_v48, 4  ;;  %v3520_v11 = vmul.f32 %v3515_v59, %v3495_v61  ;;  %v3637_v50 = vadd.f32 %v3633_v4, %v3617_v26 }
 0x61a   : > { %v4382_v40 = vmul.f32 -1.442695, %v3443_v2 }
 0x61b   : > { %v3638_v58 = vadd.f32 %v3634_v17, %v3618_v15  ;;  %v3543_v52 = vadd.f32 %v3539_v57, %v3527_v16  ;;  %v3524_v31 = vrot.slane %v3520_v11, 4  ;;  %v3639_v62 = vadd.f32 %v3637_v50, %v7115_v55 }
 0x61c   : > { %4472 = vpow2.f32 %v4382_v40  ;;  %v3713_v57 = vrot.slane %v7051_v28, 2 }
 0x61d   : > { %v3640_v19 = vadd.f32 %v3638_v58, %v7115_v55  ;;  %v3545_v30 = vadd.f32 %v3543_v52, %v7115_v55  ;;  %v3528_v35 = vadd.f32 %v3524_v31, %v3507_v63  ;;  %v4386_v54 = vmul.f32 -1.442695, %v3639_v62 }
 0x61f   : > { %v7111_v37 = vpop.permute.xlu0 %3681  ;;  %v3409_v46 = vpop.permute.xlu1 %3408  ;;  %v4387_v51 = vmul.f32 -1.442695, %v3640_v19  ;;  %v4384_v18 = vmul.f32 -1.442695, %v3545_v30 }
 0x620   : > { %v3688_v25 = vsel %vm3687_vm13, %v7111_v37, 0.0 }
 0x621   : > { %4474 = vpow2.f32 %v4387_v51  ;;  %v3690_v5 = vmul.f32 %v3688_v25, %v3495_v61 }
 0x622   : > { %4476 = vpow2.f32 %v4384_v18  ;;  %v4473_v17 = vpop.eup %4472 }
 0x623   : > { %4478 = vpow2.f32 %v4386_v54 }
 0x627   : > { %v3381_v60 = vpop.permute.xlu0 %3380  ;;  %v3534_v39 = vpop.permute.xlu1 %3533 }
 0x628   : > { %v3383_v23 = vsel %vm3382_vm3, %v7069_v12, %v3381_v60  ;;  %v3535_v3 = vsel %vm3410_vm6, %v3532_v36, %v3534_v39  ;;  %v3411_v12 = vsel %vm3410_vm6, %v7080_v0, %v3409_v46  ;;  %v4475_v48 = vpop.eup %4474  ;;  %v3695_v0 = vrot.slane %v7101_v22, 2 }
 0x629   : > { %v3393_v7 = vmul.f32 %v7082_v47, %v3383_v23  ;;  %v3540_v44 = vrot.slane %v3535_v3, 4  ;;  %v3416_v1 = vrot.slane %v3411_v12, 3  ;;  %v4477_v21 = vpop.eup %4476  ;;  %v7141_v15 = vadd.f32 1.0, %v4475_v48 }
 0x62a   : > { %v3699_v34 = vadd.f32 %v3695_v0, %v3690_v5  ;;  %v4479_v59 = vpop.eup %4478  ;;  %v7147_v26 = vadd.f32 1.0, %v4477_v21 }
 0x62b   : > { %v3397_v20 = vrot.slane %v3393_v7, 3  ;;  %v3544_v29 = vadd.f32 %v3540_v44, %v3528_v35  ;;  %v7156_v19 = vadd.f32 1.0, %v4479_v59  ;;  %v3673_v5 = vand.u32 2147483647, %v7141_v15 }
 0x62c   : > { %vm3669_vm1 = vweird.f32 %v7141_v15  ;;  %v3564_v48 = vand.u32 2147483647, %v7147_v26  ;;  %v3566_v0 = vand.u32 2147483648, %v7147_v26  ;;  %vm3560_vm3 = vweird.f32 %v7147_v26 }
 0x62d   : > { %v3401_v13 = vadd.f32 %v3397_v20, %v7046_v56  ;;  %v3546_v42 = vadd.f32 %v3544_v29, %v7115_v55  ;;  %vm3654_vm13 = vweird.f32 %v7156_v19 }
 0x62f   : > { %v3426_v36 = vpop.permute.xlu0 %3425  ;;  %v4385_v53 = vmul.f32 -1.442695, %v3546_v42  ;;  %v3703_v49 = vpop.permute.xlu1 %3702  ;;  %v3420_v41 = vadd.f32 %v3416_v1, %v3401_v13 }
 0x630   : > { %v3428_v33 = vsel %vm3427_vm7, %v7071_v14, %v3426_v36  ;;  %v3707_v56 = vsel %vm3491_vm12, %v3703_v49, 0.0  ;;  %v7139_v14 = vadd.f32 1.0, %v4473_v17  ;;  %v3675_v17 = vand.u32 2147483648, %v7141_v15 }
 0x631   : > { %v3433_v43 = vmul.f32 %v3428_v33, %v7082_v47  ;;  %4480 = vpow2.f32 %v4385_v53  ;;  %v3709_v47 = vmul.f32 %v3707_v56, %v3495_v61  ;;  %v3701_v61 = vpop.permute.xlu2 %3700  ;;  %vm7217_vm7 = vcmp.eq.f32.partialorder %v3673_v5, 8.507059e+37 }
 0x632   : > { %4482 = vrcp.f32 %v7139_v14  ;;  %v3704_v28 = vsel %vm3487_vm9, %v3701_v61, %v3703_v49  ;;  %v3464_v35 = vand.u32 2147483648, %v7139_v14  ;;  %v3462_v13 = vand.u32 2147483647, %v7139_v14 }
 0x633   : > { %v3437_v8 = vrot.slane %v3433_v43, 3  ;;  %v3711_v22 = vadd.f32 %v3709_v47, %v3699_v34  ;;  %4484 = vrcp.f32 %v7141_v15  ;;  %v3708_v50 = vmul.f32 %v3704_v28, %v7090_v27 }
 0x634   : > { %v7192_v33 = vor.u32 1.1754944e-38, %v3464_v35  ;;  %v3660_v43 = vand.u32 2147483648, %v7156_v19  ;;  %vm3458_vm4 = vweird.f32 %v7139_v14  ;;  %vm7232_vm12 = vcmp.eq.f32.partialorder %v3462_v13, 8.507059e+37 }
 0x635   : > { %v3441_v46 = vadd.f32 %v3437_v8, %v3420_v41  ;;  %v3717_v11 = vadd.f32 %v3713_v57, %v3711_v22 }
 0x637   : > { %v3680_v9 = vpop.permute.xlu0 %3679  ;;  %v3444_v45 = vadd.f32 %v7115_v55, %v3441_v46  ;;  %v4481_v16 = vpop.eup %4480  ;;  %v3719_v52 = vadd.f32 %v3717_v11, %v7115_v55 }
 0x638   : > { %v3684_v58 = vsel %vm3683_vm14, %v3680_v9, %v7111_v37  ;;  %v7150_v4 = vadd.f32 1.0, %v4481_v16  ;;  %v3694_v37 = vrot.slane %v7107_v38, 2  ;;  %v7161_v39 = vpop.eup %4482 }
 0x639   : > { %v4383_v32 = vmul.f32 -1.442695, %v3444_v45  ;;  %v3689_v2 = vmul.f32 %v3684_v58, %v7090_v27  ;;  %v4389_v10 = vmul.f32 -1.442695, %v3719_v52  ;;  %v7163_v31 = vpop.eup %4484  ;;  %v3454_v7 = vmul.f32 %v7161_v39, %v7139_v14 }
 0x63a   : > { %v3665_v24 = vmul.f32 %v7163_v31, %v7141_v15  ;;  %vm3459_vm15 = vweird.f32 %v7161_v39  ;;  %vm3670_vm2 = vweird.f32 %v7163_v31  ;;  %vm3575_vm9 = vweird.f32 %v7150_v4 }
 0x63b   : > { %4486 = vpow2.f32 %v4383_v32  ;;  %v3698_v60 = vadd.f32 %v3694_v37, %v3689_v2  ;;  %v3455_v25 = vsub.f32 1.0, %v3454_v7  ;;  %v3581_v58 = vand.u32 2147483648, %v7150_v4 }
 0x63c   : > { %4488 = vrcp.f32 %v7150_v4  ;;  %v3666_v36 = vsub.f32 1.0, %v3665_v24  ;;  %v3579_v61 = vand.u32 2147483647, %v7150_v4 }
 0x63d   : > { %4490 = vrcp.f32 %v7147_v26  ;;  %v3710_v38 = vadd.f32 %v3708_v50, %v3698_v60  ;;  %v3456_v49 = vmul.f32 %v7161_v39, %v3455_v25 }
 0x63e   : > { %4492 = vpow2.f32 %v4389_v10  ;;  %v3667_v8 = vmul.f32 %v7163_v31, %v3666_v36  ;;  %v3658_v36 = vand.u32 2147483647, %v7156_v19 }
 0x63f   : > { %4494 = vrcp.f32 %v7156_v19  ;;  %v3716_v3 = vadd.f32 %v3712_v6, %v3710_v38  ;;  %v3457_v6 = vadd.f32 %v7161_v39, %v3456_v49 }
 0x640   : > { %v3668_v52 = vadd.f32 %v7163_v31, %v3667_v8 }
 0x641   : > { %v4487_v40 = vpop.eup %4486  ;;  %v3718_v63 = vadd.f32 %v3716_v3, %v7115_v55 }
 0x642   : > { %v7167_v30 = vpop.eup %4488  ;;  %v7169_v23 = vadd.f32 1.0, %v4487_v40 }
 0x643   : > { %v7171_v51 = vpop.eup %4490  ;;  %v3571_v27 = vmul.f32 %v7167_v30, %v7150_v4  ;;  %v4388_v54 = vmul.f32 -1.442695, %v3718_v63  ;;  %vm3576_vm5 = vweird.f32 %v7167_v30 }
 0x644   : > { %4496 = vrcp.f32 %v7169_v23  ;;  %v4493_v44 = vpop.eup %4492  ;;  %v3556_v18 = vmul.f32 %v7171_v51, %v7147_v26  ;;  %v3477_v47 = vand.u32 2147483647, %v7169_v23  ;;  %v3479_v21 = vand.u32 2147483648, %v7169_v23  ;;  %vm7227_vm11 = vmor %vm3575_vm9, %vm3576_vm5 }
 0x645   : > { %v7181_v62 = vpop.eup %4494  ;;  %v7186_v20 = vadd.f32 1.0, %v4493_v44  ;;  %v3572_v29 = vsub.f32 1.0, %v3571_v27  ;;  %vm3561_vm8 = vweird.f32 %v7171_v51  ;;  %vm3473_vm10 = vweird.f32 %v7169_v23 }
 0x646   : > { %v3650_v12 = vmul.f32 %v7181_v62, %v7156_v19  ;;  %v3557_v42 = vsub.f32 1.0, %v3556_v18  ;;  %v3480_v10 = vor.u32 1.1754944e-38, %v3479_v21  ;;  %vm3478_vm5 = vcmp.eq.f32.partialorder %v3477_v47, 8.507059e+37 }
 0x647   : > { %4498 = vrcp.f32 %v7186_v20  ;;  %v3573_v53 = vmul.f32 %v7167_v30, %v3572_v29  ;;  %v3676_v27 = vor.u32 1.1754944e-38, %v3675_v17  ;;  %vm3784_vm9 = vcmask 1041408  }
 0x648   : > { %4500 = vpow2.f32 %v4388_v54  ;;  %v3651_v41 = vsub.f32 1.0, %v3650_v12  ;;  %v3558_v46 = vmul.f32 %v7171_v51, %v3557_v42  ;;  %v3754_v24 = vand.u32 2147483648, %v7186_v20 }
 0x649   : > { %v3574_v57 = vadd.f32 %v7167_v30, %v3573_v53  ;;  %v3752_v35 = vand.u32 2147483647, %v7186_v20  ;;  %v3567_v54 = vor.u32 1.1754944e-38, %v3566_v0 }
 0x64a   : > { %v4497_v55 = vpop.eup %4496  ;;  %v3559_v37 = vadd.f32 %v7171_v51, %v3558_v46  ;;  %v3652_v38 = vmul.f32 %v7181_v62, %v3651_v41  ;;  %v3755_v42 = vor.u32 1.1754944e-38, %v3754_v24 }
 0x64b   : > { %v3469_v1 = vmul.f32 %v4497_v55, %v7169_v23  ;;  %vm3474_vm6 = vweird.f32 %v4497_v55  ;;  %v3578_v4 = vsel %vm7227_vm11, %v7167_v30, %v3574_v57  ;;  %v3582_v23 = vor.u32 1.1754944e-38, %v3581_v58 }
 0x64c   : > { %vm3475_vm14 = vmor %vm3473_vm10, %vm3474_vm6  ;;  %vm3580_vm10 = vcmp.eq.f32.partialorder %v3579_v61, 8.507059e+37  ;;  %v3653_v14 = vadd.f32 %v7181_v62, %v3652_v38 }
 0x64d   : > { %v3470_v56 = vsub.f32 1.0, %v3469_v1  ;;  %v7207_v34 = vpop.eup %4498  ;;  %vm7251_vm6 = vmor %vm3669_vm1, %vm3670_vm2  ;;  %v3583_v44 = vsel %vm3580_vm10, %v3582_v23, %v3578_v4  ;;  %vm3793_vm10 = vcmask 1043456  }
 0x64e   : > { %v4501_v9 = vpop.eup %4500  ;;  %v3744_v22 = vmul.f32 %v7207_v34, %v7186_v20  ;;  %vm3749_vm11 = vweird.f32 %v7207_v34  ;;  %v3672_v7 = vsel %vm7251_vm6, %v7163_v31, %v3668_v52  ;;  %vm7265_vm1 = vmor %vm3560_vm3, %vm3561_vm8  ;;  %vm3748_vm3 = vweird.f32 %v7186_v20 }
 0x64f   : > { %v3471_v45 = vmul.f32 %v4497_v55, %v3470_v56  ;;  %v7224_v16 = vadd.f32 1.0, %v4501_v9  ;;  %vm7274_vm2 = vmor %vm3458_vm4, %vm3459_vm15  ;;  %v3563_v26 = vsel %vm7265_vm1, %v7171_v51, %v3559_v37  ;;  %vm3565_vm15 = vcmp.eq.f32.partialorder %v3564_v48, 8.507059e+37 }
 0x650   : > { %v3745_v2 = vsub.f32 1.0, %v3744_v22  ;;  %v3461_v29 = vsel %vm7274_vm2, %v7161_v39, %v3457_v6  ;;  %vm7289_vm4 = vmor %vm3748_vm3, %vm3749_vm11  ;;  %v3677_v51 = vsel %vm7217_vm7, %v3676_v27, %v3672_v7  ;;  %v3767_v12 = vrot.slane %v3583_v44, 3 }
 0x651   : > { %v3472_v32 = vadd.f32 %v4497_v55, %v3471_v45  ;;  %4502 = vrcp.f32 %v7224_v16  ;;  %v3568_v13 = vsel %vm3565_vm15, %v3567_v54, %v3563_v26  ;;  %v3466_v5 = vsel %vm7232_vm12, %v7192_v33, %v3461_v29 }
 0x652   : > { %v3746_v60 = vmul.f32 %v7207_v34, %v3745_v2  ;;  %vm3753_vm8 = vcmp.eq.f32.partialorder %v3752_v35, 8.507059e+37  ;;  %v3773_v17 = vrot.slane %v3677_v51, 7  ;;  %v3739_v33 = vand.u32 2147483648, %v7224_v16 }
 0x653   : > { %v3476_v50 = vsel %vm3475_vm14, %v4497_v55, %v3472_v32  ;;  %vm3655_vm14 = vweird.f32 %v7181_v62  ;;  %v3661_v55 = vor.u32 1.1754944e-38, %v3660_v43  ;;  %v3766_v0 = vrot.slane %v3568_v13, 3 }
 0x654   : > { %v3481_v40 = vsel %vm3478_vm5, %v3480_v10, %v3476_v50  ;;  %v3747_v30 = vadd.f32 %v7207_v34, %v3746_v60  ;;  %vm7310_vm7 = vmor %vm3654_vm13, %vm3655_vm14  ;;  %v3737_v41 = vand.u32 2147483647, %v7224_v16  ;;  %v3760_v8 = vrot.slane %v3466_v5, 5 }
 0x655   : > { %v3761_v31 = vrot.slane %v3481_v40, 5  ;;  %v3657_v43 = vsel %vm7310_vm7, %v7181_v62, %v3653_v14  ;;  %vm3659_vm13 = vcmp.eq.f32.partialorder %v3658_v36, 8.507059e+37  ;;  %vm3787_vm5 = vcmask 1042432  }
 0x656   : > { %v3751_v20 = vsel %vm7289_vm4, %v7207_v34, %v3747_v30  ;;  %v3662_v34 = vsel %vm3659_vm13, %v3661_v55, %v3657_v43  ;;  %vm3733_vm6 = vweird.f32 %v7224_v16  ;;  %vm3796_vm11 = vcmask 556036  }
 0x657   : > { %v4503_v18 = vpop.eup %4502  ;;  %v3783_v53 = vsel %vm1030_vm0, %v3761_v31, %v3767_v12  ;;  %v3756_v48 = vsel %vm3753_vm8, %v3755_v42, %v3751_v20  ;;  %v3740_v62 = vor.u32 1.1754944e-38, %v3739_v33  ;;  %v3782_v21 = vsel %vm1030_vm0, %v3760_v8, %v3766_v0  ;;  %vm3797_vm2 = vmor %vm3796_vm11, %vm3793_vm10 }
 0x658   : > { %v3729_v39 = vmul.f32 %v4503_v18, %v7224_v16  ;;  %vm3734_vm12 = vweird.f32 %v4503_v18  ;;  %v3786_v56 = vsel %vm3784_vm9, %v3783_v53, %v3773_v17  ;;  %v3779_v46 = vrot.slane %v3756_v48, 5 }
 0x659   : > { %vm3735_vm14 = vmor %vm3733_vm6, %vm3734_vm12  ;;  %vm3738_vm1 = vcmp.eq.f32.partialorder %v3737_v41, 8.507059e+37  ;;  %v3772_v57 = vrot.slane %v3662_v34, 7 }
 0x65a   : > { %v3730_v49 = vsub.f32 1.0, %v3729_v39  ;;  %v3789_v9 = vsel %vm3787_vm5, %v3786_v56, %v3779_v46 }
 0x65b   : > { %v3785_v58 = vsel %vm3784_vm9, %v3782_v21, %v3772_v57  ;;  %v3792_v32 = vrot.slane %v3789_v9, 4 }
 0x65c   : > { %v3731_v19 = vmul.f32 %v4503_v18, %v3730_v49 }
 0x65e   : > { %v3732_v47 = vadd.f32 %v4503_v18, %v3731_v19 }
 0x660   : > { %v3736_v45 = vsel %vm3735_vm14, %v4503_v18, %v3732_v47 }
 0x661   : > { %v3741_v22 = vsel %vm3738_vm1, %v3740_v62, %v3736_v45 }
 0x662   : > { %v3778_v59 = vrot.slane %v3741_v22, 5 }
 0x664   : > { %v3788_v16 = vsel %vm3787_vm5, %v3785_v58, %v3778_v59 }
 0x665   : > { %v3794_v11 = vsel %vm3793_vm10, %v3788_v16, %v3792_v32 }
 0x666   : > { %3798 = vst.msk [vmem:[%s327_s16] sm:$0xff] %vm3797_vm2, %v3794_v11 }
 0x667 PF: > { %s21_s11 = sadd.s32 1, %s4529_s11  }
 0x668   : > { %p18_p7 = scmp.ge.s32.totalorder %s21_s11, 4  }
 0x66a   :  { %20 = sbr.rel (!%p18_p7) target bundleno = 3 (0x3), region = 105 }
 0x66f   :  { %3820 = vsyncpa [#allocation4], 1 }
 0x670   :  { %3822 = vsyncpa [#allocation4 + $0x1], 1 }

</bundles_post_ra>
